<compile_context>
chip_gen: v7x
topology: tpu7x:2x2x1
jax: 0.10.0
libtpu: 0.0.40
codegen_flags: <defaults>
</compile_context>

<pallas_src>
import functools
import math

import jax
import jax.numpy as jnp
from jax.experimental import pallas as pl
from jax.experimental.pallas import tpu as pltpu

_LANE = 128


def _cross_attention_kernel(l_valid,
                            q_ref, mem_ref,
                            wq_ref, wk_ref, wv_ref,
                            wp_ref, bp_ref,
                            x_ref, attn_ref):
    # q_ref:    (1, N, C)   bf16
    # mem_ref:  (1, Lp, E)  bf16   (key rows >= l_valid are zero padding)
    # wq_ref:   (C, C)      bf16   (scale pre-folded)
    # wk_ref:   (E, C)      bf16
    # wv_ref:   (E, C)      bf16
    # wp_ref:   (C, C)      bf16
    # bp_ref:   (1, C)      f32
    # x_ref:    (1, N, C)   f32 out
    # attn_ref: (1, H, N, Lp) f32 out (pre-softmax scores, lane-dense)
    N, C = x_ref.shape[1], x_ref.shape[2]
    H, Lp = attn_ref.shape[1], attn_ref.shape[3]
    Dh = C // H
    bf16 = jnp.bfloat16

    xq = q_ref[0]        # (N, C)  bf16
    mem = mem_ref[0]     # (Lp, E) bf16

    # Projections (bf16 operands, f32 accumulate on the MXU).
    q2 = jnp.dot(xq, wq_ref[...], preferred_element_type=jnp.float32)    # (N, C)
    k2 = jnp.dot(mem, wk_ref[...], preferred_element_type=jnp.float32)   # (Lp, C)
    v2 = jnp.dot(mem, wv_ref[...], preferred_element_type=jnp.float32)   # (Lp, C)

    # Head split (h-major along the channel axis, matching PyTorch reshape).
    q = q2.reshape(N, H, Dh).transpose(1, 0, 2).astype(bf16)     # (H, N, Dh)
    k = k2.reshape(Lp, H, Dh).transpose(1, 0, 2).astype(bf16)    # (H, Lp, Dh)
    v = v2.reshape(Lp, H, Dh).transpose(1, 0, 2).astype(bf16)    # (H, Lp, Dh)

    # Pre-softmax scores (scale already folded into Wq).
    s = jnp.einsum('hnd,hld->hnl', q, k,
                   preferred_element_type=jnp.float32)           # (H, N, Lp)
    attn_ref[0] = s.astype(attn_ref.dtype)                       # lane-dense store

    # Mask padded key columns (static trace-time condition).
    if l_valid != Lp:
        col = jax.lax.broadcasted_iota(jnp.int32, s.shape, 2)
        s = jnp.where(col < l_valid, s, jnp.float32(-1e30))

    # Softmax (f32; reciprocal goes to the EUP slot).
    s_max = jnp.max(s, axis=-1, keepdims=True)
    p = jnp.exp(s - s_max)
    p = p * pl.reciprocal(jnp.sum(p, axis=-1, keepdims=True), approx=True)

    # Attention-weighted values, head merge, output projection.
    ctx = jnp.einsum('hnl,hld->hnd', p.astype(bf16), v,
                     preferred_element_type=jnp.float32)         # (H, N, Dh)
    ctx = ctx.transpose(1, 0, 2).reshape(N, C).astype(bf16)      # (N, C)
    out = jnp.dot(ctx, wp_ref[...],
                  preferred_element_type=jnp.float32) + bp_ref[...]
    x_ref[0] = out.astype(x_ref.dtype)


def _nbytes(shape, dtype):
    return math.prod(shape) * jnp.dtype(dtype).itemsize


def cross_attention(query, memory, params, num_heads):
    """Pallas CrossAttention: returns (x, attn_wo_softmax)."""
    B, N, C = query.shape
    _, L, E = memory.shape
    H = num_heads
    Dh = C // H
    scale = float(Dh) ** -0.5
    bf16 = jnp.bfloat16

    # Pad kv length so the score dump's last dim is a multiple of 128.
    Lp = ((L + _LANE - 1) // _LANE) * _LANE
    if Lp != L:
        memory = jnp.pad(memory, ((0, 0), (0, Lp - L), (0, 0)))

    # Host-side prep: bf16 weights/activations, scale folded, Wkv split.
    q_in = query.astype(bf16)
    mem_in = memory.astype(bf16)
    wq = (params['wq'] * scale).astype(bf16)        # (C, C)
    wk = params['wkv'][:, :C].astype(bf16)          # (E, C)
    wv = params['wkv'][:, C:].astype(bf16)          # (E, C)
    wp = params['wproj'].astype(bf16)               # (C, C)
    bp = params['bproj'].reshape(1, C).astype(jnp.float32)

    in_specs = [
        pl.BlockSpec((1, N, C), lambda b: (b, 0, 0)),      # query
        pl.BlockSpec((1, Lp, E), lambda b: (b, 0, 0)),     # memory (padded)
        pl.BlockSpec((C, C), lambda b: (0, 0)),            # wq (scaled)
        pl.BlockSpec((E, C), lambda b: (0, 0)),            # wk
        pl.BlockSpec((E, C), lambda b: (0, 0)),            # wv
        pl.BlockSpec((C, C), lambda b: (0, 0)),            # wproj
        pl.BlockSpec((1, C), lambda b: (0, 0)),            # bproj
    ]
    out_specs = (
        pl.BlockSpec((1, N, C), lambda b: (b, 0, 0)),
        pl.BlockSpec((1, H, N, Lp), lambda b: (b, 0, 0, 0)),
    )
    out_shape = (
        jax.ShapeDtypeStruct((B, N, C), jnp.float32),
        jax.ShapeDtypeStruct((B, H, N, Lp), jnp.float32),
    )

    # Explicit VMEM budget: double-buffered blocks + headroom for intermediates.
    block_bytes = (
        _nbytes((1, N, C), bf16) + _nbytes((1, Lp, E), bf16)
        + 2 * _nbytes((C, C), bf16) + 2 * _nbytes((E, C), bf16)
        + _nbytes((1, C), jnp.float32)
        + _nbytes((1, N, C), jnp.float32) + _nbytes((1, H, N, Lp), jnp.float32)
    )
    vmem_limit = min(3 * block_bytes + (8 << 20), 64 << 20)

    fn = pl.pallas_call(
        functools.partial(_cross_attention_kernel, L),
        out_shape=out_shape,
        grid=(B,),
        in_specs=in_specs,
        out_specs=out_specs,
        compiler_params=pltpu.CompilerParams(
            dimension_semantics=("parallel",),
            vmem_limit_bytes=int(vmem_limit)),
    )
    x_out, attn_pad = fn(q_in, mem_in, wq, wk, wv, wp, bp)
    return x_out, attn_pad[..., :L]


# ------------------------- pure-JAX reference (f32) -------------------------
def cross_attention_ref(query, memory, p, num_heads):
    B, N, C = query.shape
    L = memory.shape[1]
    H = num_heads
    Dh = C // H
    scale = Dh ** -0.5

    q = (query @ p['wq']).reshape(B, N, H, Dh).transpose(0, 2, 1, 3)
    kv = memory @ p['wkv']
    k = kv[..., :C].reshape(B, L, H, Dh).transpose(0, 2, 1, 3)
    v = kv[..., C:].reshape(B, L, H, Dh).transpose(0, 2, 1, 3)

    s = jnp.einsum('bhnd,bhld->bhnl', q * scale, k)
    a = jax.nn.softmax(s, axis=-1)
    x = jnp.einsum('bhnl,bhld->bhnd', a, v).transpose(0, 2, 1, 3).reshape(B, N, C)
    x = x @ p['wproj'] + p['bproj']
    return x, s


# ------------------------- parameter init -------------------------
def init_params(key, qdim, kvdim):
    ks = jax.random.split(key, 4)
    std = 0.02
    f32 = jnp.float32
    return {
        'wq': std * jax.random.normal(ks[0], (qdim, qdim), f32),
        'wkv': std * jax.random.normal(ks[1], (kvdim, 2 * qdim), f32),
        'wproj': std * jax.random.normal(ks[2], (qdim, qdim), f32),
        'bproj': 0.01 * jax.random.normal(ks[3], (qdim,), f32),
    }


if __name__ == "__main__":
    B, N, L = 2, 8, 16
    qdim, kvdim, num_heads = 32, 48, 4

    key = jax.random.PRNGKey(0)
    kq, km, kp = jax.random.split(key, 3)
    query = jax.random.normal(kq, (B, N, qdim), jnp.float32)
    memory = jax.random.normal(km, (B, L, kvdim), jnp.float32)
    params = init_params(kp, qdim, kvdim)

    x_out, attn_out = cross_attention(query, memory, params, num_heads)
    x_out = jax.block_until_ready(x_out)
    attn_out = jax.block_until_ready(attn_out)

    x_ref, attn_ref = cross_attention_ref(query, memory, params, num_heads)
    assert x_out.shape == (B, N, qdim)
    assert attn_out.shape == (B, num_heads, N, L)
    assert jnp.allclose(x_out, x_ref, rtol=2e-2, atol=2e-3), "x mismatch"
    assert jnp.allclose(attn_out, attn_ref, rtol=2e-2, atol=2e-3), "attn mismatch"

    print("KERNEL_OK")
</pallas_src>

<mosaic_0001>
module attributes {stable_mosaic.version = 11 : i64} {
  func.func @_cross_attention_kernel(%arg0: i32, %arg1: memref<1x8x32xbf16, #tpu.memory_space<vmem>>, %arg2: memref<1x128x48xbf16, #tpu.memory_space<vmem>>, %arg3: memref<32x32xbf16, #tpu.memory_space<vmem>>, %arg4: memref<48x32xbf16, #tpu.memory_space<vmem>>, %arg5: memref<48x32xbf16, #tpu.memory_space<vmem>>, %arg6: memref<32x32xbf16, #tpu.memory_space<vmem>>, %arg7: memref<1x32xf32, #tpu.memory_space<vmem>>, %arg8: memref<1x8x32xf32, #tpu.memory_space<vmem>>, %arg9: memref<1x4x8x128xf32, #tpu.memory_space<vmem>>) attributes {dimension_semantics = [#tpu.dimension_semantics<parallel>], iteration_bounds = array<i64: 2>, scalar_prefetch = 0 : i64, scratch_operands = 0 : i64, tpu.core_type = #tpu.core_type<tc>, window_params = [{transform_indices = @transform_0, window_bounds = array<i64: 1, 8, 32>}, {transform_indices = @transform_1, window_bounds = array<i64: 1, 128, 48>}, {pipeline_mode = #tpu.pipeline_mode<synchronous>, transform_indices = @transform_2, window_bounds = array<i64: 32, 32>}, {pipeline_mode = #tpu.pipeline_mode<synchronous>, transform_indices = @transform_3, window_bounds = array<i64: 48, 32>}, {pipeline_mode = #tpu.pipeline_mode<synchronous>, transform_indices = @transform_4, window_bounds = array<i64: 48, 32>}, {pipeline_mode = #tpu.pipeline_mode<synchronous>, transform_indices = @transform_5, window_bounds = array<i64: 32, 32>}, {pipeline_mode = #tpu.pipeline_mode<synchronous>, transform_indices = @transform_6, window_bounds = array<i64: 1, 32>}, {transform_indices = @transform_7, window_bounds = array<i64: 1, 8, 32>}, {transform_indices = @transform_8, window_bounds = array<i64: 1, 4, 8, 128>}]} {
    %c0 = arith.constant 0 : index
    %c0_0 = arith.constant 0 : index
    %c0_1 = arith.constant 0 : index
    %0 = vector.load %arg1[%c0, %c0_0, %c0_1] : memref<1x8x32xbf16, #tpu.memory_space<vmem>>, vector<1x8x32xbf16>
    %1 = vector.shape_cast %0 : vector<1x8x32xbf16> to vector<8x32xbf16>
    %c0_2 = arith.constant 0 : index
    %c0_3 = arith.constant 0 : index
    %c0_4 = arith.constant 0 : index
    %2 = vector.load %arg2[%c0_2, %c0_3, %c0_4] : memref<1x128x48xbf16, #tpu.memory_space<vmem>>, vector<1x128x48xbf16>
    %3 = vector.shape_cast %2 : vector<1x128x48xbf16> to vector<128x48xbf16>
    %c0_5 = arith.constant 0 : index
    %c0_6 = arith.constant 0 : index
    %4 = vector.load %arg3[%c0_5, %c0_6] : memref<32x32xbf16, #tpu.memory_space<vmem>>, vector<32x32xbf16>
    %cst = arith.constant dense<0.000000e+00> : vector<8x32xf32>
    %5 = tpu.matmul %1, %4, %cst {dimension_numbers = #tpu.dot_dimension_numbers<[1], [0], [0], [1], [0, 0, 1, 1], [], []>} : vector<8x32xbf16>, vector<32x32xbf16>, vector<8x32xf32> -> vector<8x32xf32>
    %c0_7 = arith.constant 0 : index
    %c0_8 = arith.constant 0 : index
    %6 = vector.load %arg4[%c0_7, %c0_8] : memref<48x32xbf16, #tpu.memory_space<vmem>>, vector<48x32xbf16>
    %cst_9 = arith.constant dense<0.000000e+00> : vector<128x32xf32>
    %7 = tpu.matmul %3, %6, %cst_9 {dimension_numbers = #tpu.dot_dimension_numbers<[1], [0], [0], [1], [0, 0, 1, 1], [], []>} : vector<128x48xbf16>, vector<48x32xbf16>, vector<128x32xf32> -> vector<128x32xf32>
    %c0_10 = arith.constant 0 : index
    %c0_11 = arith.constant 0 : index
    %8 = vector.load %arg5[%c0_10, %c0_11] : memref<48x32xbf16, #tpu.memory_space<vmem>>, vector<48x32xbf16>
    %cst_12 = arith.constant dense<0.000000e+00> : vector<128x32xf32>
    %9 = tpu.matmul %3, %8, %cst_12 {dimension_numbers = #tpu.dot_dimension_numbers<[1], [0], [0], [1], [0, 0, 1, 1], [], []>} : vector<128x48xbf16>, vector<48x32xbf16>, vector<128x32xf32> -> vector<128x32xf32>
    %10 = vector.shape_cast %5 : vector<8x32xf32> to vector<8x4x8xf32>
    %11 = tpu.transpose %10, [1, 0, 2] : vector<8x4x8xf32> -> vector<4x8x8xf32>
    %12 = arith.truncf %11 : vector<4x8x8xf32> to vector<4x8x8xbf16>
    %13 = vector.shape_cast %7 : vector<128x32xf32> to vector<128x4x8xf32>
    %14 = tpu.transpose %13, [1, 0, 2] : vector<128x4x8xf32> -> vector<4x128x8xf32>
    %15 = arith.truncf %14 : vector<4x128x8xf32> to vector<4x128x8xbf16>
    %16 = vector.shape_cast %9 : vector<128x32xf32> to vector<128x4x8xf32>
    %17 = tpu.transpose %16, [1, 0, 2] : vector<128x4x8xf32> -> vector<4x128x8xf32>
    %18 = arith.truncf %17 : vector<4x128x8xf32> to vector<4x128x8xbf16>
    "tpu.trace_start"() <{level = 10 : i32, message = "hnd,hld->hnl"}> : () -> ()
    %cst_13 = arith.constant dense<0.000000e+00> : vector<4x8x128xf32>
    %19 = tpu.matmul %12, %15, %cst_13 {dimension_numbers = #tpu.dot_dimension_numbers<[2], [2], [1], [1], [0, 0, 0, 1, 1, 1], [0], [0]>} : vector<4x8x8xbf16>, vector<4x128x8xbf16>, vector<4x8x128xf32> -> vector<4x8x128xf32>
    "tpu.trace_stop"() : () -> ()
    %c0_14 = arith.constant 0 : index
    %c0_15 = arith.constant 0 : index
    %c0_16 = arith.constant 0 : index
    %c0_17 = arith.constant 0 : index
    %20 = vector.load %arg9[%c0_14, %c0_15, %c0_16, %c0_17] : memref<1x4x8x128xf32, #tpu.memory_space<vmem>>, vector<1x4x8x128xf32>
    %21 = vector.shape_cast %20 : vector<1x4x8x128xf32> to vector<4x8x128xf32>
    %22 = vector.shape_cast %19 : vector<4x8x128xf32> to vector<1x4x8x128xf32>
    tpu.vector_store %arg9[%c0_14, %c0_15, %c0_16, %c0_17], %22 {strides = array<i32>} : memref<1x4x8x128xf32, #tpu.memory_space<vmem>>, vector<1x4x8x128xf32>,
    %23 = tpu.iota {dimensions = array<i32: 2>} : vector<4x8x128xi32>
    %c16_i32 = arith.constant 16 : i32
    %24 = vector.broadcast %c16_i32 : i32 to vector<4x8x128xi32>
    %25 = arith.cmpi slt, %23, %24 : vector<4x8x128xi32>
    %cst_18 = arith.constant -1.000000e+30 : f32
    %26 = vector.broadcast %cst_18 : f32 to vector<4x8x128xf32>
    %27 = arith.select %25, %19, %26 : vector<4x8x128xi1>, vector<4x8x128xf32>
    %cst_19 = arith.constant dense<0xFF800000> : vector<4x8xf32>
    %28 = vector.multi_reduction <maximumf>, %27, %cst_19 [2] : vector<4x8x128xf32> to vector<4x8xf32>
    %29 = vector.shape_cast %28 : vector<4x8xf32> to vector<4x8x1xf32>
    %30 = vector.broadcast %29 : vector<4x8x1xf32> to vector<4x8x128xf32>
    %31 = arith.subf %27, %30 : vector<4x8x128xf32>
    %32 = math.exp %31 : vector<4x8x128xf32>
    %cst_20 = arith.constant dense<0.000000e+00> : vector<4x8xf32>
    %33 = vector.multi_reduction <add>, %32, %cst_20 [2] : vector<4x8x128xf32> to vector<4x8xf32>
    %34 = vector.shape_cast %33 : vector<4x8xf32> to vector<4x8x1xf32>
    %35 = tpu.reciprocal %34 {approx = true} : vector<4x8x1xf32> -> vector<4x8x1xf32>
    %36 = vector.broadcast %35 : vector<4x8x1xf32> to vector<4x8x128xf32>
    %37 = arith.mulf %32, %36 : vector<4x8x128xf32>
    %38 = arith.truncf %37 : vector<4x8x128xf32> to vector<4x8x128xbf16>
    "tpu.trace_start"() <{level = 10 : i32, message = "hnl,hld->hnd"}> : () -> ()
    %cst_21 = arith.constant dense<0.000000e+00> : vector<4x8x8xf32>
    %39 = tpu.matmul %38, %18, %cst_21 {dimension_numbers = #tpu.dot_dimension_numbers<[2], [1], [1], [2], [0, 0, 0, 1, 1, 2], [0], [0]>} : vector<4x8x128xbf16>, vector<4x128x8xbf16>, vector<4x8x8xf32> -> vector<4x8x8xf32>
    "tpu.trace_stop"() : () -> ()
    %40 = tpu.transpose %39, [1, 0, 2] : vector<4x8x8xf32> -> vector<8x4x8xf32>
    %41 = vector.shape_cast %40 : vector<8x4x8xf32> to vector<8x32xf32>
    %42 = arith.truncf %41 : vector<8x32xf32> to vector<8x32xbf16>
    %c0_22 = arith.constant 0 : index
    %c0_23 = arith.constant 0 : index
    %43 = vector.load %arg6[%c0_22, %c0_23] : memref<32x32xbf16, #tpu.memory_space<vmem>>, vector<32x32xbf16>
    %cst_24 = arith.constant dense<0.000000e+00> : vector<8x32xf32>
    %44 = tpu.matmul %42, %43, %cst_24 {dimension_numbers = #tpu.dot_dimension_numbers<[1], [0], [0], [1], [0, 0, 1, 1], [], []>} : vector<8x32xbf16>, vector<32x32xbf16>, vector<8x32xf32> -> vector<8x32xf32>
    %c0_25 = arith.constant 0 : index
    %c0_26 = arith.constant 0 : index
    %45 = vector.load %arg7[%c0_25, %c0_26] : memref<1x32xf32, #tpu.memory_space<vmem>>, vector<1x32xf32>
    %46 = vector.broadcast %45 : vector<1x32xf32> to vector<8x32xf32>
    %47 = arith.addf %44, %46 : vector<8x32xf32>
    %c0_27 = arith.constant 0 : index
    %c0_28 = arith.constant 0 : index
    %c0_29 = arith.constant 0 : index
    %48 = vector.load %arg8[%c0_27, %c0_28, %c0_29] : memref<1x8x32xf32, #tpu.memory_space<vmem>>, vector<1x8x32xf32>
    %49 = vector.shape_cast %48 : vector<1x8x32xf32> to vector<8x32xf32>
    %50 = vector.shape_cast %47 : vector<8x32xf32> to vector<1x8x32xf32>
    tpu.vector_store %arg8[%c0_27, %c0_28, %c0_29], %50 {strides = array<i32>} : memref<1x8x32xf32, #tpu.memory_space<vmem>>, vector<1x8x32xf32>,
    return
  }
  func.func @transform_0(%arg0: i32) -> (i32, i32, i32) {
    %c0_i32 = arith.constant 0 : i32
    %c0_i32_0 = arith.constant 0 : i32
    %c0_i32_1 = arith.constant 0 : i32
    return %arg0, %c0_i32, %c0_i32_0 : i32, i32, i32
  }
  func.func @transform_1(%arg0: i32) -> (i32, i32, i32) {
    %c0_i32 = arith.constant 0 : i32
    %c0_i32_0 = arith.constant 0 : i32
    %c0_i32_1 = arith.constant 0 : i32
    return %arg0, %c0_i32, %c0_i32_0 : i32, i32, i32
  }
  func.func @transform_2(%arg0: i32) -> (i32, i32) {
    %c0_i32 = arith.constant 0 : i32
    %c0_i32_0 = arith.constant 0 : i32
    %c0_i32_1 = arith.constant 0 : i32
    return %c0_i32, %c0_i32_0 : i32, i32
  }
  func.func @transform_3(%arg0: i32) -> (i32, i32) {
    %c0_i32 = arith.constant 0 : i32
    %c0_i32_0 = arith.constant 0 : i32
    %c0_i32_1 = arith.constant 0 : i32
    return %c0_i32, %c0_i32_0 : i32, i32
  }
  func.func @transform_4(%arg0: i32) -> (i32, i32) {
    %c0_i32 = arith.constant 0 : i32
    %c0_i32_0 = arith.constant 0 : i32
    %c0_i32_1 = arith.constant 0 : i32
    return %c0_i32, %c0_i32_0 : i32, i32
  }
  func.func @transform_5(%arg0: i32) -> (i32, i32) {
    %c0_i32 = arith.constant 0 : i32
    %c0_i32_0 = arith.constant 0 : i32
    %c0_i32_1 = arith.constant 0 : i32
    return %c0_i32, %c0_i32_0 : i32, i32
  }
  func.func @transform_6(%arg0: i32) -> (i32, i32) {
    %c0_i32 = arith.constant 0 : i32
    %c0_i32_0 = arith.constant 0 : i32
    %c0_i32_1 = arith.constant 0 : i32
    return %c0_i32, %c0_i32_0 : i32, i32
  }
  func.func @transform_7(%arg0: i32) -> (i32, i32, i32) {
    %c0_i32 = arith.constant 0 : i32
    %c0_i32_0 = arith.constant 0 : i32
    %c0_i32_1 = arith.constant 0 : i32
    return %arg0, %c0_i32, %c0_i32_0 : i32, i32, i32
  }
  func.func @transform_8(%arg0: i32) -> (i32, i32, i32, i32) {
    %c0_i32 = arith.constant 0 : i32
    %c0_i32_0 = arith.constant 0 : i32
    %c0_i32_1 = arith.constant 0 : i32
    %c0_i32_2 = arith.constant 0 : i32
    return %arg0, %c0_i32, %c0_i32_0, %c0_i32_1 : i32, i32, i32, i32
  }
}

</mosaic_0001>

<bundles_post_ra>
// kernel: tpu_custom_call.1
= control target key start
LH: loop header
LB: loop body
LE: loop exit
PB: predicated region body
PF: predicated region fallthrough
CT: control target
= control target key end

     0   :  { %s9214_s0 = inlined_call_operand.vmem [shape: bf16[2,8,32], index: 0, kind: input, shape index: {}]   ;;  %s9215_s1 = inlined_call_operand.vmem [shape: bf16[2,128,48], index: 1, kind: input, shape index: {}]   ;;  %s9216_s2 = inlined_call_operand.vmem [shape: bf16[32,32], index: 2, kind: input, shape index: {}]   ;;  %s9217_s3 = inlined_call_operand.vmem [shape: bf16[48,32], index: 3, kind: input, shape index: {}]   ;;  %s9218_s4 = inlined_call_operand.vmem [shape: bf16[48,32], index: 4, kind: input, shape index: {}]   ;;  %s9219_s5 = inlined_call_operand.vmem [shape: bf16[32,32], index: 5, kind: input, shape index: {}]   ;;  %s9220_s6 = inlined_call_operand.vmem [shape: f32[1,32], index: 6, kind: input, shape index: {}]   ;;  %s9221_s7 = inlined_call_operand.hbm [shape: f32[2,8,32], index: 7, kind: output, shape index: {0}]   ;;  %s9222_s8 = inlined_call_operand.hbm [shape: f32[2,4,8,128], index: 8, kind: output, shape index: {1}]  }
   0x1   :  { %9310 = sst [smem:[#allocation54_spill]] %s9214_s0 }
   0x2   :  { %9311 = sst [smem:[#allocation55_spill]] %s9215_s1 }
   0x3   :  { %14 = vsyncpa [#allocation3], 0 }
   0x4   :  { %16 = vsyncpa [#allocation3 + $0x1], 0 }
   0x5   :  { %17 = vsyncpa [#allocation5], 0 }
   0x6   :  { %19 = vsyncpa [#allocation5 + $0x1], 0  ;;  %s7132_s27 = smov 0   ;;  %s7134_s28 = smov 0  }
   0x7   :  { %s7136_s29 = smov 0   ;;  %s7138_s30 = smov 0  }
   0x8 LB: > { %s7153_s9 = sadd.s32 4294967295, %s7072_s30   ;;  %s6442_s10 = sadd.s32 4294967294, %s7072_s30   ;;  %s7072_s30 = sphi %s7138_s30, %s9449_s30   ;;  %s7068_s29 = sphi %s7136_s29, %s9448_s29   ;;  %s7064_s28 = sphi %s7134_s28, %s9447_s28   ;;  %s7060_s27 = sphi %s7132_s27, %s9446_s27  }
   0x9   : > { %s7157_s11 = sadd.s32 1, %s7072_s30   ;;  %s189_s12 = sadd.s32 1, %s7068_s29 }
   0xa   : > { %s186_s13 = ssub.s32 %s7072_s30, %s7157_s11  ;;  %p199_p0 = scmp.ne.s32.totalorder %s7068_s29, %s7064_s28 }
   0xb   : > { %p187_p1 = scmp.eq.s32.totalorder %s186_s13, 0  ;;  %p200_p2 = scmp.eq.s32.totalorder %s7153_s9, 1 }
   0xc   : > { %p205_p3 = scmp.ne.s32.totalorder %s7064_s28, %s7060_s27  ;;  %p206_p4 = scmp.eq.s32.totalorder %s6442_s10, 1 }
   0xd   : > { %s7168_s14 = scalar_select %p187_p1, %s7068_s29, %s189_s12  }
   0xe   : > { %p7170_p5 = por %p200_p2, %p199_p0  ;;  %p7174_p6 = por %p206_p4, %p205_p3 }
   0xf   : > { %p6445_p7 = scmp.ge.s32.totalorder %s7072_s30, 1  ;;  %p280_p8 = scmp.lt.s32.totalorder %s7072_s30, 3 }
  0x11   : > { %p281_p9 = pnand %p6445_p7, %p280_p8 }
  0x13   : > { %284 = sbr.rel (%p281_p9) target bundleno = 1702 (0x6a6), region = 48 }
  0x1a   : > { %v6944_v0 = vld [vmem:[%s9217_s3] sm:$0xff]   ;;  %p323_p10 = scmp.lt.s32.totalorder %s7153_s9, 1  ;;  %v6945_v1 = vld [vmem:[%s9217_s3 + $0x8] sm:$0xff]   ;;  %v6946_v3 = vld [vmem:[%s9217_s3 + $0x10] sm:$0xff]   ;;  %v9224_v4 = vmov 0.0   ;;  %s9314_s1 = sld [smem:[#allocation55_spill]]  ;;  %v9223_v45 = vlaneseq }
  0x1b   : > { %6677 = vmatprep.subr.bf16.mxu1 %v6944_v0  ;;  %v6955_v2 = vld [vmem:[%s9216_s2] sm:$0xff]   ;;  %6669 = vmatprep.subr.bf16.mxu0 %v9224_v4  ;;  %vm474_vm0 = vcmask 392192   ;;  %v6956_v5 = vld [vmem:[%s9216_s2 + $0x8] sm:$0xff]   ;;  %vm7075_vm1 = vmmov 0   ;;  %s9315_s0 = sld [smem:[#allocation54_spill]]  ;;  %vm366_vm2 = vcmask 261120  }
  0x1c   : > { %s324_s21 = scalar_select %p323_p10, %s7153_s9, 1  ;;  %6678 = vmatpush3.bf16.msra.mxu1 %v6944_v0  ;;  %6670 = vmatpush3.bf16.msra.mxu0 %v6955_v2  ;;  %v6957_v6 = vld [vmem:[%s9218_s4] sm:$0xff]   ;;  %v6958_v11 = vld [vmem:[%s9218_s4 + $0x8] sm:$0xff]   ;;  %v6959_v12 = vld [vmem:[%s9218_s4 + $0x10] sm:$0xff]   ;;  %v7079_v43 = vmov 1983009808  }
  0x1d   : > { %6679 = vmatprep.subr.bf16.mxu1 %v6945_v1  ;;  %6671 = vmatprep.subr.bf16.mxu0 %v9224_v4  ;;  %s7077_s17 = smov 112   ;;  %s7078_s18 = smov 104   ;;  %v730_v44 = vunpack.c.l.s4 %v7079_v43  ;;  %v7080_v47 = vmov 1934713408   ;;  %v733_v51 = vshrl.u32 %v9223_v45, 7  ;;  %vm5603_vm3 = vcmask 64512  }
  0x1e   : > { %s6567_s26 = sshll.u32 %s324_s21, 6  ;;  %6673 = vmatprep.mubr.msk.bf16.mxu0 %vm7075_vm1, %v9224_v4  ;;  %s6448_s22 = sshll.u32 %s324_s21, 2  ;;  %v762_v48 = vunpack.c.l.s4 %v7080_v47  ;;  %vm6232_vm5 = vcmask 130048   ;;  %vm6234_vm6 = vcmask 195584  }
  0x1f   : > { %v731_v50 = vunpack.c.0.s8 %v730_v44  ;;  %s8933_s19 = sand.u32 1, %s7064_s28   ;;  %s7082_s10 = smov 8  }
  0x20   : > { %s7198_s13 = scalar_lea.vmem %s9314_s1, %s6567_s26  ;;  %6680 = vmatpush3.bf16.msra.mxu1 %v6945_v1  ;;  %6672 = vmatpush3.bf16.msra.mxu0 %v6956_v5  ;;  %v763_v53 = vunpack.c.0.s8 %v762_v48  ;;  %s6447_s20 = sshll.u32 %s8933_s19, 5 }
  0x21   : > { %v6947_v7 = vld [vmem:[%s7198_s13] sm:$0xff]   ;;  %6681 = vmatprep.subr.bf16.mxu1 %v6946_v3  ;;  %v6948_v8 = vld [vmem:[%s7198_s13 + $0x8] sm:$0xff]   ;;  %6699 = vmatprep.subr.bf16.mxu0 %v6957_v6  ;;  %v6949_v9 = vld [vmem:[%s7198_s13 + $0x10] sm:$0xff]   ;;  %s326_s25 = scalar_lea.vmem %s9315_s0, %s6448_s22  ;;  %v7418_v57 = vsub.s32 %v731_v50, %v733_v51  ;;  %s8937_s22 = scalar_lea.vmem [#allocation4], %s6447_s20 }
  0x22   : > { %6683 = vmatprep.mubr.msk.bf16.mxu1 %vm474_vm0, %v6947_v7  ;;  %v333_v10 = vld [vmem:[%s326_s25] sm:$0xf]  ;;  %v6950_v13 = vld [vmem:[%s7198_s13 + $0x18] sm:$0xff]   ;;  %v6952_v15 = vld [vmem:[%s7198_s13 + $0x28] sm:$0xff]   ;;  %v7422_v63 = vsub.s32 %v763_v53, %v733_v51  ;;  %s7081_s26 = smov 16   ;;  %s7083_s12 = smov 24  }
  0x23   : > { %6674 = vmatmul.mubr.msk.bf16.vlgmr.msra.gmra.mrb[0].mxu0 %vm366_vm2, %v333_v10  ;;  %v6951_v14 = vld [vmem:[%s7198_s13 + $0x20] sm:$0xff]   ;;  %v6953_v16 = vld [vmem:[%s7198_s13 + $0x30] sm:$0xff]   ;;  %v6954_v17 = vld [vmem:[%s7198_s13 + $0x38] sm:$0xff]   ;;  %s7076_s13 = smov 120   ;;  %9320 = vst [vmem:[#allocation12_spill] sm:$0xff] %v7418_v57  ;;  %s6310_s24 = scalar_lea.sflag [#allocation5], %s8933_s19 }
  0x24   : > { %6682 = vmatpush3.bf16.msra.mxu1 %v6946_v3  ;;  %6700 = vmatpush3.bf16.msra.mxu0 %v6957_v6  ;;  %s7084_s21 = smov [#allocation4]  }
  0x25   : > { %6721 = vmatprep.subr.bf16.mxu1 %v9224_v4  ;;  %6705 = vmatprep.mubr.msk.bf16.mxu0 %vm474_vm0, %v6947_v7 }
  0x26   : > { %6701 = vmatprep.subr.bf16.mxu0 %v6958_v11 }
  0x27   : > { %6684 = vmatmul.mubr.msk.bf16.vlgmr.msra.gmra.mrb[0].mxu1 %vm474_vm0, %v6948_v8 }
  0x28   : > { %6687 = vmatprep.mubr.msk.bf16.mxu1 %vm474_vm0, %v6949_v9  ;;  %6702 = vmatpush3.bf16.msra.mxu0 %v6958_v11 }
  0x29   : > { %6703 = vmatprep.subr.bf16.mxu0 %v6959_v12 }
  0x2c   : > { %6704 = vmatpush3.bf16.msra.mxu0 %v6959_v12 }
  0x2d   : > { %6741 = vmatprep.subr.bf16.mxu0 %v9224_v4 }
  0x2f   : > { %6688 = vmatmul.mubr.msk.bf16.gmra.mrb[4].mxu1 %vm474_vm0, %v6950_v13  ;;  %6706 = vmatmul.mubr.msk.bf16.vlgmr.msra.gmra.mrb[4].mxu0 %vm474_vm0, %v6948_v8 }
  0x30   : > { %6691 = vmatprep.mubr.msk.bf16.mxu1 %vm474_vm0, %v6951_v14  ;;  %6709 = vmatprep.mubr.msk.bf16.mxu0 %vm474_vm0, %v6949_v9 }
  0x37   : > { %6692 = vmatmul.mubr.msk.bf16.gmra.mrb[8].mxu1 %vm474_vm0, %v6952_v15  ;;  %6710 = vmatmul.mubr.msk.bf16.gmra.mrb[8].mxu0 %vm474_vm0, %v6950_v13 }
  0x38   : > { %6695 = vmatprep.mubr.msk.bf16.mxu1 %vm474_vm0, %v6953_v16  ;;  %6713 = vmatprep.mubr.msk.bf16.mxu0 %vm474_vm0, %v6951_v14 }
  0x3f   : > { %6696 = vmatmul.mubr.msk.bf16.gmra.mrb[12].mxu1 %vm474_vm0, %v6954_v17  ;;  %6714 = vmatmul.mubr.msk.bf16.gmra.mrb[12].mxu0 %vm474_vm0, %v6952_v15 }
  0x40   : > { %6737 = vmatprep.mubr.msk.bf16.mxu1 %vm7075_vm1, %v9224_v4  ;;  %6717 = vmatprep.mubr.msk.bf16.mxu0 %vm474_vm0, %v6953_v16 }
  0x47   : > { %6718 = vmatmul.mubr.msk.bf16.gmra.mrb[16].mxu0 %vm474_vm0, %v6954_v17 }
  0x48   : > { %6757 = vmatprep.mubr.msk.bf16.mxu0 %vm7075_vm1, %v9224_v4 }
  0xf6   : > { %v7255_v20 = vpop.f32.mrb[0].mxu0 }
  0xf7   : > { %v6675_v22 = vpop.f32.mrb[1].mxu0 }
  0xf8   : > { %v407_v24 = vpop.f32.mrb[2].mxu0 }
  0xf9   : > { %v6676_v25 = vpop.f32.mrb[3].mxu0 }
  0xfa   : > { %v7249_v18 = vpop.f32.mrb[0].mxu1 }
  0xfb   : > { %887 = vrot.lane.b32.xlu0 %v7249_v18, %s7076_s13  ;;  %v7253_v19 = vpop.f32.mrb[1].mxu1 }
  0xfc   : > { %931 = vrot.lane.b32.xlu1 %v7253_v19, %s7077_s17  ;;  %v7259_v21 = vpop.f32.mrb[2].mxu1 }
  0xfd   : > { %v7261_v23 = vpop.f32.mrb[3].mxu1 }
  0xff   : > { %935 = vrot.lane.b32.xlu0 %v7249_v18, %s7077_s17 }
 0x100   : > { %889 = vrot.lane.b32.xlu1 %v7259_v21, %s7076_s13 }
 0x102   : > { %v7267_v26 = vpop.f32.mrb[4].mxu1  ;;  %v7379_v38 = vpop.f32.mrb[4].mxu0 }
 0x103   : > { %983 = vrot.lane.b32.xlu0 %v7249_v18, %s7078_s18  ;;  %v7271_v27 = vpop.f32.mrb[5].mxu1  ;;  %9316 = vst [vmem:[#allocation8_spill] sm:$0xff] %v7379_v38  ;;  %v7385_v39 = vpop.f32.mrb[5].mxu0 }
 0x104   : > { %937 = vrot.lane.b32.xlu1 %v7259_v21, %s7077_s17  ;;  %v7275_v28 = vpop.f32.mrb[6].mxu1  ;;  %9317 = vst [vmem:[#allocation9_spill] sm:$0xff] %v7385_v39  ;;  %v7387_v40 = vpop.f32.mrb[6].mxu0 }
 0x105   : > { %v7277_v29 = vpop.f32.mrb[7].mxu1  ;;  %9318 = vst [vmem:[#allocation10_spill] sm:$0xff] %v7387_v40  ;;  %v7391_v41 = vpop.f32.mrb[7].mxu0 }
 0x106   : > { %9319 = vst [vmem:[#allocation11_spill] sm:$0xff] %v7391_v41 }
 0x107   : > { %883 = vrot.lane.b32.xlu0 %v7253_v19, %s7076_s13 }
 0x108   : > { %985 = vrot.lane.b32.xlu1 %v7259_v21, %s7078_s18 }
 0x10a   : > { %v7283_v30 = vpop.f32.mrb[8].mxu1 }
 0x10b   : > { %979 = vrot.lane.b32.xlu0 %v7253_v19, %s7078_s18  ;;  %v7287_v31 = vpop.f32.mrb[9].mxu1 }
 0x10c   : > { %933 = vrot.lane.b32.xlu1 %v7261_v23, %s7077_s17  ;;  %v7291_v32 = vpop.f32.mrb[10].mxu1 }
 0x10d   : > { %v7293_v33 = vpop.f32.mrb[11].mxu1 }
 0x10f   : > { %885 = vrot.lane.b32.xlu0 %v7261_v23, %s7076_s13 }
 0x110   : > { %981 = vrot.lane.b32.xlu1 %v7261_v23, %s7078_s18 }
 0x112   : > { %v7299_v34 = vpop.f32.mrb[12].mxu1 }
 0x113   : > { %895 = vrot.lane.b32.xlu0 %v7267_v26, %s7076_s13  ;;  %v7303_v35 = vpop.f32.mrb[13].mxu1 }
 0x114   : > { %897 = vrot.lane.b32.xlu1 %v7275_v28, %s7076_s13  ;;  %v7307_v36 = vpop.f32.mrb[14].mxu1 }
 0x115   : > { %v7309_v37 = vpop.f32.mrb[15].mxu1 }
 0x117   : > { %943 = vrot.lane.b32.xlu0 %v7267_v26, %s7077_s17 }
 0x118   : > { %945 = vrot.lane.b32.xlu1 %v7275_v28, %s7077_s17 }
 0x11b   : > { %991 = vrot.lane.b32.xlu0 %v7267_v26, %s7078_s18 }
 0x11c   : > { %993 = vrot.lane.b32.xlu1 %v7275_v28, %s7078_s18 }
 0x11f   : > { %891 = vrot.lane.b32.xlu0 %v7271_v27, %s7076_s13 }
 0x120   : > { %893 = vrot.lane.b32.xlu1 %v7277_v29, %s7076_s13 }
 0x123   : > { %939 = vrot.lane.b32.xlu0 %v7271_v27, %s7077_s17 }
 0x124   : > { %941 = vrot.lane.b32.xlu1 %v7277_v29, %s7077_s17 }
 0x127   : > { %987 = vrot.lane.b32.xlu0 %v7271_v27, %s7078_s18 }
 0x128   : > { %989 = vrot.lane.b32.xlu1 %v7277_v29, %s7078_s18 }
 0x12b   : > { %903 = vrot.lane.b32.xlu0 %v7283_v30, %s7076_s13 }
 0x12c   : > { %905 = vrot.lane.b32.xlu1 %v7291_v32, %s7076_s13 }
 0x12f   : > { %951 = vrot.lane.b32.xlu0 %v7283_v30, %s7077_s17 }
 0x130   : > { %953 = vrot.lane.b32.xlu1 %v7291_v32, %s7077_s17 }
 0x133   : > { %999 = vrot.lane.b32.xlu0 %v7283_v30, %s7078_s18 }
 0x134   : > { %1001 = vrot.lane.b32.xlu1 %v7291_v32, %s7078_s18 }
 0x137   : > { %899 = vrot.lane.b32.xlu0 %v7287_v31, %s7076_s13 }
 0x138   : > { %901 = vrot.lane.b32.xlu1 %v7293_v33, %s7076_s13 }
 0x13b   : > { %947 = vrot.lane.b32.xlu0 %v7287_v31, %s7077_s17 }
 0x13c   : > { %949 = vrot.lane.b32.xlu1 %v7293_v33, %s7077_s17 }
 0x13f   : > { %995 = vrot.lane.b32.xlu0 %v7287_v31, %s7078_s18 }
 0x140   : > { %997 = vrot.lane.b32.xlu1 %v7293_v33, %s7078_s18 }
 0x143   : > { %911 = vrot.lane.b32.xlu0 %v7299_v34, %s7076_s13 }
 0x144   : > { %913 = vrot.lane.b32.xlu1 %v7307_v36, %s7076_s13 }
 0x147   : > { %907 = vrot.lane.b32.xlu0 %v7303_v35, %s7076_s13 }
 0x148   : > { %909 = vrot.lane.b32.xlu1 %v7309_v37, %s7076_s13 }
 0x14b   : > { %955 = vrot.lane.b32.xlu0 %v7303_v35, %s7077_s17 }
 0x14c   : > { %957 = vrot.lane.b32.xlu1 %v7309_v37, %s7077_s17 }
 0x14f   : > { %1003 = vrot.lane.b32.xlu0 %v7303_v35, %s7078_s18 }
 0x150   : > { %1005 = vrot.lane.b32.xlu1 %v7309_v37, %s7078_s18 }
 0x153   : > { %959 = vrot.lane.b32.xlu0 %v7299_v34, %s7077_s17 }
 0x154   : > { %961 = vrot.lane.b32.xlu1 %v7307_v36, %s7077_s17 }
 0x157   : > { %1007 = vrot.lane.b32.xlu0 %v7299_v34, %s7078_s18 }
 0x158   : > { %1009 = vrot.lane.b32.xlu1 %v7307_v36, %s7078_s18 }
 0x15b   : > { %718 = vrot.lane.b32.xlu0 %v7255_v20, %s7076_s13 }
 0x15c   : > { %721 = vrot.lane.b32.xlu1 %v7255_v20, %s7077_s17 }
 0x15f   : > { %724 = vrot.lane.b32.xlu0 %v7255_v20, %s7078_s18 }
 0x160   : > { %3253 = vrot.lane.b32.xlu1 %v7391_v41, %s7076_s13 }
 0x163   : > { %3251 = vrot.lane.b32.xlu0 %v7385_v39, %s7076_s13 }
 0x164   : > { %3299 = vrot.lane.b32.xlu1 %v7385_v39, %s7077_s17 }
 0x167   : > { %3301 = vrot.lane.b32.xlu0 %v7391_v41, %s7077_s17 }
 0x168   : > { %3347 = vrot.lane.b32.xlu1 %v7385_v39, %s7078_s18 }
 0x16b   : > { %3349 = vrot.lane.b32.xlu0 %v7391_v41, %s7078_s18 }
 0x16c   : > { %3255 = vrot.lane.b32.xlu1 %v7379_v38, %s7076_s13 }
 0x16d   : > { %v888_v42 = vpop.permute.xlu0 %887 }
 0x16e   : > { %v932_v46 = vpop.permute.xlu1 %931 }
 0x16f   : > { %3257 = vrot.lane.b32.xlu0 %v7387_v40, %s7076_s13  ;;  %v1027_v61 = vcombine.low %v7253_v19, %v932_v46  ;;  %v1028_v62 = vcombine.high %v7253_v19, %v932_v46 }
 0x170   : > { %3303 = vrot.lane.b32.xlu1 %v7379_v38, %s7077_s17 }
 0x171   : > { %v936_v49 = vpop.permute.xlu0 %935  ;;  %v1035_v13 = vrot.slane %v1027_v61, %v7418_v57  ;;  %v1042_v14 = vrot.slane %v1028_v62, %v7418_v57 }
 0x172   : > { %v890_v52 = vpop.permute.xlu1 %889  ;;  %v1163_v54 = vcombine.low %v7249_v18, %v936_v49  ;;  %v1164_v55 = vcombine.high %v7249_v18, %v936_v49 }
 0x173   : > { %3305 = vrot.lane.b32.xlu0 %v7387_v40, %s7077_s17 }
 0x174   : > { %3351 = vrot.lane.b32.xlu1 %v7379_v38, %s7078_s18  ;;  %v1171_v0 = vrot.slane %v1163_v54, %v7418_v57  ;;  %v1178_v1 = vrot.slane %v1164_v55, %v7418_v57 }
 0x175   : > { %v984_v56 = vpop.permute.xlu0 %983 }
 0x176   : > { %v1179_v58 = vcombine.low %v888_v42, %v984_v56  ;;  %v1180_v59 = vcombine.high %v888_v42, %v984_v56  ;;  %v938_v60 = vpop.permute.xlu1 %937 }
 0x177   : > { %3353 = vrot.lane.b32.xlu0 %v7387_v40, %s7078_s18  ;;  %v1231_v5 = vcombine.low %v7259_v21, %v938_v60  ;;  %v1232_v6 = vcombine.high %v7259_v21, %v938_v60 }
 0x178   : > { %v1187_v2 = vrot.slane %v1179_v58, %v7418_v57  ;;  %v1194_v3 = vrot.slane %v1180_v59, %v7418_v57  ;;  %v7444_v59 = vpop.f32.mrb[8].mxu0 }
 0x179   : > { %v884_v7 = vpop.permute.xlu0 %883  ;;  %v1239_v22 = vrot.slane %v1231_v5, %v7418_v57  ;;  %v1246_v24 = vrot.slane %v1232_v6, %v7418_v57  ;;  %9321 = vst [vmem:[#allocation13_spill] sm:$0xff] %v7444_v59 }
 0x17a   : > { %v1195_v8 = vcombine.low %v1171_v0, %v1187_v2  ;;  %v1196_v9 = vcombine.high %v1171_v0, %v1187_v2  ;;  %v1211_v10 = vcombine.low %v1178_v1, %v1194_v3  ;;  %v1212_v11 = vcombine.high %v1178_v1, %v1194_v3  ;;  %v986_v12 = vpop.permute.xlu1 %985  ;;  %v7458_v2 = vpop.f32.mrb[9].mxu0 }
 0x17b   : > { %v1247_v15 = vcombine.low %v890_v52, %v986_v12  ;;  %v1248_v16 = vcombine.high %v890_v52, %v986_v12  ;;  %9322 = vst [vmem:[#allocation14_spill] sm:$0xff] %v7458_v2  ;;  %3259 = vrot.lane.b32.xlu1 %v7458_v2, %s7076_s13 }
 0x17c   : > { %v1203_v17 = vrot.slane %v1195_v8, %v7422_v63  ;;  %v1210_v18 = vrot.slane %v1196_v9, %v7422_v63  ;;  %v1219_v19 = vrot.slane %v1211_v10, %v7422_v63  ;;  %v1226_v21 = vrot.slane %v1212_v11, %v7422_v63  ;;  %v7464_v8 = vpop.f32.mrb[10].mxu0 }
 0x17d   : > { %v1255_v25 = vrot.slane %v1247_v15, %v7418_v57  ;;  %v1262_v42 = vrot.slane %v1248_v16, %v7418_v57  ;;  %v980_v43 = vpop.permute.xlu0 %979  ;;  %9323 = vst [vmem:[#allocation15_spill] sm:$0xff] %v7464_v8  ;;  %v7476_v15 = vpop.f32.mrb[11].mxu0 }
 0x17e   : > { %v2251_v44 = vcombine.low %v1203_v17, %v1210_v18  ;;  %v6490_v46 = vcombine.high %v1203_v17, %v1210_v18  ;;  %v2267_v47 = vcombine.low %v1219_v19, %v1226_v21  ;;  %v6491_v48 = vcombine.high %v1219_v19, %v1226_v21  ;;  %v934_v49 = vpop.permute.xlu1 %933  ;;  %9324 = vst [vmem:[#allocation16_spill] sm:$0xff] %v7476_v15 }
 0x17f   : > { %v1263_v50 = vcombine.low %v1239_v22, %v1255_v25  ;;  %v1264_v51 = vcombine.high %v1239_v22, %v1255_v25  ;;  %v1279_v52 = vcombine.low %v1246_v24, %v1262_v42  ;;  %v1280_v53 = vcombine.high %v1246_v24, %v1262_v42  ;;  %3261 = vrot.lane.b32.xlu0 %v7476_v15, %s7076_s13 }
 0x180   : > { %v1043_v54 = vcombine.low %v884_v7, %v980_v43  ;;  %v1044_v55 = vcombine.high %v884_v7, %v980_v43  ;;  %v1095_v56 = vcombine.low %v7261_v23, %v934_v49  ;;  %v1096_v58 = vcombine.high %v7261_v23, %v934_v49  ;;  %3307 = vrot.lane.b32.xlu1 %v7458_v2, %s7077_s17 }
 0x181   : > { %v7447_v60 = vrot.slane %v1263_v50, %v7422_v63  ;;  %v7450_v61 = vrot.slane %v1264_v51, %v7422_v63  ;;  %v7453_v62 = vrot.slane %v1279_v52, %v7422_v63  ;;  %v7456_v0 = vrot.slane %v1280_v53, %v7422_v63  ;;  %v886_v1 = vpop.permute.xlu0 %885 }
 0x182   : > { %v1051_v3 = vrot.slane %v1043_v54, %v7418_v57  ;;  %v1058_v23 = vrot.slane %v1044_v55, %v7418_v57  ;;  %v1103_v5 = vrot.slane %v1095_v56, %v7418_v57  ;;  %v1110_v6 = vrot.slane %v1096_v58, %v7418_v57  ;;  %v982_v7 = vpop.permute.xlu1 %981 }
 0x183   : > { %v1111_v21 = vcombine.low %v886_v1, %v982_v7  ;;  %v1112_v22 = vcombine.high %v886_v1, %v982_v7  ;;  %v7481_v25 = vrot.slane %v2251_v44, %v7418_v57  ;;  %v7484_v42 = vrot.slane %v6490_v46, %v7418_v57  ;;  %3309 = vrot.lane.b32.xlu0 %v7476_v15, %s7077_s17 }
 0x184   : > { %v1059_v16 = vcombine.low %v1035_v13, %v1051_v3  ;;  %v1060_v17 = vcombine.high %v1035_v13, %v1051_v3  ;;  %v1075_v18 = vcombine.low %v1042_v14, %v1058_v23  ;;  %v1076_v19 = vcombine.high %v1042_v14, %v1058_v23  ;;  %3355 = vrot.lane.b32.xlu1 %v7458_v2, %s7078_s18 }
 0x185   : > { %v896_v24 = vpop.permute.xlu0 %895  ;;  %9325 = vst [vmem:[#allocation17_spill] sm:$0xff] %v7481_v25  ;;  %9326 = vst [vmem:[#allocation18_spill] sm:$0xff] %v7484_v42  ;;  %v1119_v51 = vrot.slane %v1111_v21, %v7418_v57  ;;  %v1126_v44 = vrot.slane %v1112_v22, %v7418_v57  ;;  %v7495_v52 = vrot.slane %v2267_v47, %v7418_v57 }
 0x186   : > { %v1067_v43 = vrot.slane %v1059_v16, %v7422_v63  ;;  %v1074_v49 = vrot.slane %v1060_v17, %v7422_v63  ;;  %v1083_v13 = vrot.slane %v1075_v18, %v7422_v63  ;;  %v1090_v14 = vrot.slane %v1076_v19, %v7422_v63  ;;  %v898_v50 = vpop.permute.xlu1 %897 }
 0x187   : > { %9327 = vst [vmem:[#allocation19_spill] sm:$0xff] %v7495_v52  ;;  %v7498_v46 = vrot.slane %v6491_v48, %v7418_v57  ;;  %v1127_v58 = vcombine.low %v1103_v5, %v1119_v51  ;;  %v1128_v1 = vcombine.high %v1103_v5, %v1119_v51  ;;  %v1143_v3 = vcombine.low %v1110_v6, %v1126_v44 }
 0x188   : > { %v2115_v53 = vcombine.low %v1067_v43, %v1074_v49  ;;  %v6486_v54 = vcombine.high %v1067_v43, %v1074_v49  ;;  %v2131_v55 = vcombine.low %v1083_v13, %v1090_v14  ;;  %v6487_v56 = vcombine.high %v1083_v13, %v1090_v14  ;;  %3357 = vrot.lane.b32.xlu0 %v7476_v15, %s7078_s18 }
 0x189   : > { %9328 = vst [vmem:[#allocation20_spill] sm:$0xff] %v7498_v46  ;;  %v1144_v23 = vcombine.high %v1110_v6, %v1126_v44  ;;  %v944_v7 = vpop.permute.xlu0 %943  ;;  %v1135_v19 = vrot.slane %v1127_v58, %v7422_v63  ;;  %v1142_v5 = vrot.slane %v1128_v1, %v7422_v63  ;;  %v7515_v6 = vrot.slane %v1143_v3, %v7422_v63 }
 0x18a   : > { %v1435_v16 = vcombine.low %v7267_v26, %v944_v7  ;;  %v1436_v47 = vcombine.high %v7267_v26, %v944_v7  ;;  %v946_v17 = vpop.permute.xlu1 %945  ;;  %v7505_v48 = vrot.slane %v2115_v53, %v7418_v57  ;;  %v7508_v18 = vrot.slane %v6486_v54, %v7418_v57  ;;  %3263 = vrot.lane.b32.xlu1 %v7444_v59, %s7076_s13 }
 0x18b   : > { %v7518_v21 = vrot.slane %v1144_v23, %v7422_v63  ;;  %v1503_v43 = vcombine.low %v7275_v28, %v946_v17  ;;  %v1504_v49 = vcombine.high %v7275_v28, %v946_v17  ;;  %v2183_v13 = vcombine.low %v1135_v19, %v1142_v5 }
 0x18c   : > { %v1443_v26 = vrot.slane %v1435_v16, %v7418_v57  ;;  %v1450_v22 = vrot.slane %v1436_v47, %v7418_v57  ;;  %v6488_v14 = vcombine.high %v1135_v19, %v1142_v5  ;;  %v7535_v16 = vrot.slane %v2131_v55, %v7418_v57  ;;  %3265 = vrot.lane.b32.xlu0 %v7464_v8, %s7076_s13 }
 0x18d   : > { %v992_v53 = vpop.permute.xlu0 %991  ;;  %v1511_v54 = vrot.slane %v1503_v43, %v7418_v57  ;;  %v1518_v58 = vrot.slane %v1504_v49, %v7418_v57  ;;  %v7538_v47 = vrot.slane %v6487_v56, %v7418_v57  ;;  %v2147_v5 = vcombine.low %v7505_v48, %v7508_v18 }
 0x18e   : > { %v1451_v1 = vcombine.low %v896_v24, %v992_v53  ;;  %v1452_v3 = vcombine.high %v896_v24, %v992_v53  ;;  %v994_v23 = vpop.permute.xlu1 %993  ;;  %v7545_v24 = vrot.slane %v2183_v13, %v7418_v57  ;;  %v7556_v49 = vrot.slane %v6488_v14, %v7418_v57  ;;  %3311 = vrot.lane.b32.xlu1 %v7444_v59, %s7077_s17 }
 0x18f   : > { %v1519_v28 = vcombine.low %v898_v50, %v994_v23  ;;  %v1520_v7 = vcombine.high %v898_v50, %v994_v23  ;;  %v2163_v56 = vcombine.low %v7535_v16, %v7538_v47 }
 0x190   : > { %v1459_v17 = vrot.slane %v1451_v1, %v7418_v57  ;;  %v1466_v19 = vrot.slane %v1452_v3, %v7418_v57  ;;  %3313 = vrot.lane.b32.xlu0 %v7464_v8, %s7077_s17 }
 0x191   : > { %v1527_v50 = vrot.slane %v1519_v28, %v7418_v57  ;;  %v1534_v55 = vrot.slane %v1520_v7, %v7418_v57  ;;  %v7551_v43 = vpop.permute.xlu0 %891 }
 0x192   : > { %v1467_v53 = vcombine.low %v1443_v26, %v1459_v17  ;;  %v1468_v1 = vcombine.high %v1443_v26, %v1459_v17  ;;  %v1483_v3 = vcombine.low %v1450_v22, %v1466_v19  ;;  %v1484_v13 = vcombine.high %v1450_v22, %v1466_v19  ;;  %v7558_v23 = vpop.permute.xlu1 %893  ;;  %3359 = vrot.lane.b32.xlu1 %v7444_v59, %s7078_s18 }
 0x193   : > { %v1535_v28 = vcombine.low %v1511_v54, %v1527_v50  ;;  %v1536_v45 = vcombine.high %v1511_v54, %v1527_v50  ;;  %v1551_v7 = vcombine.low %v1518_v58, %v1534_v55  ;;  %v1552_v12 = vcombine.high %v1518_v58, %v1534_v55 }
 0x194   : > { %v1475_v11 = vrot.slane %v1467_v53, %v7422_v63  ;;  %v1482_v10 = vrot.slane %v1468_v1, %v7422_v63  ;;  %v1491_v14 = vrot.slane %v1483_v3, %v7422_v63  ;;  %v1498_v9 = vrot.slane %v1484_v13, %v7422_v63  ;;  %v7574_v3 = vpop.f32.mrb[12].mxu0  ;;  %3361 = vrot.lane.b32.xlu0 %v7464_v8, %s7078_s18 }
 0x195   : > { %v1543_v26 = vrot.slane %v1535_v28, %v7422_v63  ;;  %v1550_v22 = vrot.slane %v1536_v45, %v7422_v63  ;;  %v1559_v17 = vrot.slane %v1551_v7, %v7422_v63  ;;  %v1566_v54 = vrot.slane %v1552_v12, %v7422_v63  ;;  %v940_v58 = vpop.permute.xlu0 %939  ;;  %9329 = vst [vmem:[#allocation21_spill] sm:$0xff] %v7574_v3  ;;  %v7576_v45 = vpop.f32.mrb[13].mxu0 }
 0x196   : > { %v2523_v19 = vcombine.low %v1475_v11, %v1482_v10  ;;  %v6498_v50 = vcombine.high %v1475_v11, %v1482_v10  ;;  %v2539_v55 = vcombine.low %v1491_v14, %v1498_v9  ;;  %v6499_v53 = vcombine.high %v1491_v14, %v1498_v9  ;;  %v942_v1 = vpop.permute.xlu1 %941  ;;  %9330 = vst [vmem:[#allocation22_spill] sm:$0xff] %v7576_v45  ;;  %v7592_v11 = vpop.f32.mrb[14].mxu0 }
 0x197   : > { %v2591_v13 = vcombine.low %v1543_v26, %v1550_v22  ;;  %v6500_v4 = vcombine.high %v1543_v26, %v1550_v22  ;;  %v2607_v28 = vcombine.low %v1559_v17, %v1566_v54  ;;  %v6501_v44 = vcombine.high %v1559_v17, %v1566_v54  ;;  %9334 = vst [vmem:[#allocation26_spill] sm:$0xff] %v7592_v11 }
 0x198   : > { %v7579_v7 = vrot.slane %v2523_v19, %v7418_v57  ;;  %v7582_v12 = vrot.slane %v6498_v50, %v7418_v57  ;;  %v7585_v9 = vrot.slane %v2539_v55, %v7418_v57  ;;  %v7588_v10 = vrot.slane %v6499_v53, %v7418_v57  ;;  %v7606_v19 = vpop.f32.mrb[15].mxu0  ;;  %3267 = vrot.lane.b32.xlu1 %v7576_v45, %s7076_s13 }
 0x199   : > { %v7595_v14 = vrot.slane %v2591_v13, %v7418_v57  ;;  %v7598_v26 = vrot.slane %v6500_v4, %v7418_v57  ;;  %v7601_v22 = vrot.slane %v2607_v28, %v7418_v57  ;;  %v7604_v17 = vrot.slane %v6501_v44, %v7418_v57  ;;  %v988_v54 = vpop.permute.xlu0 %987  ;;  %9339 = vst [vmem:[#allocation31_spill] sm:$0xff] %v7606_v19 }
 0x19a   : > { %9331 = vst [vmem:[#allocation23_spill] sm:$0xff] %v7579_v7  ;;  %9332 = vst [vmem:[#allocation24_spill] sm:$0xff] %v7582_v12  ;;  %v1299_v50 = vcombine.low %v7271_v27, %v940_v58  ;;  %v1300_v55 = vcombine.high %v7271_v27, %v940_v58  ;;  %v1367_v53 = vcombine.low %v7277_v29, %v942_v1  ;;  %v990_v51 = vpop.permute.xlu1 %989  ;;  %3269 = vrot.lane.b32.xlu0 %v7606_v19, %s7076_s13 }
 0x19b   : > { %9333 = vst [vmem:[#allocation25_spill] sm:$0xff] %v7585_v9  ;;  %9335 = vst [vmem:[#allocation27_spill] sm:$0xff] %v7595_v14  ;;  %v1368_v13 = vcombine.high %v7277_v29, %v942_v1  ;;  %v2155_v4 = vrot.slane %v2147_v5, %v7422_v63  ;;  %v2171_v44 = vrot.slane %v2163_v56, %v7422_v63 }
 0x19c   : > { %9336 = vst [vmem:[#allocation28_spill] sm:$0xff] %v7598_v26  ;;  %9337 = vst [vmem:[#allocation29_spill] sm:$0xff] %v7601_v22  ;;  %v9340_v28 = vcombine.low %v7515_v6, %v7518_v21  ;;  %v9342_v27 = vcombine.high %v7515_v6, %v7518_v21  ;;  %v1307_v29 = vrot.slane %v1299_v50, %v7418_v57  ;;  %3315 = vrot.lane.b32.xlu1 %v7576_v45, %s7077_s17 }
 0x19d   : > { %9338 = vst [vmem:[#allocation30_spill] sm:$0xff] %v7604_v17  ;;  %v1314_v1 = vrot.slane %v1300_v55, %v7418_v57  ;;  %v1375_v5 = vrot.slane %v1367_v53, %v7418_v57  ;;  %v7632_v56 = vrot.slane %v1368_v13, %v7418_v57  ;;  %v2215_v59 = vcombine.low %v7545_v24, %v7556_v49  ;;  %v7640_v50 = vpop.permute.xlu0 %903 }
 0x19e   : > { %v7620_v8 = vrot.slane %v9340_v28, %v7418_v57  ;;  %v7626_v58 = vrot.slane %v9342_v27, %v7418_v57  ;;  %v2179_v28 = vcombine.low %v2155_v4, %v2171_v44  ;;  %v2180_v21 = vcombine.high %v2155_v4, %v2171_v44  ;;  %v7646_v15 = vpop.permute.xlu1 %905  ;;  %3317 = vrot.lane.b32.xlu0 %v7606_v19, %s7077_s17 }
 0x19f   : > { %v1315_v55 = vcombine.low %v7551_v43, %v988_v54  ;;  %v1316_v53 = vcombine.high %v7551_v43, %v988_v54  ;;  %v1383_v13 = vcombine.low %v7558_v23, %v990_v51  ;;  %v1384_v27 = vcombine.high %v7558_v23, %v990_v51 }
 0x1a0   : > { %9341 = vst [vmem:[#allocation32_spill] sm:$0xff] %v7620_v8  ;;  %v2231_v6 = vcombine.low %v7620_v8, %v7626_v58  ;;  %v2223_v2 = vrot.slane %v2215_v59, %v7422_v63  ;;  %v2283_v4 = vcombine.low %v7481_v25, %v7484_v42  ;;  %v2299_v44 = vcombine.low %v7495_v52, %v7498_v46 }
 0x1a1   : > { %v1323_v43 = vrot.slane %v1315_v55, %v7418_v57  ;;  %v1330_v54 = vrot.slane %v1316_v53, %v7418_v57  ;;  %v1391_v51 = vrot.slane %v1383_v13, %v7418_v57  ;;  %v1398_v23 = vrot.slane %v1384_v27, %v7418_v57  ;;  %v7668_v41 = vpop.permute.xlu0 %951  ;;  %3363 = vrot.lane.b32.xlu1 %v7576_v45, %s7078_s18 }
 0x1a2   : > { %v2239_v38 = vrot.slane %v2231_v6, %v7422_v63  ;;  %v7663_v6 = vrot.slane %v2283_v4, %v7422_v63  ;;  %v7666_v39 = vrot.slane %v2299_v44, %v7422_v63  ;;  %v7670_v13 = vpop.permute.xlu1 %953  ;;  %3365 = vrot.lane.b32.xlu0 %v7606_v19, %s7078_s18 }
 0x1a3   : > { %v1331_v55 = vcombine.low %v1307_v29, %v1323_v43  ;;  %v1332_v52 = vcombine.high %v1307_v29, %v1323_v43  ;;  %v1347_v53 = vcombine.low %v1314_v1, %v1330_v54  ;;  %v1348_v46 = vcombine.high %v1314_v1, %v1330_v54 }
 0x1a4   : > { %v2247_v59 = vcombine.low %v2223_v2, %v2239_v38  ;;  %v2248_v40 = vcombine.high %v2223_v2, %v2239_v38  ;;  %v1399_v38 = vcombine.low %v1375_v5, %v1391_v51  ;;  %v1400_v2 = vcombine.high %v1375_v5, %v1391_v51 }
 0x1a5   : > { %v1339_v4 = vrot.slane %v1331_v55, %v7422_v63  ;;  %v1346_v44 = vrot.slane %v1332_v52, %v7422_v63  ;;  %v1355_v42 = vrot.slane %v1347_v53, %v7422_v63  ;;  %v1362_v8 = vrot.slane %v1348_v46, %v7422_v63  ;;  %v1000_v5 = vpop.permute.xlu0 %999  ;;  %3271 = vrot.lane.b32.xlu1 %v7574_v3, %s7076_s13 }
 0x1a6   : > { %v3203_v27 = vpack.c.bf16 %v2247_v59, %v2179_v28  ;;  %v3211_v25 = vpack.c.bf16 %v2248_v40, %v2180_v21  ;;  %v1407_v28 = vrot.slane %v1399_v38, %v7422_v63  ;;  %v1414_v40 = vrot.slane %v1400_v2, %v7422_v63  ;;  %v1002_v54 = vpop.permute.xlu1 %1001  ;;  %3273 = vrot.lane.b32.xlu0 %v7592_v11, %s7076_s13 }
 0x1a7   : > { %v2387_v21 = vcombine.low %v1339_v4, %v1346_v44  ;;  %v6494_v52 = vcombine.high %v1339_v4, %v1346_v44  ;;  %v2403_v43 = vcombine.low %v1355_v42, %v1362_v8  ;;  %v6495_v51 = vcombine.high %v1355_v42, %v1362_v8 }
 0x1a8   : > { %v5608_v29 = vsel %vm5603_vm3, %v3203_v27, 0  ;;  %v5675_v1 = vsel %vm5603_vm3, %v3211_v25, 0  ;;  %v1415_v46 = vcombine.low %v7632_v56, %v1398_v23  ;;  %v1416_v59 = vcombine.high %v7632_v56, %v1398_v23 }
 0x1a9   : > { %6722 = vmatpush3.bf16.xpose.msra.mxu1 %v5608_v29  ;;  %6742 = vmatpush3.bf16.xpose.msra.mxu0 %v5675_v1  ;;  %v2455_v55 = vcombine.low %v1407_v28, %v1414_v40  ;;  %v9343_v53 = vmov 0.0   ;;  %v7688_v25 = vrot.slane %v2387_v21, %v7418_v57  ;;  %v7691_v27 = vrot.slane %v6494_v52, %v7418_v57  ;;  %v7705_v4 = vpop.permute.xlu0 %899 }
 0x1aa   : > { %6723 = vmatprep.subr.bf16.mxu1 %v9343_v53  ;;  %v7694_v38 = vrot.slane %v2403_v43, %v7418_v57  ;;  %v6496_v2 = vcombine.high %v1407_v28, %v1414_v40  ;;  %6743 = vmatprep.subr.bf16.mxu0 %v9343_v53  ;;  %v7698_v8 = vrot.slane %v6495_v51, %v7418_v57  ;;  %v7726_v52 = vpop.permute.xlu1 %901 }
 0x1ab   : > { %v1423_v42 = vrot.slane %v1415_v46, %v7422_v63  ;;  %v1430_v56 = vrot.slane %v1416_v59, %v7422_v63  ;;  %v7703_v23 = vrot.slane %v2455_v55, %v7418_v57  ;;  %v2315_v29 = vcombine.low %v7663_v6, %v7666_v39  ;;  %3319 = vrot.lane.b32.xlu1 %v7574_v3, %s7077_s17 }
 0x1ac   : > { %v7710_v44 = vrot.slane %v6496_v2, %v7418_v57  ;;  %v9345_v1 = vcombine.low %v7447_v60, %v7450_v61  ;;  %v9347_v40 = vcombine.high %v7447_v60, %v7450_v61  ;;  %v9349_v46 = vcombine.low %v7453_v62, %v7456_v0  ;;  %3321 = vrot.lane.b32.xlu0 %v7592_v11, %s7077_s17 }
 0x1ad   : > { %9344 = vst [vmem:[#allocation33_spill] sm:$0xff] %v7703_v23  ;;  %v2471_v43 = vcombine.low %v1423_v42, %v1430_v56  ;;  %v6497_v51 = vcombine.high %v1423_v42, %v1430_v56  ;;  %v9351_v55 = vcombine.high %v7453_v62, %v7456_v0  ;;  %v2316_v2 = vcombine.high %v7663_v6, %v7666_v39 }
 0x1ae   : > { %v7718_v28 = vrot.slane %v9345_v1, %v7418_v57  ;;  %v7724_v21 = vrot.slane %v9347_v40, %v7418_v57  ;;  %v7734_v59 = vrot.slane %v9349_v46, %v7418_v57  ;;  %v1707_v42 = vcombine.low %v7283_v30, %v7668_v41  ;;  %v948_v46 = vpop.permute.xlu0 %947  ;;  %v7773_v45 = vpop.permute.xlu1 %949 }
 0x1af   : > { %v7740_v60 = vrot.slane %v9351_v55, %v7418_v57  ;;  %v1708_v56 = vcombine.high %v7283_v30, %v7668_v41  ;;  %v7751_v1 = vrot.slane %v2471_v43, %v7418_v57  ;;  %v7754_v40 = vrot.slane %v6497_v51, %v7418_v57  ;;  %3367 = vrot.lane.b32.xlu1 %v7574_v3, %s7078_s18 }
 0x1b0   : > { %9346 = vst [vmem:[#allocation34_spill] sm:$0xff] %v7718_v28  ;;  %9348 = vst [vmem:[#allocation35_spill] sm:$0xff] %v7724_v21  ;;  %v2351_v61 = vcombine.low %v7718_v28, %v7724_v21  ;;  %v1775_v0 = vcombine.low %v7291_v32, %v7670_v13  ;;  %v1715_v30 = vrot.slane %v1707_v42, %v7418_v57  ;;  %3369 = vrot.lane.b32.xlu0 %v7592_v11, %s7078_s18 }
 0x1b1   : > { %9350 = vst [vmem:[#allocation36_spill] sm:$0xff] %v7734_v59  ;;  %9352 = vst [vmem:[#allocation37_spill] sm:$0xff] %v7740_v60  ;;  %v2367_v62 = vcombine.low %v7734_v59, %v7740_v60  ;;  %v1722_v41 = vrot.slane %v1708_v56, %v7418_v57  ;;  %v1776_v6 = vcombine.high %v7291_v32, %v7670_v13 }
 0x1b2   : > { %9353 = vst [vmem:[#allocation38_spill] sm:$0xff] %v7751_v1  ;;  %9354 = vst [vmem:[#allocation39_spill] sm:$0xff] %v7754_v40  ;;  %v2359_v39 = vrot.slane %v2351_v61, %v7422_v63  ;;  %v1783_v51 = vrot.slane %v1775_v0, %v7418_v57  ;;  %v1723_v55 = vcombine.low %v7640_v50, %v1000_v5  ;;  %v7797_v21 = vpop.permute.xlu1 %997 }
 0x1b3   : > { %v2375_v43 = vrot.slane %v2367_v62, %v7422_v63  ;;  %v1724_v19 = vcombine.high %v7640_v50, %v1000_v5  ;;  %v1790_v61 = vrot.slane %v1776_v6, %v7418_v57  ;;  %v1791_v42 = vcombine.low %v7646_v15, %v1002_v54 }
 0x1b4   : > { %v1792_v56 = vcombine.high %v7646_v15, %v1002_v54  ;;  %v1571_v32 = vcombine.low %v7287_v31, %v948_v46  ;;  %v1731_v62 = vrot.slane %v1723_v55, %v7418_v57  ;;  %v1572_v6 = vcombine.high %v7287_v31, %v948_v46  ;;  %v7789_v15 = vpop.permute.xlu0 %995 }
 0x1b5   : > { %v2383_v13 = vcombine.low %v2359_v39, %v2375_v43  ;;  %v2384_v59 = vcombine.high %v2359_v39, %v2375_v43  ;;  %v1738_v0 = vrot.slane %v1724_v19, %v7418_v57  ;;  %v1799_v50 = vrot.slane %v1791_v42, %v7418_v57 }
 0x1b6   : > { %v1806_v5 = vrot.slane %v1792_v56, %v7418_v57  ;;  %v7787_v60 = vrot.slane %v1571_v32, %v7418_v57  ;;  %v1739_v19 = vcombine.low %v1715_v30, %v1731_v62  ;;  %v1740_v43 = vcombine.high %v1715_v30, %v1731_v62  ;;  %v7802_v30 = vpop.f32.mrb[16].mxu0 }
 0x1b7   : > { %v3204_v54 = vpack.c.bf16 %v2383_v13, %v2315_v29  ;;  %v3212_v39 = vpack.c.bf16 %v2384_v59, %v2316_v2  ;;  %v1755_v55 = vcombine.low %v1722_v41, %v1738_v0  ;;  %v1756_v3 = vcombine.high %v1722_v41, %v1738_v0  ;;  %9355 = vst [vmem:[#allocation40_spill] sm:$0xff] %v7802_v30 }
 0x1b8   : > { %v1807_v28 = vcombine.low %v1783_v51, %v1799_v50  ;;  %v1808_v42 = vcombine.high %v1783_v51, %v1799_v50  ;;  %v1747_v46 = vrot.slane %v1739_v19, %v7422_v63  ;;  %v1754_v32 = vrot.slane %v1740_v43, %v7422_v63  ;;  %3279 = vrot.lane.b32.xlu1 %v7802_v30, %s7076_s13 }
 0x1b9   : > { %v5611_v56 = vsel %vm5603_vm3, %v3204_v54, 0  ;;  %v5678_v31 = vsel %vm5603_vm3, %v3212_v39, 0  ;;  %v1763_v29 = vrot.slane %v1755_v55, %v7422_v63  ;;  %v1770_v59 = vrot.slane %v1756_v3, %v7422_v63  ;;  %v7810_v3 = vpop.permute.xlu0 %911 }
 0x1ba   : > { %6724 = vmatpush3.bf16.xpose.msra.mxu1 %v5611_v56  ;;  %6744 = vmatpush3.bf16.xpose.msra.mxu0 %v5678_v31  ;;  %v1815_v2 = vrot.slane %v1807_v28, %v7422_v63  ;;  %v2795_v41 = vcombine.low %v1747_v46, %v1754_v32  ;;  %v6506_v51 = vcombine.high %v1747_v46, %v1754_v32 }
 0x1bb   : > { %v1822_v13 = vrot.slane %v1808_v42, %v7422_v63  ;;  %v1823_v62 = vcombine.low %v1790_v61, %v1806_v5  ;;  %6725 = vmatprep.subr.bf16.mxu1 %v9343_v53  ;;  %v2811_v0 = vcombine.low %v1763_v29, %v1770_v59  ;;  %v6507_v50 = vcombine.high %v1763_v29, %v1770_v59  ;;  %v7837_v29 = vpop.permute.xlu1 %913 }
 0x1bc   : > { %v1824_v54 = vcombine.high %v1790_v61, %v1806_v5  ;;  %v7807_v39 = vrot.slane %v1572_v6, %v7418_v57  ;;  %6745 = vmatprep.subr.bf16.mxu0 %v9343_v53  ;;  %v7813_v28 = vrot.slane %v2795_v41, %v7418_v57  ;;  %v7816_v19 = vrot.slane %v6506_v51, %v7418_v57 }
 0x1bd   : > { %v1831_v43 = vrot.slane %v1823_v62, %v7422_v63  ;;  %v2863_v55 = vcombine.low %v1815_v2, %v1822_v13  ;;  %v7822_v61 = vrot.slane %v2811_v0, %v7418_v57  ;;  %v7825_v5 = vrot.slane %v6507_v50, %v7418_v57 }
 0x1be   : > { %v1838_v6 = vrot.slane %v1824_v54, %v7422_v63  ;;  %v6508_v42 = vcombine.high %v1815_v2, %v1822_v13  ;;  %v1639_v31 = vcombine.low %v7293_v33, %v7773_v45  ;;  %v1640_v46 = vcombine.high %v7293_v33, %v7773_v45 }
 0x1bf   : > { %v7829_v56 = vrot.slane %v2863_v55, %v7418_v57  ;;  %v2419_v32 = vcombine.low %v7688_v25, %v7691_v27  ;;  %v2435_v2 = vcombine.low %v7694_v38, %v7698_v8  ;;  %v2487_v45 = vcombine.low %v7703_v23, %v7710_v44  ;;  %v7860_v55 = vpop.permute.xlu0 %907 }
 0x1c0   : > { %v7840_v59 = vrot.slane %v6508_v42, %v7418_v57  ;;  %v2879_v41 = vcombine.low %v1831_v43, %v1838_v6  ;;  %v6509_v51 = vcombine.high %v1831_v43, %v1838_v6  ;;  %v1647_v13 = vrot.slane %v1639_v31, %v7418_v57  ;;  %v7862_v6 = vpop.f32.mrb[17].mxu0 }
 0x1c1   : > { %v7846_v62 = vrot.slane %v1640_v46, %v7418_v57  ;;  %v2427_v33 = vrot.slane %v2419_v32, %v7422_v63  ;;  %v2443_v54 = vrot.slane %v2435_v2, %v7422_v63  ;;  %v2503_v43 = vcombine.low %v7751_v1, %v7754_v40  ;;  %9356 = vst [vmem:[#allocation41_spill] sm:$0xff] %v7862_v6  ;;  %v7887_v40 = vpop.permute.xlu1 %909 }
 0x1c2   : > { %v7852_v0 = vrot.slane %v2879_v41, %v7418_v57  ;;  %v7855_v50 = vrot.slane %v6509_v51, %v7418_v57  ;;  %v2495_v42 = vrot.slane %v2487_v45, %v7422_v63  ;;  %v1587_v31 = vcombine.low %v7705_v4, %v7789_v15  ;;  %3323 = vrot.lane.b32.xlu1 %v7862_v6, %s7077_s17  ;;  %v7873_v41 = vpop.f32.mrb[18].mxu0 }
 0x1c3   : > { %v1588_v46 = vcombine.high %v7705_v4, %v7789_v15  ;;  %v1655_v32 = vcombine.low %v7726_v52, %v7797_v21  ;;  %9357 = vst [vmem:[#allocation42_spill] sm:$0xff] %v7873_v41  ;;  %v2451_v51 = vcombine.low %v2427_v33, %v2443_v54  ;;  %v2511_v2 = vrot.slane %v2503_v43, %v7422_v63  ;;  %v7880_v11 = vpop.f32.mrb[19].mxu0 }
 0x1c4   : > { %v2452_v30 = vcombine.high %v2427_v33, %v2443_v54  ;;  %v1656_v45 = vcombine.high %v7726_v52, %v7797_v21  ;;  %3275 = vrot.lane.b32.xlu0 %v7862_v6, %s7076_s13  ;;  %9358 = vst [vmem:[#allocation43_spill] sm:$0xff] %v7880_v11  ;;  %v1595_v4 = vrot.slane %v1587_v31, %v7418_v57 }
 0x1c5   : > { %v1602_v15 = vrot.slane %v1588_v46, %v7418_v57  ;;  %v1663_v1 = vrot.slane %v1655_v32, %v7418_v57  ;;  %v2555_v41 = vcombine.low %v7579_v7, %v7582_v12  ;;  %v2519_v33 = vcombine.low %v2495_v42, %v2511_v2 }
 0x1c6   : > { %v2520_v54 = vcombine.high %v2495_v42, %v2511_v2  ;;  %v1670_v21 = vrot.slane %v1656_v45, %v7418_v57  ;;  %v2571_v52 = vcombine.low %v7585_v9, %v7588_v10  ;;  %v1603_v43 = vcombine.low %v7787_v60, %v1595_v4  ;;  %3371 = vrot.lane.b32.xlu1 %v7862_v6, %s7078_s18  ;;  %v956_v2 = vpop.permute.xlu0 %955 }
 0x1c7   : > { %v1604_v31 = vcombine.high %v7787_v60, %v1595_v4  ;;  %v1619_v46 = vcombine.low %v7807_v39, %v1602_v15  ;;  %v1620_v32 = vcombine.high %v7807_v39, %v1602_v15  ;;  %v3205_v7 = vpack.c.bf16 %v2519_v33, %v2451_v51 }
 0x1c8   : > { %v3213_v12 = vpack.c.bf16 %v2520_v54, %v2452_v30  ;;  %v1671_v23 = vcombine.low %v1647_v13, %v1663_v1  ;;  %v1672_v42 = vcombine.high %v1647_v13, %v1663_v1  ;;  %3325 = vrot.lane.b32.xlu0 %v7880_v11, %s7077_s17  ;;  %v1611_v45 = vrot.slane %v1603_v43, %v7422_v63  ;;  %v958_v54 = vpop.permute.xlu1 %957 }
 0x1c9   : > { %v1618_v9 = vrot.slane %v1604_v31, %v7422_v63  ;;  %v1627_v60 = vrot.slane %v1619_v46, %v7422_v63  ;;  %v1634_v4 = vrot.slane %v1620_v32, %v7422_v63  ;;  %v5614_v39 = vsel %vm5603_vm3, %v3205_v7, 0 }
 0x1ca   : > { %v5681_v15 = vsel %vm5603_vm3, %v3213_v12, 0  ;;  %v1679_v30 = vrot.slane %v1671_v23, %v7422_v63  ;;  %v1686_v1 = vrot.slane %v1672_v42, %v7422_v63  ;;  %6726 = vmatpush3.bf16.xpose.msra.mxu1 %v5614_v39  ;;  %v1687_v31 = vcombine.low %v7846_v62, %v1670_v21  ;;  %3277 = vrot.lane.b32.xlu1 %v7880_v11, %s7076_s13 }
 0x1cb   : > { %6746 = vmatpush3.bf16.xpose.msra.mxu0 %v5681_v15  ;;  %v2659_v13 = vcombine.low %v1611_v45, %v1618_v9  ;;  %v6502_v51 = vcombine.high %v1611_v45, %v1618_v9  ;;  %v2675_v33 = vcombine.low %v1627_v60, %v1634_v4  ;;  %v6503_v43 = vcombine.high %v1627_v60, %v1634_v4  ;;  %v1004_v60 = vpop.permute.xlu0 %1003 }
 0x1cc   : > { %v1688_v46 = vcombine.high %v7846_v62, %v1670_v21  ;;  %v2727_v32 = vcombine.low %v1679_v30, %v1686_v1  ;;  %6727 = vmatprep.subr.bf16.mxu1 %v9343_v53  ;;  %v6504_v9 = vcombine.high %v1679_v30, %v1686_v1  ;;  %6747 = vmatprep.subr.bf16.mxu0 %v9343_v53 }
 0x1cd   : > { %v7912_v7 = vrot.slane %v2659_v13, %v7418_v57  ;;  %v7915_v12 = vrot.slane %v6502_v51, %v7418_v57  ;;  %v7918_v23 = vrot.slane %v2675_v33, %v7418_v57  ;;  %v7922_v42 = vrot.slane %v6503_v43, %v7418_v57  ;;  %3373 = vrot.lane.b32.xlu0 %v7880_v11, %s7078_s18 }
 0x1ce   : > { %v1695_v62 = vrot.slane %v1687_v31, %v7422_v63  ;;  %v1702_v21 = vrot.slane %v1688_v46, %v7422_v63  ;;  %v7927_v45 = vrot.slane %v2727_v32, %v7418_v57  ;;  %v7932_v4 = vrot.slane %v6504_v9, %v7418_v57 }
 0x1cf   : > { %9359 = vst [vmem:[#allocation44_spill] sm:$0xff] %v7918_v23  ;;  %9360 = vst [vmem:[#allocation45_spill] sm:$0xff] %v7922_v42  ;;  %v2563_v39 = vrot.slane %v2555_v41, %v7422_v63  ;;  %v2579_v15 = vrot.slane %v2571_v52, %v7422_v63  ;;  %v2623_v30 = vcombine.low %v7595_v14, %v7598_v26  ;;  %v1006_v52 = vpop.permute.xlu1 %1005 }
 0x1d0   : > { %9361 = vst [vmem:[#allocation46_spill] sm:$0xff] %v7927_v45  ;;  %9362 = vst [vmem:[#allocation47_spill] sm:$0xff] %v7932_v4  ;;  %v2743_v1 = vcombine.low %v1695_v62, %v1702_v21  ;;  %v6505_v13 = vcombine.high %v1695_v62, %v1702_v21  ;;  %v2639_v51 = vcombine.low %v7601_v22, %v7604_v17 }
 0x1d1   : > { %v1843_v33 = vcombine.low %v7303_v35, %v956_v2  ;;  %v2587_v43 = vcombine.low %v2563_v39, %v2579_v15  ;;  %v2631_v31 = vrot.slane %v2623_v30, %v7422_v63  ;;  %v2588_v46 = vcombine.high %v2563_v39, %v2579_v15 }
 0x1d2   : > { %v1844_v41 = vcombine.high %v7303_v35, %v956_v2  ;;  %v7946_v32 = vrot.slane %v2743_v1, %v7418_v57  ;;  %v7949_v9 = vrot.slane %v6505_v13, %v7418_v57  ;;  %v2647_v62 = vrot.slane %v2639_v51, %v7422_v63  ;;  %v960_v13 = vpop.permute.xlu0 %959 }
 0x1d3   : > { %v1851_v21 = vrot.slane %v1843_v33, %v7418_v57  ;;  %v1911_v6 = vcombine.low %v7309_v37, %v958_v54  ;;  %v1912_v30 = vcombine.high %v7309_v37, %v958_v54  ;;  %v1859_v39 = vcombine.low %v7860_v55, %v1004_v60 }
 0x1d4   : > { %9363 = vst [vmem:[#allocation48_spill] sm:$0xff] %v7946_v32  ;;  %9364 = vst [vmem:[#allocation49_spill] sm:$0xff] %v7949_v9  ;;  %v1858_v11 = vrot.slane %v1844_v41, %v7418_v57  ;;  %v2655_v35 = vcombine.low %v2631_v31, %v2647_v62  ;;  %v2656_v2 = vcombine.high %v2631_v31, %v2647_v62 }
 0x1d5   : > { %v1860_v15 = vcombine.high %v7860_v55, %v1004_v60  ;;  %v1927_v1 = vcombine.low %v7887_v40, %v1006_v52  ;;  %v1919_v22 = vrot.slane %v1911_v6, %v7418_v57  ;;  %v1926_v51 = vrot.slane %v1912_v30, %v7418_v57 }
 0x1d6   : > { %v1867_v33 = vrot.slane %v1859_v39, %v7418_v57  ;;  %v1928_v41 = vcombine.high %v7887_v40, %v1006_v52  ;;  %v3206_v17 = vpack.c.bf16 %v2655_v35, %v2587_v43  ;;  %v3214_v14 = vpack.c.bf16 %v2656_v2, %v2588_v46 }
 0x1d7   : > { %v1874_v37 = vrot.slane %v1860_v15, %v7418_v57  ;;  %v1935_v54 = vrot.slane %v1927_v1, %v7418_v57  ;;  %v1979_v60 = vcombine.low %v7299_v34, %v960_v13  ;;  %v962_v1 = vpop.permute.xlu1 %961 }
 0x1d8   : > { %v1875_v31 = vcombine.low %v1851_v21, %v1867_v33  ;;  %v1876_v62 = vcombine.high %v1851_v21, %v1867_v33  ;;  %v1942_v55 = vrot.slane %v1928_v41, %v7418_v57  ;;  %v5617_v6 = vsel %vm5603_vm3, %v3206_v17, 0 }
 0x1d9   : > { %v5684_v30 = vsel %vm5603_vm3, %v3214_v14, 0  ;;  %v1891_v26 = vcombine.low %v1858_v11, %v1874_v37  ;;  %v1892_v39 = vcombine.high %v1858_v11, %v1874_v37  ;;  %6728 = vmatpush3.bf16.xpose.msra.mxu1 %v5617_v6  ;;  %v1943_v46 = vcombine.low %v1919_v22, %v1935_v54 }
 0x1da   : > { %6748 = vmatpush3.bf16.xpose.msra.mxu0 %v5684_v30  ;;  %v1883_v40 = vrot.slane %v1875_v31, %v7422_v63  ;;  %v1890_v43 = vrot.slane %v1876_v62, %v7422_v63  ;;  %v1944_v35 = vcombine.high %v1919_v22, %v1935_v54  ;;  %v1959_v2 = vcombine.low %v1926_v51, %v1942_v55 }
 0x1db   : > { %v1899_v52 = vrot.slane %v1891_v26, %v7422_v63  ;;  %v1906_v21 = vrot.slane %v1892_v39, %v7422_v63  ;;  %6729 = vmatprep.subr.bf16.mxu1 %v9343_v53  ;;  %v1951_v14 = vrot.slane %v1943_v46, %v7422_v63  ;;  %v1960_v11 = vcombine.high %v1926_v51, %v1942_v55 }
 0x1dc   : > { %v2931_v17 = vcombine.low %v1883_v40, %v1890_v43  ;;  %v6510_v15 = vcombine.high %v1883_v40, %v1890_v43  ;;  %6749 = vmatprep.subr.bf16.mxu0 %v9343_v53  ;;  %v1958_v37 = vrot.slane %v1944_v35, %v7422_v63  ;;  %v1967_v26 = vrot.slane %v1959_v2, %v7422_v63  ;;  %v1008_v35 = vpop.permute.xlu0 %1007 }
 0x1dd   : > { %v2947_v33 = vcombine.low %v1899_v52, %v1906_v21  ;;  %v6511_v41 = vcombine.high %v1899_v52, %v1906_v21  ;;  %v1974_v54 = vrot.slane %v1960_v11, %v7422_v63  ;;  %v1980_v62 = vcombine.high %v7299_v34, %v960_v13 }
 0x1de   : > { %v7979_v31 = vrot.slane %v2931_v17, %v7418_v57  ;;  %v7982_v22 = vrot.slane %v6510_v15, %v7418_v57  ;;  %v2999_v6 = vcombine.low %v1951_v14, %v1958_v37  ;;  %v6512_v30 = vcombine.high %v1951_v14, %v1958_v37  ;;  %v1010_v14 = vpop.permute.xlu1 %1009 }
 0x1df   : > { %v7987_v51 = vrot.slane %v2947_v33, %v7418_v57  ;;  %v7990_v55 = vrot.slane %v6511_v41, %v7418_v57  ;;  %v3015_v39 = vcombine.low %v1967_v26, %v1974_v54  ;;  %v6513_v40 = vcombine.high %v1967_v26, %v1974_v54 }
 0x1e0   : > { %v1987_v43 = vrot.slane %v1979_v60, %v7418_v57  ;;  %v1994_v46 = vrot.slane %v1980_v62, %v7418_v57  ;;  %v7995_v52 = vrot.slane %v2999_v6, %v7418_v57  ;;  %v7998_v21 = vrot.slane %v6512_v30, %v7418_v57 }
 0x1e1   : > { %9365 = vst [vmem:[#allocation50_spill] sm:$0xff] %v7987_v51  ;;  %v2047_v34 = vcombine.low %v7307_v36, %v962_v1  ;;  %v2048_v13 = vcombine.high %v7307_v36, %v962_v1  ;;  %v8003_v2 = vrot.slane %v3015_v39, %v7418_v57  ;;  %v8006_v17 = vrot.slane %v6513_v40, %v7418_v57 }
 0x1e2   : > { %9366 = vst [vmem:[#allocation51_spill] sm:$0xff] %v7995_v52  ;;  %9367 = vst [vmem:[#allocation52_spill] sm:$0xff] %v7998_v21  ;;  %v2691_v60 = vcombine.low %v7912_v7, %v7915_v12  ;;  %v2707_v15 = vcombine.low %v7918_v23, %v7922_v42  ;;  %v2759_v36 = vcombine.low %v7927_v45, %v7932_v4 }
 0x1e3   : > { %v2055_v11 = vrot.slane %v2047_v34, %v7418_v57  ;;  %v2062_v33 = vrot.slane %v2048_v13, %v7418_v57  ;;  %v2775_v1 = vcombine.low %v7946_v32, %v7949_v9  ;;  %v1995_v26 = vcombine.low %v7810_v3, %v1008_v35 }
 0x1e4   : > { %v2699_v41 = vrot.slane %v2691_v60, %v7422_v63  ;;  %v2715_v37 = vrot.slane %v2707_v15, %v7422_v63  ;;  %v1996_v54 = vcombine.high %v7810_v3, %v1008_v35  ;;  %v2767_v62 = vrot.slane %v2759_v36, %v7422_v63 }
 0x1e5   : > { %v2783_v6 = vrot.slane %v2775_v1, %v7422_v63  ;;  %v2063_v30 = vcombine.low %v7837_v29, %v1010_v14  ;;  %v2064_v39 = vcombine.high %v7837_v29, %v1010_v14  ;;  %v2003_v13 = vrot.slane %v1995_v26, %v7418_v57 }
 0x1e6   : > { %v2723_v40 = vcombine.low %v2699_v41, %v2715_v37  ;;  %v2724_v34 = vcombine.high %v2699_v41, %v2715_v37  ;;  %v2010_v60 = vrot.slane %v1996_v54, %v7418_v57 }
 0x1e7   : > { %v2791_v32 = vcombine.low %v2767_v62, %v2783_v6  ;;  %v2792_v15 = vcombine.high %v2767_v62, %v2783_v6  ;;  %v2071_v9 = vrot.slane %v2063_v30, %v7418_v57  ;;  %v2078_v3 = vrot.slane %v2064_v39, %v7418_v57 }
 0x1e8   : > { %v2011_v35 = vcombine.low %v1987_v43, %v2003_v13  ;;  %v2012_v36 = vcombine.high %v1987_v43, %v2003_v13  ;;  %v2027_v45 = vcombine.low %v1994_v46, %v2010_v60  ;;  %v2028_v1 = vcombine.high %v1994_v46, %v2010_v60 }
 0x1e9   : > { %v3207_v4 = vpack.c.bf16 %v2791_v32, %v2723_v40  ;;  %v3215_v23 = vpack.c.bf16 %v2792_v15, %v2724_v34  ;;  %v2079_v42 = vcombine.low %v2055_v11, %v2071_v9  ;;  %v2080_v29 = vcombine.high %v2055_v11, %v2071_v9  ;;  %v719_v32 = vpop.permute.xlu0 %718  ;;  %v722_v34 = vpop.permute.xlu1 %721 }
 0x1ea   : > { %v2019_v14 = vrot.slane %v2011_v35, %v7422_v63  ;;  %v2026_v41 = vrot.slane %v2012_v36, %v7422_v63  ;;  %v2035_v37 = vrot.slane %v2027_v45, %v7422_v63  ;;  %v2042_v26 = vrot.slane %v2028_v1, %v7422_v63 }
 0x1eb   : > { %v5620_v54 = vsel %vm5603_vm3, %v3207_v4, 0  ;;  %v5687_v62 = vsel %vm5603_vm3, %v3215_v23, 0  ;;  %v2087_v43 = vrot.slane %v2079_v42, %v7422_v63  ;;  %v2094_v46 = vrot.slane %v2080_v29, %v7422_v63 }
 0x1ec   : > { %6730 = vmatpush3.bf16.xpose.msra.mxu1 %v5620_v54  ;;  %6750 = vmatpush3.bf16.xpose.msra.mxu0 %v5687_v62  ;;  %v3067_v9 = vcombine.low %v2019_v14, %v2026_v41  ;;  %v6514_v11 = vcombine.high %v2019_v14, %v2026_v41  ;;  %v3083_v6 = vcombine.low %v2035_v37, %v2042_v26 }
 0x1ed   : > { %v6515_v30 = vcombine.high %v2035_v37, %v2042_v26  ;;  %v2095_v39 = vcombine.low %v2062_v33, %v2078_v3  ;;  %v2096_v40 = vcombine.high %v2062_v33, %v2078_v3  ;;  %v3135_v45 = vcombine.low %v2087_v43, %v2094_v46  ;;  %6731 = vmatprep.subr.bf16.mxu1 %v9343_v53  ;;  %v725_v54 = vpop.permute.xlu0 %724 }
 0x1ee   : > { %v8040_v4 = vrot.slane %v3067_v9, %v7418_v57  ;;  %v8043_v23 = vrot.slane %v6514_v11, %v7418_v57  ;;  %v8046_v42 = vrot.slane %v3083_v6, %v7418_v57  ;;  %v6516_v13 = vcombine.high %v2087_v43, %v2094_v46  ;;  %6751 = vmatprep.subr.bf16.mxu0 %v9343_v53 }
 0x1ef   : > { %v8050_v60 = vrot.slane %v6515_v30, %v7418_v57  ;;  %v2103_v33 = vrot.slane %v2095_v39, %v7422_v63  ;;  %v2110_v15 = vrot.slane %v2096_v40, %v7422_v63  ;;  %v8055_v3 = vrot.slane %v3135_v45, %v7418_v57 }
 0x1f0   : > { %v8058_v35 = vrot.slane %v6516_v13, %v7418_v57  ;;  %v727_v36 = vcombine.low %v7255_v20, %v722_v34  ;;  %v728_v1 = vcombine.high %v7255_v20, %v722_v34  ;;  %v2827_v29 = vcombine.low %v7813_v28, %v7816_v19 }
 0x1f1   : > { %v3151_v14 = vcombine.low %v2103_v33, %v2110_v15  ;;  %v6517_v41 = vcombine.high %v2103_v33, %v2110_v15  ;;  %v2843_v37 = vcombine.low %v7822_v61, %v7825_v5  ;;  %v2895_v26 = vcombine.low %v7829_v56, %v7840_v59 }
 0x1f2   : > { %v735_v62 = vrot.slane %v727_v36, %v7418_v57  ;;  %v742_v43 = vrot.slane %v728_v1, %v7418_v57  ;;  %v2835_v46 = vrot.slane %v2827_v29, %v7422_v63  ;;  %v2911_v20 = vcombine.low %v7852_v0, %v7855_v50 }
 0x1f3   : > { %v8074_v9 = vrot.slane %v3151_v14, %v7418_v57  ;;  %v8077_v11 = vrot.slane %v6517_v41, %v7418_v57  ;;  %v2851_v6 = vrot.slane %v2843_v37, %v7422_v63  ;;  %v2903_v30 = vrot.slane %v2895_v26, %v7422_v63 }
 0x1f4   : > { %v2919_v39 = vrot.slane %v2911_v20, %v7422_v63  ;;  %v743_v40 = vcombine.low %v719_v32, %v725_v54  ;;  %v744_v45 = vcombine.high %v719_v32, %v725_v54  ;;  %v2963_v34 = vcombine.low %v7979_v31, %v7982_v22 }
 0x1f5   : > { %v2859_v13 = vcombine.low %v2835_v46, %v2851_v6  ;;  %v2860_v33 = vcombine.high %v2835_v46, %v2851_v6  ;;  %v2979_v15 = vcombine.low %v7987_v51, %v7990_v55  ;;  %v3031_v36 = vcombine.low %v7995_v52, %v7998_v21 }
 0x1f6   : > { %v2927_v1 = vcombine.low %v2903_v30, %v2919_v39  ;;  %v2928_v29 = vcombine.high %v2903_v30, %v2919_v39  ;;  %v751_v14 = vrot.slane %v743_v40, %v7418_v57  ;;  %v758_v41 = vrot.slane %v744_v45, %v7418_v57 }
 0x1f7   : > { %v2971_v37 = vrot.slane %v2963_v34, %v7422_v63  ;;  %v2987_v32 = vrot.slane %v2979_v15, %v7422_v63  ;;  %v3039_v26 = vrot.slane %v3031_v36, %v7422_v63  ;;  %v3047_v54 = vcombine.low %v8003_v2, %v8006_v17 }
 0x1f8   : > { %v3208_v46 = vpack.c.bf16 %v2927_v1, %v2859_v13  ;;  %v3216_v20 = vpack.c.bf16 %v2928_v29, %v2860_v33  ;;  %v759_v6 = vcombine.low %v735_v62, %v751_v14  ;;  %v760_v51 = vcombine.high %v735_v62, %v751_v14 }
 0x1f9   : > { %v775_v52 = vcombine.low %v742_v43, %v758_v41  ;;  %v776_v21 = vcombine.high %v742_v43, %v758_v41  ;;  %v2995_v30 = vcombine.low %v2971_v37, %v2987_v32  ;;  %v3055_v39 = vrot.slane %v3047_v54, %v7422_v63 }
 0x1fa   : > { %v5623_v40 = vsel %vm5603_vm3, %v3208_v46, 0  ;;  %v5690_v45 = vsel %vm5603_vm3, %v3216_v20, 0  ;;  %v767_v34 = vrot.slane %v759_v6, %v7422_v63  ;;  %v774_v15 = vrot.slane %v760_v51, %v7422_v63 }
 0x1fb   : > { %6732 = vmatpush3.bf16.xpose.msra.mxu1 %v5623_v40  ;;  %6752 = vmatpush3.bf16.xpose.msra.mxu0 %v5690_v45  ;;  %v783_v13 = vrot.slane %v775_v52, %v7422_v63  ;;  %v790_v33 = vrot.slane %v776_v21, %v7422_v63  ;;  %v3063_v62 = vcombine.low %v3039_v26, %v3055_v39 }
 0x1fc   : > { %v795_v36 = vcombine.low %v767_v34, %v774_v15  ;;  %v6484_v43 = vcombine.high %v767_v34, %v774_v15  ;;  %6733 = vmatprep.subr.bf16.mxu1 %v9343_v53  ;;  %6753 = vmatprep.subr.bf16.mxu0 %v9343_v53  ;;  %v2996_v1 = vcombine.high %v2971_v37, %v2987_v32 }
 0x1fd   : > { %v811_v29 = vcombine.low %v783_v13, %v790_v33  ;;  %v6485_v14 = vcombine.high %v783_v13, %v790_v33  ;;  %v3209_v41 = vpack.c.bf16 %v3063_v62, %v2995_v30  ;;  %v3064_v54 = vcombine.high %v3039_v26, %v3055_v39 }
 0x1fe   : > { %v8105_v51 = vrot.slane %v795_v36, %v7418_v57  ;;  %v8108_v46 = vrot.slane %v6484_v43, %v7418_v57  ;;  %v3099_v52 = vcombine.low %v8040_v4, %v8043_v23  ;;  %v3115_v21 = vcombine.low %v8046_v42, %v8050_v60 }
 0x1ff   : > { %v8115_v20 = vrot.slane %v811_v29, %v7418_v57  ;;  %v8118_v37 = vrot.slane %v6485_v14, %v7418_v57  ;;  %v5626_v32 = vsel %vm5603_vm3, %v3209_v41, 0  ;;  %v3217_v26 = vpack.c.bf16 %v3064_v54, %v2996_v1 }
 0x200   : > { %v827_v6 = vcombine.low %v8105_v51, %v8108_v46  ;;  %v3107_v39 = vrot.slane %v3099_v52, %v7422_v63  ;;  %v3123_v40 = vrot.slane %v3115_v21, %v7422_v63  ;;  %v3167_v13 = vcombine.low %v8055_v3, %v8058_v35 }
 0x201   : > { %9368 = vst [vmem:[#allocation53_spill] sm:$0xff] %v8118_v37  ;;  %v843_v45 = vcombine.low %v8115_v20, %v8118_v37  ;;  %v5693_v15 = vsel %vm5603_vm3, %v3217_v26, 0  ;;  %v3183_v36 = vcombine.low %v8074_v9, %v8077_v11  ;;  %v2148_v14 = vcombine.high %v7505_v48, %v7508_v18  ;;  %v9376_v37 = vld [vmem:[#allocation37_spill] sm:$0xff] }
 0x202   : > { %v835_v33 = vrot.slane %v827_v6, %v7422_v63  ;;  %v3131_v62 = vcombine.low %v3107_v39, %v3123_v40  ;;  %v3132_v43 = vcombine.high %v3107_v39, %v3123_v40  ;;  %v3175_v29 = vrot.slane %v3167_v13, %v7422_v63  ;;  %v9371_v13 = vld [vmem:[#allocation17_spill] sm:$0xff] }
 0x203   : > { %v851_v1 = vrot.slane %v843_v45, %v7422_v63  ;;  %6734 = vmatpush3.bf16.xpose.msra.mxu1 %v5626_v32  ;;  %6754 = vmatpush3.bf16.xpose.msra.mxu0 %v5693_v15  ;;  %v3191_v41 = vrot.slane %v3183_v36, %v7422_v63  ;;  %v2164_v54 = vcombine.high %v7535_v16, %v7538_v47  ;;  %v9369_v32 = vld [vmem:[#allocation32_spill] sm:$0xff]  ;;  %v9370_v15 = vld [vmem:[#allocation18_spill] sm:$0xff] }
 0x204   : > { %6735 = vmatprep.subr.bf16.mxu1 %v9343_v53  ;;  %6755 = vmatprep.subr.bf16.mxu0 %v9343_v53  ;;  %v2216_v52 = vcombine.high %v7545_v24, %v7556_v49  ;;  %v2232_v26 = vcombine.high %v9369_v32, %v7626_v58  ;;  %v2162_v18 = vrot.slane %v2148_v14, %v7422_v63  ;;  %v9374_v32 = vld [vmem:[#allocation35_spill] sm:$0xff] }
 0x205   : > { %v859_v21 = vcombine.low %v835_v33, %v851_v1  ;;  %v3199_v6 = vcombine.low %v3175_v29, %v3191_v41  ;;  %v3200_v39 = vcombine.high %v3175_v29, %v3191_v41  ;;  %v2178_v40 = vrot.slane %v2164_v54, %v7422_v63  ;;  %v9372_v29 = vld [vmem:[#allocation20_spill] sm:$0xff]  ;;  %v9373_v41 = vld [vmem:[#allocation19_spill] sm:$0xff] }
 0x206   : > { %v2230_v48 = vrot.slane %v2216_v52, %v7422_v63  ;;  %v2246_v45 = vrot.slane %v2232_v26, %v7422_v63  ;;  %v2284_v16 = vcombine.high %v9371_v13, %v9370_v15  ;;  %v860_v47 = vcombine.high %v835_v33, %v851_v1  ;;  %v9375_v26 = vld [vmem:[#allocation34_spill] sm:$0xff]  ;;  %v9377_v15 = vld [vmem:[#allocation36_spill] sm:$0xff] }
 0x207   : > { %v3210_v36 = vpack.c.bf16 %v3199_v6, %v3131_v62  ;;  %v3218_v24 = vpack.c.bf16 %v3200_v39, %v3132_v43  ;;  %v863_v49 = vpack.c.bf16 %v859_v21, %v859_v21  ;;  %v2300_v52 = vcombine.high %v9373_v41, %v9372_v29  ;;  %v9379_v41 = vld [vmem:[#allocation39_spill] sm:$0xff] }
 0x208   : > { %v2249_v34 = vcombine.low %v2230_v48, %v2246_v45  ;;  %v2250_v30 = vcombine.high %v2230_v48, %v2246_v45  ;;  %v2298_v58 = vrot.slane %v2284_v16, %v7422_v63  ;;  %v2352_v57 = vcombine.high %v9375_v26, %v9374_v32  ;;  %v9384_v26 = vld [vmem:[#allocation28_spill] sm:$0xff] }
 0x209   : > { %v5629_v14 = vsel %vm5603_vm3, %v3210_v36, 0  ;;  %v5696_v54 = vsel %vm5603_vm3, %v3218_v24, 0  ;;  %v2368_v33 = vcombine.high %v9377_v15, %v9376_v37  ;;  %v2181_v62 = vcombine.low %v2162_v18, %v2178_v40  ;;  %v8175_v24 = vpop.permute.xlu1 %3253  ;;  %v9385_v15 = vld [vmem:[#allocation27_spill] sm:$0xff] }
 0x20a   : > { %v2182_v43 = vcombine.high %v2162_v18, %v2178_v40  ;;  %v2314_v1 = vrot.slane %v2300_v52, %v7422_v63  ;;  %v2366_v21 = vrot.slane %v2352_v57, %v7422_v63  ;;  %v2420_v39 = vcombine.high %v7688_v25, %v7691_v27  ;;  %v9378_v57 = vld [vmem:[#allocation33_spill] sm:$0xff]  ;;  %v9380_v52 = vld [vmem:[#allocation38_spill] sm:$0xff]  ;;  %v9381_v25 = vld [vmem:[#allocation24_spill] sm:$0xff] }
 0x20b   : > { %6736 = vmatpush3.bf16.xpose.msra.mxu1 %v5629_v14  ;;  %6756 = vmatpush3.bf16.xpose.msra.mxu0 %v5696_v54  ;;  %v2382_v6 = vrot.slane %v2368_v33, %v7422_v63  ;;  %v864_v48 = vpack.c.bf16 %v860_v47, %v860_v47  ;;  %v3219_v45 = vpack.c.bf16 %v2249_v34, %v2181_v62  ;;  %v9382_v27 = vld [vmem:[#allocation23_spill] sm:$0xff] }
 0x20c   : > { %6761 = vmatprep.subr.bf16.mxu1 %v9343_v53  ;;  %6781 = vmatprep.subr.bf16.mxu0 %v9343_v53  ;;  %v3227_v37 = vpack.c.bf16 %v2250_v30, %v2182_v43  ;;  %v2317_v13 = vcombine.low %v2298_v58, %v2314_v1  ;;  %v2434_v18 = vrot.slane %v2420_v39, %v7422_v63  ;;  %v9383_v30 = vld [vmem:[#allocation25_spill] sm:$0xff] }
 0x20d   : > { %v2385_v16 = vcombine.low %v2366_v21, %v2382_v6  ;;  %v2386_v36 = vcombine.high %v2366_v21, %v2382_v6  ;;  %v2436_v40 = vcombine.high %v7694_v38, %v7698_v8  ;;  %v2488_v29 = vcombine.high %v9378_v57, %v7710_v44  ;;  %v8188_v8 = vpop.permute.xlu0 %3251  ;;  %v9388_v57 = vld [vmem:[#allocation45_spill] sm:$0xff] }
 0x20e   : > { %v2504_v14 = vcombine.high %v9380_v52, %v9379_v41  ;;  %v2556_v34 = vcombine.high %v9382_v27, %v9381_v25  ;;  %v2572_v47 = vcombine.high %v9383_v30, %v7588_v10  ;;  %v2318_v54 = vcombine.high %v2298_v58, %v2314_v1  ;;  %v9391_v25 = vld [vmem:[#allocation46_spill] sm:$0xff]  ;;  %v9393_v30 = vld [vmem:[#allocation48_spill] sm:$0xff] }
 0x20f   : > { %v2450_v32 = vrot.slane %v2436_v40, %v7422_v63  ;;  %v2624_v38 = vcombine.high %v9385_v15, %v9384_v26  ;;  %v3220_v33 = vpack.c.bf16 %v2385_v16, %v2317_v13  ;;  %v2502_v44 = vrot.slane %v2488_v29, %v7422_v63  ;;  %v9387_v13 = vld [vmem:[#allocation29_spill] sm:$0xff]  ;;  %v8206_v16 = vpop.permute.xlu1 %3299  ;;  %v9389_v29 = vld [vmem:[#allocation44_spill] sm:$0xff] }
 0x210   : > { %v2518_v62 = vrot.slane %v2504_v14, %v7422_v63  ;;  %v5742_v43 = vsel %vm5603_vm3, %v3219_v45, 0  ;;  %v5809_v10 = vsel %vm5603_vm3, %v3227_v37, 0  ;;  %v3228_v58 = vpack.c.bf16 %v2386_v36, %v2318_v54  ;;  %v9386_v45 = vld [vmem:[#allocation30_spill] sm:$0xff]  ;;  %v9390_v14 = vld [vmem:[#allocation47_spill] sm:$0xff] }
 0x211   : > { %v8197_v1 = vrot.slane %v2556_v34, %v7422_v63  ;;  %v2453_v21 = vcombine.low %v2434_v18, %v2450_v32  ;;  %v2454_v6 = vcombine.high %v2434_v18, %v2450_v32  ;;  %v8200_v39 = vrot.slane %v2572_v47, %v7422_v63  ;;  %v9392_v34 = vld [vmem:[#allocation49_spill] sm:$0xff] }
 0x212   : > { %6738 = vmatmul.mubr.msk.bf16.vlgmr.msra.gmra.mrb[16].mxu1 %vm5603_vm3, %v863_v49  ;;  %6758 = vmatmul.mubr.msk.bf16.vlgmr.msra.gmra.mrb[20].mxu0 %vm5603_vm3, %v864_v48  ;;  %v2521_v49 = vcombine.low %v2502_v44, %v2518_v62  ;;  %v2522_v48 = vcombine.high %v2502_v44, %v2518_v62  ;;  %v2640_v37 = vcombine.high %v9387_v13, %v9386_v45  ;;  %v5745_v36 = vsel %vm5603_vm3, %v3220_v33, 0 }
 0x213   : > { %6762 = vmatpush3.bf16.xpose.msra.mxu1 %v5742_v43  ;;  %6782 = vmatpush3.bf16.xpose.msra.mxu0 %v5809_v10  ;;  %v8210_v40 = vrot.slane %v2624_v38, %v7422_v63  ;;  %v2692_v18 = vcombine.high %v7912_v7, %v7915_v12  ;;  %v2708_v41 = vcombine.high %v9389_v29, %v9388_v57  ;;  %v8229_v7 = vpop.permute.xlu0 %3301  ;;  %v5812_v12 = vsel %vm5603_vm3, %v3228_v58, 0 }
 0x214   : > { %6763 = vmatprep.subr.bf16.mxu1 %v9343_v53  ;;  %6783 = vmatprep.subr.bf16.mxu0 %v9343_v53  ;;  %v8219_v52 = vrot.slane %v2640_v37, %v7422_v63  ;;  %v2760_v27 = vcombine.high %v9391_v25, %v9390_v14  ;;  %v2776_v47 = vcombine.high %v9393_v30, %v9392_v34  ;;  %v9395_v34 = vld [vmem:[#allocation52_spill] sm:$0xff]  ;;  %v9396_v30 = vld [vmem:[#allocation51_spill] sm:$0xff] }
 0x215   : > { %6777 = vmatprep.mubr.msk.bf16.mxu1 %vm7075_vm1, %v9343_v53  ;;  %v2828_v54 = vcombine.high %v7813_v28, %v7816_v19  ;;  %6797 = vmatprep.mubr.msk.bf16.mxu0 %vm7075_vm1, %v9343_v53  ;;  %v2589_v32 = vcombine.low %v8197_v1, %v8200_v39  ;;  %v2706_v26 = vrot.slane %v2692_v18, %v7422_v63 }
 0x216   : > { %v2722_v15 = vrot.slane %v2708_v41, %v7422_v63  ;;  %v3221_v38 = vpack.c.bf16 %v2521_v49, %v2453_v21  ;;  %v3229_v33 = vpack.c.bf16 %v2522_v48, %v2454_v6  ;;  %v2774_v44 = vrot.slane %v2760_v27, %v7422_v63  ;;  %v8245_v6 = vpop.permute.xlu1 %3347  ;;  %v9394_v41 = vld [vmem:[#allocation50_spill] sm:$0xff] }
 0x217   : > { %v2790_v28 = vrot.slane %v2776_v47, %v7422_v63  ;;  %v2842_v43 = vrot.slane %v2828_v54, %v7422_v63  ;;  %v2844_v10 = vcombine.high %v7822_v61, %v7825_v5  ;;  %v2657_v58 = vcombine.low %v8210_v40, %v8219_v52 }
 0x218   : > { %v2725_v19 = vcombine.low %v2706_v26, %v2722_v15  ;;  %v2726_v62 = vcombine.high %v2706_v26, %v2722_v15  ;;  %v2590_v45 = vcombine.high %v8197_v1, %v8200_v39  ;;  %v2896_v48 = vcombine.high %v7829_v56, %v7840_v59 }
 0x219   : > { %v2793_v13 = vcombine.low %v2774_v44, %v2790_v28  ;;  %v2794_v21 = vcombine.high %v2774_v44, %v2790_v28  ;;  %v2858_v49 = vrot.slane %v2844_v10, %v7422_v63  ;;  %v2912_v61 = vcombine.high %v7852_v0, %v7855_v50 }
 0x21a   : > { %v5748_v5 = vsel %vm5603_vm3, %v3221_v38, 0  ;;  %v5815_v1 = vsel %vm5603_vm3, %v3229_v33, 0  ;;  %v2910_v56 = vrot.slane %v2896_v48, %v7422_v63  ;;  %v3222_v50 = vpack.c.bf16 %v2657_v58, %v2589_v32 }
 0x21b   : > { %6764 = vmatpush3.bf16.xpose.msra.mxu1 %v5745_v36  ;;  %6784 = vmatpush3.bf16.xpose.msra.mxu0 %v5812_v12  ;;  %v8256_v39 = vpack.c.bf16 %v2793_v13, %v2725_v19  ;;  %v8258_v37 = vpack.c.bf16 %v2794_v21, %v2726_v62  ;;  %v8260_v36 = vpop.permute.xlu0 %3349  ;;  %v2861_v18 = vcombine.low %v2842_v43, %v2858_v49 }
 0x21c   : > { %6765 = vmatprep.subr.bf16.mxu1 %v9343_v53  ;;  %6785 = vmatprep.subr.bf16.mxu0 %v9343_v53  ;;  %v2926_v59 = vrot.slane %v2912_v61, %v7422_v63  ;;  %v2862_v0 = vcombine.high %v2842_v43, %v2858_v49  ;;  %v2658_v57 = vcombine.high %v8210_v40, %v8219_v52  ;;  %v5751_v61 = vsel %vm5603_vm3, %v3222_v50, 0 }
 0x21d   : > { %v2964_v29 = vcombine.high %v7979_v31, %v7982_v22  ;;  %v2980_v14 = vcombine.high %v9394_v41, %v7990_v55  ;;  %v3032_v47 = vcombine.high %v9396_v30, %v9395_v34  ;;  %v3048_v54 = vcombine.high %v8003_v2, %v8006_v17  ;;  %v8280_v22 = vpop.permute.xlu1 %3255 }
 0x21e   : > { %v2929_v25 = vcombine.low %v2910_v56, %v2926_v59  ;;  %v2930_v27 = vcombine.high %v2910_v56, %v2926_v59  ;;  %v3100_v40 = vcombine.high %v8040_v4, %v8043_v23  ;;  %v3116_v31 = vcombine.high %v8046_v42, %v8050_v60 }
 0x21f   : > { %v2978_v12 = vrot.slane %v2964_v29, %v7422_v63  ;;  %v2994_v32 = vrot.slane %v2980_v14, %v7422_v63  ;;  %v3046_v26 = vrot.slane %v3032_v47, %v7422_v63  ;;  %v3062_v2 = vrot.slane %v3048_v54, %v7422_v63  ;;  %v8290_v4 = vpop.permute.xlu0 %3257 }
 0x220   : > { %v8282_v55 = vpack.c.bf16 %v2929_v25, %v2861_v18  ;;  %v8284_v52 = vpack.c.bf16 %v2930_v27, %v2862_v0  ;;  %v3114_v38 = vrot.slane %v3100_v40, %v7422_v63  ;;  %v3130_v33 = vrot.slane %v3116_v31, %v7422_v63 }
 0x221   : > { %v2997_v17 = vcombine.low %v2978_v12, %v2994_v32  ;;  %v2998_v15 = vcombine.high %v2978_v12, %v2994_v32  ;;  %v3230_v23 = vpack.c.bf16 %v2658_v57, %v2590_v45  ;;  %v3065_v42 = vcombine.low %v3046_v26, %v3062_v2  ;;  %v8314_v48 = vpop.permute.xlu1 %3303  ;;  %v9402_v57 = vld [vmem:[#allocation12_spill] sm:$0xff] }
 0x222   : > { %v3066_v60 = vcombine.high %v3046_v26, %v3062_v2  ;;  %v3133_v44 = vcombine.low %v3114_v38, %v3130_v33  ;;  %v3168_v28 = vcombine.high %v8055_v3, %v8058_v35  ;;  %v3184_v19 = vcombine.high %v8074_v9, %v8077_v11  ;;  %v9398_v3 = vld [vmem:[#allocation53_spill] sm:$0xff]  ;;  %v9400_v9 = vld [vmem:[#allocation11_spill] sm:$0xff] }
 0x223   : > { %6766 = vmatpush3.bf16.xpose.msra.mxu1 %v5748_v5  ;;  %6786 = vmatpush3.bf16.xpose.msra.mxu0 %v5815_v1  ;;  %v8298_v62 = vpack.c.bf16 %v3065_v42, %v2997_v17  ;;  %v3134_v10 = vcombine.high %v3114_v38, %v3130_v33  ;;  %v9397_v58 = vcombine.high %v8105_v51, %v8108_v46  ;;  %v9401_v46 = vld [vmem:[#allocation9_spill] sm:$0xff]  ;;  %v5818_v0 = vsel %vm5603_vm3, %v3230_v23, 0 }
 0x224   : > { %6767 = vmatprep.subr.bf16.mxu1 %v9343_v53  ;;  %6787 = vmatprep.subr.bf16.mxu0 %v9343_v53  ;;  %v8300_v43 = vpack.c.bf16 %v3066_v60, %v2998_v15  ;;  %v3182_v13 = vrot.slane %v3168_v28, %v7422_v63  ;;  %v3198_v21 = vrot.slane %v3184_v19, %v7422_v63  ;;  %v5754_v34 = vsel %vm5603_vm3, %v8256_v39, 0  ;;  %v9404_v15 = vld [vmem:[#allocation8_spill] sm:$0xff] }
 0x225   : > { %v842_v45 = vrot.slane %v9397_v58, %v7422_v63  ;;  %v9399_v35 = vcombine.high %v8115_v20, %v9398_v3  ;;  %v3463_v11 = vcombine.low %v9400_v9, %v8229_v7  ;;  %v3464_v51 = vcombine.high %v9400_v9, %v8229_v7  ;;  %v8325_v20 = vpop.permute.xlu0 %3305  ;;  %v8356_v40 = vpop.permute.xlu1 %3351 }
 0x226   : > { %v3395_v5 = vcombine.low %v9401_v46, %v8206_v16  ;;  %v3201_v1 = vcombine.low %v3182_v13, %v3198_v21  ;;  %v3202_v18 = vcombine.high %v3182_v13, %v3198_v21  ;;  %v3396_v7 = vcombine.high %v9401_v46, %v8206_v16 }
 0x227   : > { %v858_v49 = vrot.slane %v9399_v35, %v7422_v63  ;;  %v3471_v29 = vrot.slane %v3463_v11, %v9402_v57  ;;  %v3478_v50 = vrot.slane %v3464_v51, %v9402_v57  ;;  %v3479_v16 = vcombine.low %v8175_v24, %v8260_v36 }
 0x228   : > { %v8332_v41 = vpack.c.bf16 %v3201_v1, %v3133_v44  ;;  %v8334_v14 = vpack.c.bf16 %v3202_v18, %v3134_v10  ;;  %v3403_v27 = vrot.slane %v3395_v5, %v9402_v57  ;;  %v3480_v47 = vcombine.high %v8175_v24, %v8260_v36  ;;  %v9403_v36 = vld [vmem:[#allocation10_spill] sm:$0xff] }
 0x229   : > { %v8321_v56 = vcombine.low %v842_v45, %v858_v49  ;;  %v8323_v59 = vcombine.high %v842_v45, %v858_v49  ;;  %v5821_v54 = vsel %vm5603_vm3, %v8258_v37, 0  ;;  %v3410_v12 = vrot.slane %v3396_v7, %v9402_v57  ;;  %v8370_v58 = vpop.permute.xlu1 %3259 }
 0x22a   : > { %v3411_v39 = vcombine.low %v8188_v8, %v8245_v6  ;;  %v3412_v32 = vcombine.high %v8188_v8, %v8245_v6  ;;  %v3487_v31 = vrot.slane %v3479_v16, %v9402_v57  ;;  %v3494_v24 = vrot.slane %v3480_v47, %v9402_v57  ;;  %v3354_v6 = vpop.permute.xlu0 %3353 }
 0x22b   : > { %v865_v25 = vpack.c.bf16 %v8321_v56, %v8321_v56  ;;  %6768 = vmatpush3.bf16.xpose.msra.mxu1 %v5751_v61  ;;  %6788 = vmatpush3.bf16.xpose.msra.mxu0 %v5818_v0  ;;  %v866_v30 = vpack.c.bf16 %v8323_v59, %v8323_v59  ;;  %v3599_v26 = vcombine.low %v9403_v36, %v8325_v20  ;;  %v5757_v61 = vsel %vm5603_vm3, %v8282_v55, 0 }
 0x22c   : > { %6769 = vmatprep.subr.bf16.mxu1 %v9343_v53  ;;  %6789 = vmatprep.subr.bf16.mxu0 %v9343_v53  ;;  %v3600_v37 = vcombine.high %v9403_v36, %v8325_v20  ;;  %v3419_v2 = vrot.slane %v3411_v39, %v9402_v57  ;;  %v3426_v17 = vrot.slane %v3412_v32, %v9402_v57  ;;  %v5824_v1 = vsel %vm5603_vm3, %v8284_v52, 0 }
 0x22d   : > { %v3531_v38 = vcombine.low %v9404_v15, %v8314_v48  ;;  %v3532_v8 = vcombine.high %v9404_v15, %v8314_v48  ;;  %v3495_v33 = vcombine.low %v3471_v29, %v3487_v31  ;;  %v3496_v23 = vcombine.high %v3471_v29, %v3487_v31  ;;  %v3308_v47 = vpop.permute.xlu1 %3307 }
 0x22e   : > { %v3511_v42 = vcombine.low %v3478_v50, %v3494_v24  ;;  %v3512_v60 = vcombine.high %v3478_v50, %v3494_v24  ;;  %v3427_v44 = vcombine.low %v3403_v27, %v3419_v2  ;;  %v3428_v28 = vcombine.high %v3403_v27, %v3419_v2  ;;  %v8380_v48 = vpop.permute.xlu0 %3261 }
 0x22f   : > { %v3443_v19 = vcombine.low %v3410_v12, %v3426_v17  ;;  %v3444_v10 = vcombine.high %v3410_v12, %v3426_v17  ;;  %v3503_v45 = vrot.slane %v3495_v33, %v7422_v63  ;;  %v3510_v13 = vrot.slane %v3496_v23, %v7422_v63 }
 0x230   : > { %v3519_v21 = vrot.slane %v3511_v42, %v7422_v63  ;;  %v3526_v3 = vrot.slane %v3512_v60, %v7422_v63  ;;  %v3435_v35 = vrot.slane %v3427_v44, %v7422_v63  ;;  %v3442_v49 = vrot.slane %v3428_v28, %v7422_v63  ;;  %v9411_v42 = vld [vmem:[#allocation16_spill] sm:$0xff] }
 0x231   : > { %v3451_v9 = vrot.slane %v3443_v19, %v7422_v63  ;;  %v3458_v11 = vrot.slane %v3444_v10, %v7422_v63  ;;  %v4551_v51 = vcombine.low %v3503_v45, %v3510_v13  ;;  %v6520_v46 = vcombine.high %v3503_v45, %v3510_v13  ;;  %v3356_v13 = vpop.permute.xlu1 %3355 }
 0x232   : > { %v4567_v5 = vcombine.low %v3519_v21, %v3526_v3  ;;  %v6521_v18 = vcombine.high %v3519_v21, %v3526_v3  ;;  %v4483_v20 = vcombine.low %v3435_v35, %v3442_v49  ;;  %v6518_v0 = vcombine.high %v3435_v35, %v3442_v49  ;;  %v8418_v17 = vpop.permute.xlu0 %3309 }
 0x233   : > { %6770 = vmatpush3.bf16.xpose.msra.mxu1 %v5754_v34  ;;  %6790 = vmatpush3.bf16.xpose.msra.mxu0 %v5821_v54  ;;  %v8389_v29 = vrot.slane %v4551_v51, %v9402_v57  ;;  %v8392_v50 = vrot.slane %v6520_v46, %v9402_v57  ;;  %v4499_v7 = vcombine.low %v3451_v9, %v3458_v11  ;;  %v5827_v28 = vsel %vm5603_vm3, %v8300_v43, 0 }
 0x234   : > { %6771 = vmatprep.subr.bf16.mxu1 %v9343_v53  ;;  %6791 = vmatprep.subr.bf16.mxu0 %v9343_v53  ;;  %v8395_v55 = vrot.slane %v4567_v5, %v9402_v57  ;;  %v8398_v27 = vrot.slane %v6521_v18, %v9402_v57  ;;  %v8401_v34 = vrot.slane %v4483_v20, %v9402_v57 }
 0x235   : > { %9405 = vst [vmem:[#allocation32_spill] sm:$0xff] %v8389_v29  ;;  %9406 = vst [vmem:[#allocation18_spill] sm:$0xff] %v8392_v50  ;;  %v8404_v52 = vrot.slane %v6518_v0, %v9402_v57  ;;  %v6519_v16 = vcombine.high %v3451_v9, %v3458_v11  ;;  %v8407_v54 = vrot.slane %v4499_v7, %v9402_v57 }
 0x236   : > { %9407 = vst [vmem:[#allocation17_spill] sm:$0xff] %v8395_v55  ;;  %9408 = vst [vmem:[#allocation20_spill] sm:$0xff] %v8398_v27  ;;  %v3607_v12 = vrot.slane %v3599_v26, %v9402_v57  ;;  %v3614_v39 = vrot.slane %v3600_v37, %v9402_v57  ;;  %v3539_v32 = vrot.slane %v3531_v38, %v9402_v57  ;;  %v9410_v37 = vld [vmem:[#allocation14_spill] sm:$0xff]  ;;  %v3358_v51 = vpop.permute.xlu0 %3357 }
 0x237   : > { %9409 = vst [vmem:[#allocation19_spill] sm:$0xff] %v8407_v54  ;;  %v8413_v31 = vrot.slane %v6519_v16, %v9402_v57  ;;  %v3546_v24 = vrot.slane %v3532_v8, %v9402_v57  ;;  %v3615_v36 = vcombine.low %v8290_v4, %v3354_v6  ;;  %v3616_v2 = vcombine.high %v8290_v4, %v3354_v6 }
 0x238   : > { %v3547_v15 = vcombine.low %v8280_v22, %v8356_v40  ;;  %v3548_v26 = vcombine.high %v8280_v22, %v8356_v40  ;;  %v3667_v33 = vcombine.low %v9410_v37, %v3308_v47  ;;  %v3668_v38 = vcombine.high %v9410_v37, %v3308_v47 }
 0x239   : > { %v3623_v23 = vrot.slane %v3615_v36, %v9402_v57  ;;  %v3630_v8 = vrot.slane %v3616_v2, %v9402_v57  ;;  %v3735_v60 = vcombine.low %v9411_v42, %v8418_v17  ;;  %v3736_v4 = vcombine.high %v9411_v42, %v8418_v17  ;;  %v8458_v17 = vpop.permute.xlu1 %3263 }
 0x23a   : > { %v5760_v6 = vsel %vm5603_vm3, %v8298_v62, 0  ;;  %v3555_v22 = vrot.slane %v3547_v15, %v9402_v57  ;;  %v3562_v40 = vrot.slane %v3548_v26, %v9402_v57  ;;  %v8437_v44 = vrot.slane %v3667_v33, %v9402_v57  ;;  %v8484_v42 = vpop.permute.xlu0 %3265 }
 0x23b   : > { %6772 = vmatpush3.bf16.xpose.msra.mxu1 %v5757_v61  ;;  %6792 = vmatpush3.bf16.xpose.msra.mxu0 %v5824_v1  ;;  %v3631_v19 = vcombine.low %v3607_v12, %v3623_v23  ;;  %v3632_v10 = vcombine.high %v3607_v12, %v3623_v23  ;;  %v3647_v45 = vcombine.low %v3614_v39, %v3630_v8  ;;  %v5763_v15 = vsel %vm5603_vm3, %v8332_v41, 0 }
 0x23c   : > { %6773 = vmatprep.subr.bf16.mxu1 %v9343_v53  ;;  %6793 = vmatprep.subr.bf16.mxu0 %v9343_v53  ;;  %v3648_v21 = vcombine.high %v3614_v39, %v3630_v8  ;;  %v3563_v62 = vcombine.low %v3539_v32, %v3555_v22  ;;  %v3564_v3 = vcombine.high %v3539_v32, %v3555_v22 }
 0x23d   : > { %v3579_v35 = vcombine.low %v3546_v24, %v3562_v40  ;;  %v3639_v49 = vrot.slane %v3631_v19, %v7422_v63  ;;  %v3646_v9 = vrot.slane %v3632_v10, %v7422_v63  ;;  %v3655_v11 = vrot.slane %v3647_v45, %v7422_v63 }
 0x23e   : > { %v3580_v61 = vcombine.high %v3546_v24, %v3562_v40  ;;  %v3662_v46 = vrot.slane %v3648_v21, %v7422_v63  ;;  %v3571_v43 = vrot.slane %v3563_v62, %v7422_v63  ;;  %v3578_v5 = vrot.slane %v3564_v3, %v7422_v63 }
 0x23f   : > { %v3587_v1 = vrot.slane %v3579_v35, %v7422_v63  ;;  %v4687_v18 = vcombine.low %v3639_v49, %v3646_v9  ;;  %v6524_v20 = vcombine.high %v3639_v49, %v3646_v9  ;;  %v3682_v7 = vrot.slane %v3668_v38, %v9402_v57  ;;  %v8508_v35 = vpop.permute.xlu1 %3311 }
 0x240   : > { %v3594_v0 = vrot.slane %v3580_v61, %v7422_v63  ;;  %v4703_v16 = vcombine.low %v3655_v11, %v3662_v46  ;;  %v6525_v47 = vcombine.high %v3655_v11, %v3662_v46  ;;  %v4619_v12 = vcombine.low %v3571_v43, %v3578_v5 }
 0x241   : > { %v6522_v39 = vcombine.high %v3571_v43, %v3578_v5  ;;  %v8453_v32 = vrot.slane %v4687_v18, %v9402_v57  ;;  %v8456_v24 = vrot.slane %v6524_v20, %v9402_v57  ;;  %v5830_v38 = vsel %vm5603_vm3, %v8334_v14, 0 }
 0x242   : > { %v4635_v36 = vcombine.low %v3587_v1, %v3594_v0  ;;  %v6523_v2 = vcombine.high %v3587_v1, %v3594_v0  ;;  %v8463_v26 = vrot.slane %v4703_v16, %v9402_v57  ;;  %v8466_v37 = vrot.slane %v6525_v47, %v9402_v57  ;;  %v8512_v1 = vpop.permute.xlu0 %3313 }
 0x243   : > { %9412 = vst [vmem:[#allocation35_spill] sm:$0xff] %v8453_v32  ;;  %9413 = vst [vmem:[#allocation34_spill] sm:$0xff] %v8456_v24  ;;  %6774 = vmatpush3.bf16.xpose.msra.mxu1 %v5760_v6  ;;  %6794 = vmatpush3.bf16.xpose.msra.mxu0 %v5827_v28  ;;  %v8469_v33 = vrot.slane %v4619_v12, %v9402_v57  ;;  %v8476_v23 = vrot.slane %v6522_v39, %v9402_v57 }
 0x244   : > { %9414 = vst [vmem:[#allocation37_spill] sm:$0xff] %v8463_v26  ;;  %9415 = vst [vmem:[#allocation36_spill] sm:$0xff] %v8466_v37  ;;  %6775 = vmatprep.subr.bf16.mxu1 %v9343_v53  ;;  %6795 = vmatprep.subr.bf16.mxu0 %v9343_v53  ;;  %v8479_v41 = vrot.slane %v4635_v36, %v9402_v57  ;;  %v8482_v8 = vrot.slane %v6523_v2, %v9402_v57 }
 0x245   : > { %9416 = vst [vmem:[#allocation33_spill] sm:$0xff] %v8469_v33  ;;  %9417 = vst [vmem:[#allocation39_spill] sm:$0xff] %v8476_v23  ;;  %v3743_v6 = vrot.slane %v3735_v60, %v9402_v57  ;;  %v3750_v22 = vrot.slane %v3736_v4, %v9402_v57  ;;  %v3683_v40 = vcombine.low %v8370_v58, %v3356_v13 }
 0x246   : > { %9418 = vst [vmem:[#allocation38_spill] sm:$0xff] %v8479_v41  ;;  %9419 = vst [vmem:[#allocation24_spill] sm:$0xff] %v8482_v8  ;;  %v3684_v28 = vcombine.high %v8370_v58, %v3356_v13  ;;  %v3751_v14 = vcombine.low %v8380_v48, %v3358_v51  ;;  %v3752_v19 = vcombine.high %v8380_v48, %v3358_v51 }
 0x247   : > { %v4515_v10 = vcombine.low %v8401_v34, %v8404_v52  ;;  %v4531_v45 = vcombine.low %v8407_v54, %v8413_v31  ;;  %v3691_v21 = vrot.slane %v3683_v40, %v9402_v57  ;;  %v4583_v4 = vcombine.low %v8389_v29, %v8392_v50  ;;  %v3360_v40 = vpop.permute.xlu1 %3359  ;;  %v9428_v29 = vld [vmem:[#allocation43_spill] sm:$0xff] }
 0x248   : > { %v3698_v60 = vrot.slane %v3684_v28, %v9402_v57  ;;  %v4599_v58 = vcombine.low %v8395_v55, %v8398_v27  ;;  %v3759_v13 = vrot.slane %v3751_v14, %v9402_v57  ;;  %v3766_v48 = vrot.slane %v3752_v19, %v9402_v57 }
 0x249   : > { %v8505_v62 = vrot.slane %v4515_v10, %v7422_v63  ;;  %v4539_v3 = vrot.slane %v4531_v45, %v7422_v63  ;;  %v3699_v49 = vcombine.low %v8437_v44, %v3691_v21  ;;  %v3700_v9 = vcombine.high %v8437_v44, %v3691_v21 }
 0x24a   : > { %v3715_v11 = vcombine.low %v3682_v7, %v3698_v60  ;;  %v3716_v61 = vcombine.high %v3682_v7, %v3698_v60  ;;  %v3767_v51 = vcombine.low %v3743_v6, %v3759_v13  ;;  %v3768_v46 = vcombine.high %v3743_v6, %v3759_v13 }
 0x24b   : > { %v3783_v43 = vcombine.low %v3750_v22, %v3766_v48  ;;  %v3784_v5 = vcombine.high %v3750_v22, %v3766_v48  ;;  %6776 = vmatpush3.bf16.xpose.msra.mxu1 %v5763_v15  ;;  %6796 = vmatpush3.bf16.xpose.msra.mxu0 %v5830_v38  ;;  %v3707_v18 = vrot.slane %v3699_v49, %v7422_v63  ;;  %v3362_v48 = vpop.permute.xlu0 %3361 }
 0x24c   : > { %v3714_v20 = vrot.slane %v3700_v9, %v7422_v63  ;;  %v3723_v0 = vrot.slane %v3715_v11, %v7422_v63  ;;  %v3730_v16 = vrot.slane %v3716_v61, %v7422_v63  ;;  %v3775_v44 = vrot.slane %v3767_v51, %v7422_v63  ;;  %6801 = vmatprep.subr.bf16.mxu1 %v9343_v53 }
 0x24d   : > { %v3782_v7 = vrot.slane %v3768_v46, %v7422_v63  ;;  %v3791_v47 = vrot.slane %v3783_v43, %v7422_v63  ;;  %v3798_v36 = vrot.slane %v3784_v5, %v7422_v63  ;;  %6821 = vmatprep.subr.bf16.mxu0 %v9343_v53  ;;  %v4547_v2 = vcombine.low %v8505_v62, %v4539_v3 }
 0x24e   : > { %v4755_v12 = vcombine.low %v3707_v18, %v3714_v20  ;;  %v6526_v39 = vcombine.high %v3707_v18, %v3714_v20  ;;  %v4771_v15 = vcombine.low %v3723_v0, %v3730_v16  ;;  %v6527_v38 = vcombine.high %v3723_v0, %v3730_v16  ;;  %v8576_v18 = vpop.permute.xlu1 %3267 }
 0x24f   : > { %v4823_v6 = vcombine.low %v3775_v44, %v3782_v7  ;;  %v6528_v22 = vcombine.high %v3775_v44, %v3782_v7  ;;  %v4839_v19 = vcombine.low %v3791_v47, %v3798_v36  ;;  %v6529_v10 = vcombine.high %v3791_v47, %v3798_v36  ;;  %v8584_v36 = vpop.permute.xlu0 %3269 }
 0x250   : > { %v8526_v28 = vrot.slane %v4755_v12, %v9402_v57  ;;  %v8529_v14 = vrot.slane %v6526_v39, %v9402_v57  ;;  %v8532_v45 = vrot.slane %v4771_v15, %v9402_v57  ;;  %v8535_v21 = vrot.slane %v6527_v38, %v9402_v57  ;;  %v9421_v38 = vld [vmem:[#allocation15_spill] sm:$0xff] }
 0x251   : > { %v8538_v60 = vrot.slane %v4823_v6, %v9402_v57  ;;  %v8541_v13 = vrot.slane %v6528_v22, %v9402_v57  ;;  %v8544_v49 = vrot.slane %v4839_v19, %v9402_v57  ;;  %v8547_v9 = vrot.slane %v6529_v10, %v9402_v57 }
 0x252   : > { %v4591_v11 = vrot.slane %v4583_v4, %v7422_v63  ;;  %v4607_v61 = vrot.slane %v4599_v58, %v7422_v63  ;;  %6778 = vmatmul.mubr.msk.bf16.vlgmr.msra.gmra.mrb[20].mxu1 %vm5603_vm3, %v865_v25  ;;  %6798 = vmatmul.mubr.msk.bf16.vlgmr.msra.gmra.mrb[24].mxu0 %vm5603_vm3, %v866_v30  ;;  %v4548_v51 = vcombine.high %v8505_v62, %v4539_v3  ;;  %v9420_v62 = vld [vmem:[#allocation13_spill] sm:$0xff] }
 0x253   : > { %v4651_v46 = vcombine.low %v8469_v33, %v8476_v23  ;;  %v4667_v4 = vcombine.low %v8479_v41, %v8482_v8  ;;  %v4719_v56 = vcombine.low %v8453_v32, %v8456_v24  ;;  %v4735_v25 = vcombine.low %v8463_v26, %v8466_v37  ;;  %6817 = vmatprep.mubr.msk.bf16.mxu1 %vm7075_vm1, %v9343_v53 }
 0x254   : > { %v4615_v43 = vcombine.low %v4591_v11, %v4607_v61  ;;  %v4616_v58 = vcombine.high %v4591_v11, %v4607_v61  ;;  %v3803_v3 = vcombine.low %v9420_v62, %v8508_v35  ;;  %v3804_v5 = vcombine.high %v9420_v62, %v8508_v35  ;;  %6837 = vmatprep.mubr.msk.bf16.mxu0 %vm7075_vm1, %v9343_v53 }
 0x255   : > { %v4659_v59 = vrot.slane %v4651_v46, %v7422_v63  ;;  %v4675_v30 = vrot.slane %v4667_v4, %v7422_v63  ;;  %v4727_v16 = vrot.slane %v4719_v56, %v7422_v63  ;;  %v4743_v44 = vrot.slane %v4735_v25, %v7422_v63  ;;  %v3316_v56 = vpop.permute.xlu1 %3315 }
 0x256   : > { %v5571_v20 = vpack.c.bf16 %v4615_v43, %v4547_v2  ;;  %v5579_v0 = vpack.c.bf16 %v4616_v58, %v4548_v51  ;;  %v3811_v12 = vrot.slane %v3803_v3, %v9402_v57  ;;  %v3818_v39 = vrot.slane %v3804_v5, %v9402_v57  ;;  %v3318_v5 = vpop.permute.xlu0 %3317 }
 0x257   : > { %v4683_v7 = vcombine.low %v4659_v59, %v4675_v30  ;;  %v4684_v47 = vcombine.high %v4659_v59, %v4675_v30  ;;  %v4751_v35 = vcombine.low %v4727_v16, %v4743_v44  ;;  %v4752_v15 = vcombine.high %v4727_v16, %v4743_v44 }
 0x258   : > { %6802 = vmatpush3.bf16.msra.mxu1 %v5571_v20  ;;  %6822 = vmatpush3.bf16.msra.mxu0 %v5579_v0  ;;  %v3871_v2 = vcombine.low %v9421_v38, %v8512_v1  ;;  %v3872_v6 = vcombine.high %v9421_v38, %v8512_v1  ;;  %v3819_v22 = vcombine.low %v8458_v17, %v3360_v40 }
 0x259   : > { %6803 = vmatprep.subr.bf16.mxu1 %v9343_v53  ;;  %6823 = vmatprep.subr.bf16.mxu0 %v9343_v53  ;;  %v3820_v19 = vcombine.high %v8458_v17, %v3360_v40  ;;  %v5572_v10 = vpack.c.bf16 %v4751_v35, %v4683_v7  ;;  %v5580_v11 = vpack.c.bf16 %v4752_v15, %v4684_v47  ;;  %v9422_v17 = vld [vmem:[#allocation22_spill] sm:$0xff] }
 0x25a   : > { %v3879_v61 = vrot.slane %v3871_v2, %v9402_v57  ;;  %v3887_v51 = vcombine.low %v8484_v42, %v3362_v48  ;;  %v3886_v46 = vrot.slane %v3872_v6, %v9402_v57  ;;  %v3827_v4 = vrot.slane %v3819_v22, %v9402_v57 }
 0x25b   : > { %v3834_v43 = vrot.slane %v3820_v19, %v9402_v57  ;;  %v3888_v58 = vcombine.high %v8484_v42, %v3362_v48  ;;  %v3939_v40 = vcombine.low %v9422_v17, %v3316_v56  ;;  %v3940_v25 = vcombine.high %v9422_v17, %v3316_v56  ;;  %v3366_v56 = vpop.permute.xlu0 %3365 }
 0x25c   : > { %6804 = vmatpush3.bf16.msra.mxu1 %v5572_v10  ;;  %6824 = vmatpush3.bf16.msra.mxu0 %v5580_v11  ;;  %v3895_v1 = vrot.slane %v3887_v51, %v9402_v57  ;;  %v3835_v59 = vcombine.low %v3811_v12, %v3827_v4  ;;  %v3836_v30 = vcombine.high %v3811_v12, %v3827_v4  ;;  %v3364_v51 = vpop.permute.xlu1 %3363 }
 0x25d   : > { %v3851_v62 = vcombine.low %v3818_v39, %v3834_v43  ;;  %v3852_v3 = vcombine.high %v3818_v39, %v3834_v43  ;;  %6805 = vmatprep.subr.bf16.mxu1 %v9343_v53  ;;  %v3902_v20 = vrot.slane %v3888_v58, %v9402_v57  ;;  %v3947_v48 = vrot.slane %v3939_v40, %v9402_v57 }
 0x25e   : > { %v3903_v0 = vcombine.low %v3879_v61, %v3895_v1  ;;  %v3904_v42 = vcombine.high %v3879_v61, %v3895_v1  ;;  %6825 = vmatprep.subr.bf16.mxu0 %v9343_v53  ;;  %v3843_v16 = vrot.slane %v3835_v59, %v7422_v63  ;;  %v3850_v44 = vrot.slane %v3836_v30, %v7422_v63 }
 0x25f   : > { %v3859_v7 = vrot.slane %v3851_v62, %v7422_v63  ;;  %v3866_v47 = vrot.slane %v3852_v3, %v7422_v63  ;;  %v3919_v35 = vcombine.low %v3886_v46, %v3902_v20  ;;  %v3920_v15 = vcombine.high %v3886_v46, %v3902_v20  ;;  %v9423_v62 = vld [vmem:[#allocation31_spill] sm:$0xff] }
 0x260   : > { %v3911_v12 = vrot.slane %v3903_v0, %v7422_v63  ;;  %v3918_v39 = vrot.slane %v3904_v42, %v7422_v63  ;;  %v4891_v38 = vcombine.low %v3843_v16, %v3850_v44  ;;  %v6530_v2 = vcombine.high %v3843_v16, %v3850_v44 }
 0x261   : > { %v4907_v6 = vcombine.low %v3859_v7, %v3866_v47  ;;  %v6531_v22 = vcombine.high %v3859_v7, %v3866_v47  ;;  %v3927_v19 = vrot.slane %v3919_v35, %v7422_v63  ;;  %v3934_v10 = vrot.slane %v3920_v15, %v7422_v63  ;;  %v8651_v15 = vpop.permute.xlu1 %3271 }
 0x262   : > { %v4959_v11 = vcombine.low %v3911_v12, %v3918_v39  ;;  %v6532_v61 = vcombine.high %v3911_v12, %v3918_v39  ;;  %v8616_v4 = vrot.slane %v4891_v38, %v9402_v57  ;;  %v8619_v43 = vrot.slane %v6530_v2, %v9402_v57 }
 0x263   : > { %v8622_v58 = vrot.slane %v4907_v6, %v9402_v57  ;;  %v8625_v46 = vrot.slane %v6531_v22, %v9402_v57  ;;  %v4975_v40 = vcombine.low %v3927_v19, %v3934_v10  ;;  %v6533_v59 = vcombine.high %v3927_v19, %v3934_v10  ;;  %v8658_v19 = vpop.permute.xlu0 %3273 }
 0x264   : > { %v8628_v1 = vrot.slane %v4959_v11, %v9402_v57  ;;  %v8631_v17 = vrot.slane %v6532_v61, %v9402_v57  ;;  %v3954_v30 = vrot.slane %v3940_v25, %v9402_v57  ;;  %v4007_v3 = vcombine.low %v9423_v62, %v3318_v5 }
 0x265   : > { %v4008_v20 = vcombine.high %v9423_v62, %v3318_v5  ;;  %v3955_v0 = vcombine.low %v8576_v18, %v3364_v51  ;;  %v8638_v42 = vrot.slane %v4975_v40, %v9402_v57  ;;  %v8641_v16 = vrot.slane %v6533_v59, %v9402_v57 }
 0x266   : > { %v3956_v44 = vcombine.high %v8576_v18, %v3364_v51  ;;  %v4023_v7 = vcombine.low %v8584_v36, %v3366_v56  ;;  %v4015_v47 = vrot.slane %v4007_v3, %v9402_v57  ;;  %v4024_v5 = vcombine.high %v8584_v36, %v3366_v56 }
 0x267   : > { %v4022_v25 = vrot.slane %v4008_v20, %v9402_v57  ;;  %v3963_v12 = vrot.slane %v3955_v0, %v9402_v57  ;;  %v4787_v38 = vcombine.low %v8526_v28, %v8529_v14  ;;  %v4803_v18 = vcombine.low %v8532_v45, %v8535_v21 }
 0x268   : > { %v3970_v39 = vrot.slane %v3956_v44, %v9402_v57  ;;  %v4031_v35 = vrot.slane %v4023_v7, %v9402_v57  ;;  %v4038_v22 = vrot.slane %v4024_v5, %v9402_v57  ;;  %v4855_v36 = vcombine.low %v8538_v60, %v8541_v13 }
 0x269   : > { %v3971_v2 = vcombine.low %v3947_v48, %v3963_v12  ;;  %v3972_v6 = vcombine.high %v3947_v48, %v3963_v12 }
 0x26a   : > { %v3987_v10 = vcombine.low %v3954_v30, %v3970_v39  ;;  %v3988_v11 = vcombine.high %v3954_v30, %v3970_v39  ;;  %v4039_v61 = vcombine.low %v4015_v47, %v4031_v35  ;;  %v4040_v51 = vcombine.high %v4015_v47, %v4031_v35 }
 0x26b   : > { %v3979_v56 = vrot.slane %v3971_v2, %v7422_v63  ;;  %v3986_v40 = vrot.slane %v3972_v6, %v7422_v63  ;;  %v4055_v59 = vcombine.low %v4022_v25, %v4038_v22  ;;  %v4056_v62 = vcombine.high %v4022_v25, %v4038_v22  ;;  %v3320_v2 = vpop.permute.xlu1 %3319 }
 0x26c   : > { %v3995_v3 = vrot.slane %v3987_v10, %v7422_v63  ;;  %v4002_v48 = vrot.slane %v3988_v11, %v7422_v63  ;;  %v4047_v20 = vrot.slane %v4039_v61, %v7422_v63  ;;  %v4054_v0 = vrot.slane %v4040_v51, %v7422_v63  ;;  %v3322_v11 = vpop.permute.xlu0 %3321 }
 0x26d   : > { %v5027_v44 = vcombine.low %v3979_v56, %v3986_v40  ;;  %v6534_v7 = vcombine.high %v3979_v56, %v3986_v40  ;;  %v4063_v30 = vrot.slane %v4055_v59, %v7422_v63  ;;  %v4070_v47 = vrot.slane %v4056_v62, %v7422_v63 }
 0x26e   : > { %v5043_v12 = vcombine.low %v3995_v3, %v4002_v48  ;;  %v6535_v5 = vcombine.high %v3995_v3, %v4002_v48  ;;  %v5095_v39 = vcombine.low %v4047_v20, %v4054_v0  ;;  %v6536_v35 = vcombine.high %v4047_v20, %v4054_v0 }
 0x26f   : > { %v8671_v25 = vrot.slane %v5027_v44, %v9402_v57  ;;  %v8674_v6 = vrot.slane %v6534_v7, %v9402_v57  ;;  %v5111_v22 = vcombine.low %v4063_v30, %v4070_v47  ;;  %v6537_v10 = vcombine.high %v4063_v30, %v4070_v47  ;;  %v9424_v44 = vld [vmem:[#allocation21_spill] sm:$0xff] }
 0x270   : > { %v8677_v61 = vrot.slane %v5043_v12, %v9402_v57  ;;  %v8680_v51 = vrot.slane %v6535_v5, %v9402_v57  ;;  %v8683_v56 = vrot.slane %v5095_v39, %v9402_v57  ;;  %v8686_v40 = vrot.slane %v6536_v35, %v9402_v57  ;;  %v9425_v5 = vld [vmem:[#allocation26_spill] sm:$0xff] }
 0x271   : > { %v8689_v59 = vrot.slane %v5111_v22, %v9402_v57  ;;  %v8692_v62 = vrot.slane %v6537_v10, %v9402_v57  ;;  %v4795_v3 = vrot.slane %v4787_v38, %v7422_v63  ;;  %v4811_v48 = vrot.slane %v4803_v18, %v7422_v63  ;;  %v3368_v10 = vpop.permute.xlu1 %3367 }
 0x272   : > { %v4863_v20 = vrot.slane %v4855_v36, %v7422_v63  ;;  %v4871_v0 = vcombine.low %v8544_v49, %v8547_v9  ;;  %v4075_v7 = vcombine.low %v9424_v44, %v3320_v2  ;;  %v4076_v30 = vcombine.high %v9424_v44, %v3320_v2 }
 0x273   : > { %v4819_v47 = vcombine.low %v4795_v3, %v4811_v48  ;;  %v4820_v12 = vcombine.high %v4795_v3, %v4811_v48  ;;  %v4143_v39 = vcombine.low %v9425_v5, %v3322_v11  ;;  %v4144_v35 = vcombine.high %v9425_v5, %v3322_v11  ;;  %v3370_v48 = vpop.permute.xlu0 %3369 }
 0x274   : > { %v4879_v22 = vrot.slane %v4871_v0, %v7422_v63  ;;  %v4083_v38 = vrot.slane %v4075_v7, %v9402_v57  ;;  %v4090_v18 = vrot.slane %v4076_v30, %v9402_v57  ;;  %v4923_v36 = vcombine.low %v8616_v4, %v8619_v43 }
 0x275   : > { %v4151_v26 = vrot.slane %v4143_v39, %v9402_v57  ;;  %v4158_v2 = vrot.slane %v4144_v35, %v9402_v57  ;;  %v4939_v3 = vcombine.low %v8622_v58, %v8625_v46  ;;  %v4991_v11 = vcombine.low %v8628_v1, %v8631_v17 }
 0x276   : > { %v4887_v0 = vcombine.low %v4863_v20, %v4879_v22  ;;  %v4888_v44 = vcombine.high %v4863_v20, %v4879_v22  ;;  %v4931_v7 = vrot.slane %v4923_v36, %v7422_v63  ;;  %v5007_v30 = vcombine.low %v8638_v42, %v8641_v16 }
 0x277   : > { %v4947_v5 = vrot.slane %v4939_v3, %v7422_v63  ;;  %v4999_v39 = vrot.slane %v4991_v11, %v7422_v63  ;;  %v4091_v35 = vcombine.low %v8651_v15, %v3368_v10  ;;  %v4092_v37 = vcombine.high %v8651_v15, %v3368_v10 }
 0x278   : > { %v5573_v32 = vpack.c.bf16 %v4887_v0, %v4819_v47  ;;  %v5581_v24 = vpack.c.bf16 %v4888_v44, %v4820_v12  ;;  %v5015_v41 = vrot.slane %v5007_v30, %v7422_v63  ;;  %v4159_v8 = vcombine.low %v8658_v19, %v3370_v48  ;;  %v8729_v30 = vpop.permute.xlu1 %3279 }
 0x279   : > { %v4955_v20 = vcombine.low %v4931_v7, %v4947_v5  ;;  %v4956_v22 = vcombine.high %v4931_v7, %v4947_v5  ;;  %v4099_v36 = vrot.slane %v4091_v35, %v9402_v57  ;;  %v4106_v33 = vrot.slane %v4092_v37, %v9402_v57  ;;  %9426 = vst [vmem:[#allocation23_spill] sm:$0xff] %v8729_v30 }
 0x27a   : > { %6806 = vmatpush3.bf16.msra.mxu1 %v5573_v32  ;;  %6826 = vmatpush3.bf16.msra.mxu0 %v5581_v24  ;;  %v5023_v3 = vcombine.low %v4999_v39, %v5015_v41  ;;  %v5024_v11 = vcombine.high %v4999_v39, %v5015_v41  ;;  %v4160_v23 = vcombine.high %v8658_v19, %v3370_v48 }
 0x27b   : > { %6807 = vmatprep.subr.bf16.mxu1 %v9343_v53  ;;  %6827 = vmatprep.subr.bf16.mxu0 %v9343_v53  ;;  %v4107_v15 = vcombine.low %v4083_v38, %v4099_v36  ;;  %v4108_v47 = vcombine.high %v4083_v38, %v4099_v36  ;;  %v4123_v12 = vcombine.low %v4090_v18, %v4106_v33 }
 0x27c   : > { %v5574_v10 = vpack.c.bf16 %v5023_v3, %v4955_v20  ;;  %v5582_v0 = vpack.c.bf16 %v5024_v11, %v4956_v22  ;;  %v4124_v44 = vcombine.high %v4090_v18, %v4106_v33  ;;  %v4167_v7 = vrot.slane %v4159_v8, %v9402_v57 }
 0x27d   : > { %v4115_v32 = vrot.slane %v4107_v15, %v7422_v63  ;;  %v4122_v24 = vrot.slane %v4108_v47, %v7422_v63  ;;  %v4131_v37 = vrot.slane %v4123_v12, %v7422_v63  ;;  %v4174_v41 = vrot.slane %v4160_v23, %v9402_v57  ;;  %v3324_v12 = vpop.permute.xlu1 %3323 }
 0x27e   : > { %6808 = vmatpush3.bf16.msra.mxu1 %v5574_v10  ;;  %6828 = vmatpush3.bf16.msra.mxu0 %v5582_v0  ;;  %v4138_v19 = vrot.slane %v4124_v44, %v7422_v63  ;;  %v4175_v38 = vcombine.low %v4151_v26, %v4167_v7  ;;  %v4176_v48 = vcombine.high %v4151_v26, %v4167_v7  ;;  %v3276_v10 = vpop.permute.xlu0 %3275 }
 0x27f   : > { %v5163_v5 = vcombine.low %v4115_v32, %v4122_v24  ;;  %v6538_v33 = vcombine.high %v4115_v32, %v4122_v24  ;;  %v4191_v18 = vcombine.low %v4158_v2, %v4174_v41  ;;  %v4192_v8 = vcombine.high %v4158_v2, %v4174_v41  ;;  %6809 = vmatprep.subr.bf16.mxu1 %v9343_v53 }
 0x280   : > { %v5179_v39 = vcombine.low %v4131_v37, %v4138_v19  ;;  %v6539_v35 = vcombine.high %v4131_v37, %v4138_v19  ;;  %v4183_v20 = vrot.slane %v4175_v38, %v7422_v63  ;;  %v4190_v22 = vrot.slane %v4176_v48, %v7422_v63  ;;  %6829 = vmatprep.subr.bf16.mxu0 %v9343_v53 }
 0x281   : > { %v8741_v23 = vrot.slane %v5163_v5, %v9402_v57  ;;  %v8744_v36 = vrot.slane %v6538_v33, %v9402_v57  ;;  %v4199_v26 = vrot.slane %v4191_v18, %v7422_v63  ;;  %v4206_v2 = vrot.slane %v4192_v8, %v7422_v63 }
 0x282   : > { %v8749_v3 = vrot.slane %v5179_v39, %v9402_v57  ;;  %v8752_v11 = vrot.slane %v6539_v35, %v9402_v57  ;;  %v5231_v15 = vcombine.low %v4183_v20, %v4190_v22  ;;  %v6540_v47 = vcombine.high %v4183_v20, %v4190_v22  ;;  %v9427_v39 = vld [vmem:[#allocation41_spill] sm:$0xff] }
 0x283   : > { %v5247_v0 = vcombine.low %v4199_v26, %v4206_v2  ;;  %v6541_v44 = vcombine.high %v4199_v26, %v4206_v2  ;;  %v5059_v7 = vcombine.low %v8671_v25, %v8674_v6  ;;  %v5075_v32 = vcombine.low %v8677_v61, %v8680_v51 }
 0x284   : > { %v8759_v24 = vrot.slane %v5231_v15, %v9402_v57  ;;  %v8762_v37 = vrot.slane %v6540_v47, %v9402_v57  ;;  %v5127_v41 = vcombine.low %v8683_v56, %v8686_v40  ;;  %v5143_v19 = vcombine.low %v8689_v59, %v8692_v62 }
 0x285   : > { %v8769_v38 = vrot.slane %v5247_v0, %v9402_v57  ;;  %v8772_v48 = vrot.slane %v6541_v44, %v9402_v57  ;;  %v5067_v5 = vrot.slane %v5059_v7, %v7422_v63  ;;  %v5083_v33 = vrot.slane %v5075_v32, %v7422_v63  ;;  %v3372_v32 = vpop.permute.xlu1 %3371 }
 0x286   : > { %v5135_v18 = vrot.slane %v5127_v41, %v7422_v63  ;;  %v5151_v8 = vrot.slane %v5143_v19, %v7422_v63  ;;  %v4211_v35 = vcombine.low %v9427_v39, %v3324_v12  ;;  %v4212_v20 = vcombine.high %v9427_v39, %v3324_v12  ;;  %v3326_v41 = vpop.permute.xlu0 %3325 }
 0x287   : > { %v5091_v22 = vcombine.low %v5067_v5, %v5083_v33  ;;  %v5092_v26 = vcombine.high %v5067_v5, %v5083_v33  ;;  %v5195_v2 = vcombine.low %v8741_v23, %v8744_v36  ;;  %v5211_v15 = vcombine.low %v8749_v3, %v8752_v11 }
 0x288   : > { %v5159_v47 = vcombine.low %v5135_v18, %v5151_v8  ;;  %v5160_v0 = vcombine.high %v5135_v18, %v5151_v8  ;;  %v4219_v44 = vrot.slane %v4211_v35, %v9402_v57  ;;  %v4226_v7 = vrot.slane %v4212_v20, %v9402_v57 }
 0x289   : > { %v5203_v19 = vrot.slane %v5195_v2, %v7422_v63  ;;  %v5219_v12 = vrot.slane %v5211_v15, %v7422_v63  ;;  %v5263_v5 = vcombine.low %v8759_v24, %v8762_v37  ;;  %v5279_v33 = vcombine.low %v8769_v38, %v8772_v48 }
 0x28a   : > { %v5575_v39 = vpack.c.bf16 %v5159_v47, %v5091_v22  ;;  %v5583_v30 = vpack.c.bf16 %v5160_v0, %v5092_v26  ;;  %v4227_v55 = vcombine.low %v3276_v10, %v3372_v32  ;;  %v4228_v18 = vcombine.high %v3276_v10, %v3372_v32 }
 0x28b   : > { %v5227_v8 = vcombine.low %v5203_v19, %v5219_v12  ;;  %v5271_v35 = vrot.slane %v5263_v5, %v7422_v63  ;;  %v5287_v20 = vrot.slane %v5279_v33, %v7422_v63  ;;  %v5228_v27 = vcombine.high %v5203_v19, %v5219_v12  ;;  %v3374_v12 = vpop.permute.xlu0 %3373 }
 0x28c   : > { %6810 = vmatpush3.bf16.msra.mxu1 %v5575_v39  ;;  %6830 = vmatpush3.bf16.msra.mxu0 %v5583_v30  ;;  %v4235_v2 = vrot.slane %v4227_v55, %v9402_v57  ;;  %v4242_v15 = vrot.slane %v4228_v18, %v9402_v57  ;;  %v4279_v50 = vcombine.low %v9428_v29, %v3326_v41  ;;  %v3278_v30 = vpop.permute.xlu1 %3277 }
 0x28d   : > { %6811 = vmatprep.subr.bf16.mxu1 %v9343_v53  ;;  %6831 = vmatprep.subr.bf16.mxu0 %v9343_v53  ;;  %v5295_v22 = vcombine.low %v5271_v35, %v5287_v20  ;;  %v5296_v10 = vcombine.high %v5271_v35, %v5287_v20  ;;  %v4280_v26 = vcombine.high %v9428_v29, %v3326_v41 }
 0x28e   : > { %v4243_v47 = vcombine.low %v4219_v44, %v4235_v2  ;;  %v4244_v0 = vcombine.high %v4219_v44, %v4235_v2  ;;  %v4259_v32 = vcombine.low %v4226_v7, %v4242_v15  ;;  %v4260_v19 = vcombine.high %v4226_v7, %v4242_v15 }
 0x28f   : > { %v5576_v5 = vpack.c.bf16 %v5295_v22, %v5227_v8  ;;  %v5584_v55 = vpack.c.bf16 %v5296_v10, %v5228_v27  ;;  %v4287_v33 = vrot.slane %v4279_v50, %v9402_v57  ;;  %v4294_v29 = vrot.slane %v4280_v26, %v9402_v57 }
 0x290   : > { %v4251_v39 = vrot.slane %v4243_v47, %v7422_v63  ;;  %v4258_v18 = vrot.slane %v4244_v0, %v7422_v63  ;;  %v4267_v54 = vrot.slane %v4259_v32, %v7422_v63  ;;  %v4274_v35 = vrot.slane %v4260_v19, %v7422_v63 }
 0x291   : > { %6812 = vmatpush3.bf16.msra.mxu1 %v5576_v5  ;;  %6832 = vmatpush3.bf16.msra.mxu0 %v5584_v55  ;;  %v4295_v44 = vcombine.low %v3278_v30, %v3374_v12  ;;  %v4296_v7 = vcombine.high %v3278_v30, %v3374_v12 }
 0x292   : > { %v5299_v41 = vcombine.low %v4251_v39, %v4258_v18  ;;  %v6542_v20 = vcombine.high %v4251_v39, %v4258_v18  ;;  %v5315_v8 = vcombine.low %v4267_v54, %v4274_v35  ;;  %v6543_v27 = vcombine.high %v4267_v54, %v4274_v35  ;;  %6813 = vmatprep.subr.bf16.mxu1 %v9343_v53 }
 0x293   : > { %v4303_v50 = vrot.slane %v4295_v44, %v9402_v57  ;;  %v4310_v2 = vrot.slane %v4296_v7, %v9402_v57  ;;  %6833 = vmatprep.subr.bf16.mxu0 %v9343_v53 }
 0x294   : > { %v8811_v15 = vrot.slane %v5299_v41, %v9402_v57  ;;  %v8814_v22 = vrot.slane %v6542_v20, %v9402_v57  ;;  %v8817_v10 = vrot.slane %v5315_v8, %v9402_v57  ;;  %v8820_v26 = vrot.slane %v6543_v27, %v9402_v57 }
 0x295   : > { %v4311_v54 = vcombine.low %v4287_v33, %v4303_v50  ;;  %v4312_v47 = vcombine.high %v4287_v33, %v4303_v50  ;;  %v4327_v0 = vcombine.low %v4294_v29, %v4310_v2  ;;  %v4328_v32 = vcombine.high %v4294_v29, %v4310_v2 }
 0x296   : > { %v5331_v19 = vcombine.low %v8811_v15, %v8814_v22  ;;  %v5347_v12 = vcombine.low %v8817_v10, %v8820_v26 }
 0x297   : > { %v4319_v30 = vrot.slane %v4311_v54, %v7422_v63  ;;  %v4326_v5 = vrot.slane %v4312_v47, %v7422_v63  ;;  %v4335_v55 = vrot.slane %v4327_v0, %v7422_v63  ;;  %v4342_v39 = vrot.slane %v4328_v32, %v7422_v63 }
 0x298   : > { %v5339_v29 = vrot.slane %v5331_v19, %v7422_v63  ;;  %v5355_v7 = vrot.slane %v5347_v12, %v7422_v63  ;;  %v4788_v54 = vcombine.high %v8526_v28, %v8529_v14 }
 0x299   : > { %v5367_v18 = vcombine.low %v4319_v30, %v4326_v5  ;;  %v6544_v35 = vcombine.high %v4319_v30, %v4326_v5  ;;  %v5383_v44 = vcombine.low %v4335_v55, %v4342_v39  ;;  %v6545_v33 = vcombine.high %v4335_v55, %v4342_v39 }
 0x29a   : > { %v5363_v47 = vcombine.low %v5339_v29, %v5355_v7  ;;  %v5364_v19 = vcombine.high %v5339_v29, %v5355_v7  ;;  %v4802_v5 = vrot.slane %v4788_v54, %v7422_v63  ;;  %v4804_v55 = vcombine.high %v8532_v45, %v8535_v21 }
 0x29b   : > { %v8833_v41 = vrot.slane %v5367_v18, %v9402_v57  ;;  %v8836_v20 = vrot.slane %v6544_v35, %v9402_v57  ;;  %v8839_v8 = vrot.slane %v5383_v44, %v9402_v57  ;;  %v8842_v27 = vrot.slane %v6545_v33, %v9402_v57 }
 0x29c   : > { %v4856_v39 = vcombine.high %v8538_v60, %v8541_v13  ;;  %v4872_v18 = vcombine.high %v8544_v49, %v8547_v9  ;;  %v4818_v35 = vrot.slane %v4804_v55, %v7422_v63  ;;  %v4924_v29 = vcombine.high %v8616_v4, %v8619_v43 }
 0x29d   : > { %v5399_v50 = vcombine.low %v8833_v41, %v8836_v20  ;;  %v5415_v2 = vcombine.low %v8839_v8, %v8842_v27  ;;  %v4940_v45 = vcombine.high %v8622_v58, %v8625_v46  ;;  %v4992_v21 = vcombine.high %v8628_v1, %v8631_v17 }
 0x29e   : > { %v4870_v44 = vrot.slane %v4856_v39, %v7422_v63  ;;  %v4886_v33 = vrot.slane %v4872_v18, %v7422_v63  ;;  %v5008_v60 = vcombine.high %v8638_v42, %v8641_v16  ;;  %v4821_v13 = vcombine.low %v4802_v5, %v4818_v35 }
 0x29f   : > { %v5407_v0 = vrot.slane %v5399_v50, %v7422_v63  ;;  %v5423_v32 = vrot.slane %v5415_v2, %v7422_v63  ;;  %v4822_v9 = vcombine.high %v4802_v5, %v4818_v35  ;;  %v4938_v4 = vrot.slane %v4924_v29, %v7422_v63 }
 0x2a0   : > { %v4889_v49 = vcombine.low %v4870_v44, %v4886_v33  ;;  %v4890_v7 = vcombine.high %v4870_v44, %v4886_v33  ;;  %v4954_v43 = vrot.slane %v4940_v45, %v7422_v63  ;;  %v5006_v58 = vrot.slane %v4992_v21, %v7422_v63 }
 0x2a1   : > { %v5431_v12 = vcombine.low %v5407_v0, %v5423_v32  ;;  %v5432_v30 = vcombine.high %v5407_v0, %v5423_v32  ;;  %v5022_v1 = vrot.slane %v5008_v60, %v7422_v63  ;;  %v5060_v17 = vcombine.high %v8671_v25, %v8674_v6 }
 0x2a2   : > { %v8875_v46 = vpack.c.bf16 %v4889_v49, %v4821_v13  ;;  %v5076_v42 = vcombine.high %v8677_v61, %v8680_v51  ;;  %v8882_v16 = vpack.c.bf16 %v4890_v7, %v4822_v9  ;;  %v4957_v50 = vcombine.low %v4938_v4, %v4954_v43 }
 0x2a3   : > { %v5577_v28 = vpack.c.bf16 %v5431_v12, %v5363_v47  ;;  %v5585_v14 = vpack.c.bf16 %v5432_v30, %v5364_v19  ;;  %v4958_v2 = vcombine.high %v4938_v4, %v4954_v43  ;;  %v5128_v54 = vcombine.high %v8683_v56, %v8686_v40 }
 0x2a4   : > { %v5025_v47 = vcombine.low %v5006_v58, %v5022_v1  ;;  %v5026_v0 = vcombine.high %v5006_v58, %v5022_v1  ;;  %v5074_v32 = vrot.slane %v5060_v17, %v7422_v63  ;;  %v5090_v19 = vrot.slane %v5076_v42, %v7422_v63 }
 0x2a5   : > { %6814 = vmatpush3.bf16.msra.mxu1 %v5577_v28  ;;  %6834 = vmatpush3.bf16.msra.mxu0 %v5585_v14  ;;  %v5142_v12 = vrot.slane %v5128_v54, %v7422_v63  ;;  %v5144_v25 = vcombine.high %v8689_v59, %v8692_v62  ;;  %v5196_v6 = vcombine.high %v8741_v23, %v8744_v36  ;;  %v9429_v9 = vlaneseq  ;;  %v9430_v54 = vld [vmem:[#allocation42_spill] sm:$0xff] }
 0x2a6   : > { %6815 = vmatprep.subr.bf16.mxu1 %v9343_v53  ;;  %6835 = vmatprep.subr.bf16.mxu0 %v9343_v53  ;;  %v5212_v61 = vcombine.high %v8749_v3, %v8752_v11  ;;  %v8895_v51 = vpack.c.bf16 %v5025_v47, %v4957_v50  ;;  %v8897_v56 = vpack.c.bf16 %v5026_v0, %v4958_v2 }
 0x2a7   : > { %v5093_v40 = vcombine.low %v5074_v32, %v5090_v19  ;;  %v5094_v30 = vcombine.high %v5074_v32, %v5090_v19  ;;  %v5158_v5 = vrot.slane %v5144_v25, %v7422_v63  ;;  %v5210_v55 = vrot.slane %v5196_v6, %v7422_v63 }
 0x2a8   : > { %v5226_v39 = vrot.slane %v5212_v61, %v7422_v63  ;;  %v5264_v59 = vcombine.high %v8759_v24, %v8762_v37  ;;  %v5280_v62 = vcombine.high %v8769_v38, %v8772_v48  ;;  %v5332_v23 = vcombine.high %v8811_v15, %v8814_v22 }
 0x2a9   : > { %v5348_v36 = vcombine.high %v8817_v10, %v8820_v26  ;;  %v5400_v3 = vcombine.high %v8833_v41, %v8836_v20  ;;  %v5161_v11 = vcombine.low %v5142_v12, %v5158_v5  ;;  %v5162_v18 = vcombine.high %v5142_v12, %v5158_v5  ;;  %v9431_v5 = vld [vmem:[#allocation40_spill] sm:$0xff] }
 0x2aa   : > { %v5229_v28 = vcombine.low %v5210_v55, %v5226_v39  ;;  %v5278_v14 = vrot.slane %v5264_v59, %v7422_v63  ;;  %v5294_v35 = vrot.slane %v5280_v62, %v7422_v63  ;;  %v5230_v24 = vcombine.high %v5210_v55, %v5226_v39 }
 0x2ab   : > { %v5346_v37 = vrot.slane %v5332_v23, %v7422_v63  ;;  %v5362_v38 = vrot.slane %v5348_v36, %v7422_v63  ;;  %v8916_v48 = vpack.c.bf16 %v5161_v11, %v5093_v40  ;;  %v8918_v15 = vpack.c.bf16 %v5162_v18, %v5094_v30 }
 0x2ac   : > { %v5414_v22 = vrot.slane %v5400_v3, %v7422_v63  ;;  %v5416_v10 = vcombine.high %v8839_v8, %v8842_v27  ;;  %v5297_v26 = vcombine.low %v5278_v14, %v5294_v35  ;;  %v5298_v41 = vcombine.high %v5278_v14, %v5294_v35 }
 0x2ad   : > { %v5365_v20 = vcombine.low %v5346_v37, %v5362_v38  ;;  %v5366_v44 = vcombine.high %v5346_v37, %v5362_v38  ;;  %v5877_v8 = vand.u32 127, %v9429_v9  ;;  %v9433_v9 = vld [vmem:[#allocation18_spill] sm:$0xff] }
 0x2ae   : > { %v5430_v33 = vrot.slane %v5416_v10, %v7422_v63  ;;  %v8924_v29 = vpack.c.bf16 %v5297_v26, %v5229_v28  ;;  %v8926_v45 = vpack.c.bf16 %v5298_v41, %v5230_v24  ;;  %v4516_v26 = vcombine.high %v8401_v34, %v8404_v52  ;;  %v9432_v41 = vld [vmem:[#allocation19_spill] sm:$0xff] }
 0x2af   : > { %vm5878_vm4 = vcmp.lt.s32.totalorder %v5877_v8, 16  ;;  %v9434_v8 = vld [vmem:[#allocation32_spill] sm:$0xff] }
 0x2b0   : > { %v5433_v21 = vcombine.low %v5414_v22, %v5430_v33  ;;  %v5434_v60 = vcombine.high %v5414_v22, %v5430_v33 }
 0x2b2   : > { %v8928_v13 = vpack.c.bf16 %v5433_v21, %v5365_v20  ;;  %v8930_v49 = vpack.c.bf16 %v5434_v60, %v5366_v44  ;;  %v4532_v20 = vcombine.high %v9432_v41, %v8413_v31  ;;  %v8974_v21 = vrot.slane %v4516_v26, %v7422_v63 }
 0x2b4   : > { %v8977_v60 = vrot.slane %v4532_v20, %v7422_v63 }
 0x2e5   : > { %v5665_v27 = vpop.f32.mrb[16].mxu1  ;;  %v5732_v7 = vpop.f32.mrb[20].mxu0 }
 0x2e6   : > { %5872 = vst [vmem:[%s8937_s22] sm:$0xff] %v5665_v27  ;;  %5873 = vst [vmem:[%s8937_s22 + $0x8] sm:$0xff] %v5732_v7  ;;  %v6739_v4 = vpop.f32.mrb[17].mxu1  ;;  %v6759_v43 = vpop.f32.mrb[21].mxu0  ;;  %v5879_v58 = vsel %vm5878_vm4, %v5665_v27, -1e+30  ;;  %v4584_v27 = vcombine.high %v9434_v8, %v9433_v9 }
 0x2e7   : > { %v5880_v1 = vsel %vm5878_vm4, %v5732_v7, -1e+30  ;;  %v5668_v17 = vpop.f32.mrb[18].mxu1  ;;  %5883 = vmax.xlane.f32.xlu1 %v5879_v58  ;;  %v5735_v42 = vpop.f32.mrb[22].mxu0  ;;  %v9435_v4 = vld [vmem:[#allocation20_spill] sm:$0xff]  ;;  %v9436_v43 = vld [vmem:[#allocation17_spill] sm:$0xff] }
 0x2e8   : > { %5885 = vmax.xlane.f32.xlu0 %v5880_v1  ;;  %v6740_v50 = vpop.f32.mrb[19].mxu1  ;;  %v6760_v2 = vpop.f32.mrb[23].mxu0  ;;  %v4549_v17 = vcombine.low %v8974_v21, %v8977_v60  ;;  %v8989_v42 = vrot.slane %v4584_v27, %v7422_v63 }
 0x2e9   : > { %v4550_v50 = vcombine.high %v8974_v21, %v8977_v60 }
 0x2fe   : > { %3281 = vrot.lane.b32.xlu0 %v9430_v54, %s7076_s13  ;;  %s6336_s13 = sshll.u32 %s8937_s22, 4  ;;  %s9129_s13 = int_to_ptr.vmem [resolvable:$true] %s6336_s13 }
 0x2ff   : > { %s6978_s25 = scalar_lea.vmem %s9129_s13, 512 }
 0x300   : > { %p6979_p11 = scmp.ne.s32.totalorder %s9129_s13, %s6978_s25 }
 0x302   : > { %p6980_p12 = pnand %p6979_p11, %p7170_p5 }
 0x304   : > { %p6981_p13 = pneg %p6980_p12 }
 0x325   : > { %v5799_v47 = vpop.f32.mrb[20].mxu1  ;;  %v5866_v0 = vpop.f32.mrb[24].mxu0 }
 0x326   : > { %5874 = vst [vmem:[%s8937_s22 + $0x10] sm:$0xff] %v5799_v47  ;;  %5875 = vst [vmem:[%s8937_s22 + $0x18] sm:$0xff] %v5866_v0  ;;  %v6779_v32 = vpop.f32.mrb[21].mxu1  ;;  %v6799_v19 = vpop.f32.mrb[25].mxu0  ;;  %v5881_v12 = vsel %vm5878_vm4, %v5799_v47, -1e+30 }
 0x327   : > { %v5882_v25 = vsel %vm5878_vm4, %v5866_v0, -1e+30  ;;  %v5802_v6 = vpop.f32.mrb[22].mxu1  ;;  %5887 = vmax.xlane.f32.xlu0 %v5881_v12  ;;  %v5869_v61 = vpop.f32.mrb[26].mxu0  ;;  %v9437_v32 = vld [vmem:[#allocation39_spill] sm:$0xff]  ;;  %v9438_v19 = vld [vmem:[#allocation33_spill] sm:$0xff] }
 0x328   : > { %5889 = vmax.xlane.f32.xlu1 %v5882_v25  ;;  %v6780_v40 = vpop.f32.mrb[23].mxu1  ;;  %v6800_v30 = vpop.f32.mrb[27].mxu0  ;;  %v9440_v6 = vld [vmem:[#allocation38_spill] sm:$0xff] }
 0x329   : > { %v9441_v30 = vld [vmem:[#allocation23_spill] sm:$0xff] }
 0x339   : > { %3327 = vrot.lane.b32.xlu1 %v9431_v5, %s7077_s17 }
 0x33d   : > { %3329 = vrot.lane.b32.xlu0 %v9430_v54, %s7077_s17  ;;  %s6568_s17 = sshll.u32 %s7153_s9, 9 }
 0x33e   : > { %s9135_s23 = scalar_lea.hbm %s9222_s8, %s6568_s17 }
 0x374   : > { %v5884_v55 = vpop.xlane.xlu1 %5883 }
 0x375   : > { %v5886_v39 = vpop.xlane.xlu0 %5885  ;;  %v5891_v59 = vsub.f32 %v5879_v58, %v5884_v55  ;;  %v4600_v58 = vcombine.high %v9436_v43, %v9435_v4 }
 0x376   : > { %v5892_v62 = vsub.f32 %v5880_v1, %v5886_v39  ;;  %v9442_v39 = vld [vmem:[#allocation34_spill] sm:$0xff] }
 0x377   : > { %v5895_v23 = vmul.f32 1.442695, %v5891_v59  ;;  %v8995_v0 = vrot.slane %v4600_v58, %v7422_v63  ;;  %v9443_v59 = vld [vmem:[#allocation35_spill] sm:$0xff] }
 0x378   : > { %v5897_v36 = vmul.f32 1.442695, %v5892_v62  ;;  %v4720_v62 = vcombine.high %v9443_v59, %v9442_v39 }
 0x379   : > { %6962 = vpow2.f32 %v5895_v23  ;;  %v3282_v18 = vpop.permute.xlu0 %3281  ;;  %v9444_v23 = vld [vmem:[#allocation36_spill] sm:$0xff] }
 0x37a   : > { %6964 = vpow2.f32 %v5897_v36 }
 0x383   : > { %v8953_v3 = vpop.eup %6962 }
 0x384   : > { %v8955_v11 = vpop.eup %6964  ;;  %5903 = vadd.xlane.f32.xlu1 %v8953_v3 }
 0x385   : > { %5905 = vadd.xlane.f32.xlu0 %v8955_v11 }
 0x395   : > { %3375 = vrot.lane.b32.xlu1 %v9431_v5, %s7078_s18 }
 0x39b   : > { %3377 = vrot.lane.b32.xlu0 %v9430_v54, %s7078_s18 }
 0x3b4   : > { %v5888_v28 = vpop.xlane.xlu0 %5887 }
 0x3b5   : > { %v5890_v14 = vpop.xlane.xlu1 %5889  ;;  %v5893_v35 = vsub.f32 %v5881_v12, %v5888_v28  ;;  %v4652_v12 = vcombine.high %v9438_v19, %v9437_v32 }
 0x3b6   : > { %v5894_v24 = vsub.f32 %v5882_v25, %v5890_v14  ;;  %v9439_v25 = vld [vmem:[#allocation24_spill] sm:$0xff] }
 0x3b7   : > { %v5899_v37 = vmul.f32 1.442695, %v5893_v35  ;;  %v4668_v61 = vcombine.high %v9440_v6, %v9439_v25 }
 0x3b8   : > { %v5901_v38 = vmul.f32 1.442695, %v5894_v24  ;;  %v3330_v33 = vpop.permute.xlu0 %3329 }
 0x3b9   : > { %6966 = vpow2.f32 %v5899_v37  ;;  %v3328_v44 = vpop.permute.xlu1 %3327  ;;  %v4415_v34 = vcombine.low %v9430_v54, %v3330_v33  ;;  %v4416_v2 = vcombine.high %v9430_v54, %v3330_v33  ;;  %v9445_v54 = vld [vmem:[#allocation37_spill] sm:$0xff] }
 0x3ba   : > { %6968 = vpow2.f32 %v5901_v38  ;;  %v4347_v52 = vcombine.low %v9431_v5, %v3328_v44  ;;  %v4348_v31 = vcombine.high %v9431_v5, %v3328_v44  ;;  %v4736_v36 = vcombine.high %v9445_v54, %v9444_v23 }
 0x3bb   : > { %v4423_v28 = vrot.slane %v4415_v34, %v9402_v57  ;;  %v4430_v41 = vrot.slane %v4416_v2, %v9402_v57 }
 0x3bc   : > { %v4355_v14 = vrot.slane %v4347_v52, %v9402_v57  ;;  %v4362_v37 = vrot.slane %v4348_v31, %v9402_v57 }
 0x3c3   : > { %v8963_v22 = vpop.eup %6966 }
 0x3c4   : > { %v8965_v10 = vpop.eup %6968  ;;  %5907 = vadd.xlane.f32.xlu1 %v8963_v22 }
 0x3c5   : > { %5909 = vadd.xlane.f32.xlu0 %v8965_v10 }
 0x411   : > { %v5904_v7 = vpop.xlane.xlu1 %5903 }
 0x412   : > { %v5906_v1 = vpop.xlane.xlu0 %5905  ;;  %6970 = vrcp.f32 %v5904_v7 }
 0x413   : > { %6972 = vrcp.f32 %v5906_v1 }
 0x415   : > { %v3376_v47 = vpop.permute.xlu1 %3375 }
 0x416   : > { %v3378_v40 = vpop.permute.xlu0 %3377  ;;  %v4363_v5 = vcombine.low %v9441_v30, %v3376_v47  ;;  %v4364_v55 = vcombine.high %v9441_v30, %v3376_v47 }
 0x417   : > { %v4431_v35 = vcombine.low %v3282_v18, %v3378_v40  ;;  %v4432_v24 = vcombine.high %v3282_v18, %v3378_v40 }
 0x418   : > { %v4371_v38 = vrot.slane %v4363_v5, %v9402_v57  ;;  %v4378_v26 = vrot.slane %v4364_v55, %v9402_v57 }
 0x419   : > { %v4439_v20 = vrot.slane %v4431_v35, %v9402_v57  ;;  %v4446_v44 = vrot.slane %v4432_v24, %v9402_v57 }
 0x41a   : > { %v4379_v33 = vcombine.low %v4355_v14, %v4371_v38  ;;  %v4380_v9 = vcombine.high %v4355_v14, %v4371_v38  ;;  %v4395_v8 = vcombine.low %v4362_v37, %v4378_v26  ;;  %v4396_v27 = vcombine.high %v4362_v37, %v4378_v26 }
 0x41b   : > { %v4447_v4 = vcombine.low %v4423_v28, %v4439_v20  ;;  %v4448_v18 = vcombine.high %v4423_v28, %v4439_v20  ;;  %v4463_v43 = vcombine.low %v4430_v41, %v4446_v44  ;;  %v4464_v58 = vcombine.high %v4430_v41, %v4446_v44 }
 0x41c   : > { %v4387_v7 = vrot.slane %v4379_v33, %v7422_v63  ;;  %v4394_v34 = vrot.slane %v4380_v9, %v7422_v63  ;;  %v4403_v52 = vrot.slane %v4395_v8, %v7422_v63  ;;  %v4410_v1 = vrot.slane %v4396_v27, %v7422_v63  ;;  %v6971_v27 = vpop.eup %6970 }
 0x41d   : > { %v4455_v31 = vrot.slane %v4447_v4, %v7422_v63  ;;  %v4462_v2 = vrot.slane %v4448_v18, %v7422_v63  ;;  %v4471_v47 = vrot.slane %v4463_v43, %v7422_v63  ;;  %v4478_v40 = vrot.slane %v4464_v58, %v7422_v63 }
 0x41e   : > { %v5435_v30 = vcombine.low %v4387_v7, %v4394_v34  ;;  %v6546_v5 = vcombine.high %v4387_v7, %v4394_v34  ;;  %v5451_v55 = vcombine.low %v4403_v52, %v4410_v1  ;;  %v6547_v28 = vcombine.high %v4403_v52, %v4410_v1  ;;  %v6973_v7 = vpop.eup %6972 }
 0x41f   : > { %v5503_v14 = vcombine.low %v4455_v31, %v4462_v2  ;;  %v6548_v35 = vcombine.high %v4455_v31, %v4462_v2  ;;  %v5519_v24 = vcombine.low %v4471_v47, %v4478_v40  ;;  %v6549_v37 = vcombine.high %v4471_v47, %v4478_v40 }
 0x420   : > { %v5442_v38 = vrot.slane %v5435_v30, %v9402_v57  ;;  %v5450_v26 = vrot.slane %v6546_v5, %v9402_v57  ;;  %v5458_v41 = vrot.slane %v5451_v55, %v9402_v57  ;;  %v5466_v20 = vrot.slane %v6547_v28, %v9402_v57 }
 0x421   : > { %v5510_v44 = vrot.slane %v5503_v14, %v9402_v57  ;;  %v5518_v33 = vrot.slane %v6548_v35, %v9402_v57  ;;  %v5526_v9 = vrot.slane %v5519_v24, %v9402_v57  ;;  %v5534_v8 = vrot.slane %v6549_v37, %v9402_v57 }
 0x422   : > { %v5467_v4 = vcombine.low %v5442_v38, %v5450_v26  ;;  %v5483_v18 = vcombine.low %v5458_v41, %v5466_v20  ;;  %v4617_v43 = vcombine.low %v8989_v42, %v8995_v0  ;;  %v4618_v58 = vcombine.high %v8989_v42, %v8995_v0 }
 0x423   : > { %v5535_v34 = vcombine.low %v5510_v44, %v5518_v33  ;;  %v5551_v52 = vcombine.low %v5526_v9, %v5534_v8  ;;  %v5468_v1 = vcombine.high %v5442_v38, %v5450_v26  ;;  %v5484_v31 = vcombine.high %v5458_v41, %v5466_v20 }
 0x424   : > { %v5475_v2 = vrot.slane %v5467_v4, %v7422_v63  ;;  %v5491_v47 = vrot.slane %v5483_v18, %v7422_v63  ;;  %v4666_v40 = vrot.slane %v4652_v12, %v7422_v63  ;;  %v4682_v30 = vrot.slane %v4668_v61, %v7422_v63 }
 0x425   : > { %v5543_v42 = vrot.slane %v5535_v34, %v7422_v63  ;;  %v5559_v0 = vrot.slane %v5551_v52, %v7422_v63  ;;  %v5482_v5 = vrot.slane %v5468_v1, %v7422_v63  ;;  %v5498_v55 = vrot.slane %v5484_v31, %v7422_v63 }
 0x426   : > { %v5499_v28 = vcombine.low %v5475_v2, %v5491_v47  ;;  %v5500_v14 = vcombine.high %v5475_v2, %v5491_v47  ;;  %v5536_v35 = vcombine.high %v5510_v44, %v5518_v33  ;;  %v5552_v24 = vcombine.high %v5526_v9, %v5534_v8 }
 0x427   : > { %v5567_v37 = vcombine.low %v5543_v42, %v5559_v0  ;;  %v5568_v32 = vcombine.high %v5543_v42, %v5559_v0  ;;  %v5915_v19 = vmul.f32 %v6971_v27, %v8953_v3  ;;  %v5916_v12 = vmul.f32 %v6973_v7, %v8955_v11 }
 0x428   : > { %v5501_v25 = vcombine.low %v5482_v5, %v5498_v55  ;;  %v5550_v6 = vrot.slane %v5536_v35, %v7422_v63  ;;  %v5566_v61 = vrot.slane %v5552_v24, %v7422_v63  ;;  %v5502_v38 = vcombine.high %v5482_v5, %v5498_v55 }
 0x429   : > { %v5578_v26 = vpack.c.bf16 %v5567_v37, %v5499_v28  ;;  %v5586_v41 = vpack.c.bf16 %v5568_v32, %v5500_v14  ;;  %v4734_v20 = vrot.slane %v4720_v62, %v7422_v63  ;;  %v4750_v3 = vrot.slane %v4736_v36, %v7422_v63  ;;  %v6961_v32 = vld [vmem:[%s9219_s5 + $0x8] sm:$0xff]  }
 0x42a   : > { %v5569_v44 = vcombine.low %v5550_v6, %v5566_v61  ;;  %v5570_v11 = vcombine.high %v5550_v6, %v5566_v61  ;;  %v5919_v33 = vpack.c.bf16 %v5915_v19, %v5915_v19  ;;  %v5587_v9 = vpack.c.bf16 %v4617_v43, %v4549_v17 }
 0x42b   : > { %6816 = vmatpush3.bf16.msra.mxu1 %v5578_v26  ;;  %6836 = vmatpush3.bf16.msra.mxu0 %v5586_v41  ;;  %v5595_v8 = vpack.c.bf16 %v4618_v58, %v4550_v50  ;;  %v5920_v39 = vpack.c.bf16 %v5916_v12, %v5916_v12  ;;  %v4685_v23 = vcombine.low %v4666_v40, %v4682_v30 }
 0x42c   : > { %6841 = vmatprep.subr.bf16.mxu1 %v9343_v53  ;;  %6861 = vmatprep.subr.bf16.mxu0 %v9343_v53  ;;  %v5594_v59 = vpack.c.bf16 %v5569_v44, %v5501_v25  ;;  %v5602_v62 = vpack.c.bf16 %v5570_v11, %v5502_v38  ;;  %v4753_v54 = vcombine.low %v4734_v20, %v4750_v3 }
 0x42d   : > { %v4686_v36 = vcombine.high %v4666_v40, %v4682_v30  ;;  %v4754_v27 = vcombine.high %v4734_v20, %v4750_v3 }
 0x42e   : > { %6818 = vmatmul.mubr.bf16.vlgmr.msra.gmra.mrb[24].mxu1 %v5919_v33  ;;  %6838 = vmatmul.mubr.bf16.vlgmr.msra.gmra.mrb[28].mxu0 %v5920_v39  ;;  %v5588_v21 = vpack.c.bf16 %v4753_v54, %v4685_v23 }
 0x42f   : > { %6842 = vmatpush3.bf16.msra.mxu1 %v5587_v9  ;;  %6862 = vmatpush3.bf16.msra.mxu0 %v5595_v8  ;;  %v5596_v60 = vpack.c.bf16 %v4754_v27, %v4686_v36 }
 0x430   : > { %6843 = vmatprep.subr.bf16.mxu1 %v9343_v53  ;;  %6863 = vmatprep.subr.bf16.mxu0 %v9343_v53 }
 0x431   : > { %6857 = vmatprep.mubr.msk.bf16.mxu1 %vm7075_vm1, %v9343_v53  ;;  %6877 = vmatprep.mubr.msk.bf16.mxu0 %vm7075_vm1, %v9343_v53 }
 0x433   : > { %6844 = vmatpush3.bf16.msra.mxu1 %v5588_v21  ;;  %6864 = vmatpush3.bf16.msra.mxu0 %v5596_v60 }
 0x434   : > { %6845 = vmatprep.subr.bf16.mxu1 %v9343_v53  ;;  %6865 = vmatprep.subr.bf16.mxu0 %v9343_v53 }
 0x437   : > { %6846 = vmatpush3.bf16.msra.mxu1 %v8875_v46  ;;  %6866 = vmatpush3.bf16.msra.mxu0 %v8882_v16 }
 0x438   : > { %6847 = vmatprep.subr.bf16.mxu1 %v9343_v53  ;;  %6867 = vmatprep.subr.bf16.mxu0 %v9343_v53 }
 0x43b   : > { %6848 = vmatpush3.bf16.msra.mxu1 %v8895_v51  ;;  %6868 = vmatpush3.bf16.msra.mxu0 %v8897_v56 }
 0x43c   : > { %6849 = vmatprep.subr.bf16.mxu1 %v9343_v53  ;;  %6869 = vmatprep.subr.bf16.mxu0 %v9343_v53 }
 0x43f   : > { %6850 = vmatpush3.bf16.msra.mxu1 %v8916_v48  ;;  %6870 = vmatpush3.bf16.msra.mxu0 %v8918_v15 }
 0x440   : > { %6851 = vmatprep.subr.bf16.mxu1 %v9343_v53  ;;  %6871 = vmatprep.subr.bf16.mxu0 %v9343_v53 }
 0x443   : > { %6852 = vmatpush3.bf16.msra.mxu1 %v8924_v29  ;;  %6872 = vmatpush3.bf16.msra.mxu0 %v8926_v45 }
 0x444   : > { %6853 = vmatprep.subr.bf16.mxu1 %v9343_v53  ;;  %6873 = vmatprep.subr.bf16.mxu0 %v9343_v53 }
 0x447   : > { %6854 = vmatpush3.bf16.msra.mxu1 %v8928_v13  ;;  %6874 = vmatpush3.bf16.msra.mxu0 %v8930_v49  ;;  %v6960_v13 = vld [vmem:[%s9219_s5] sm:$0xff]  }
 0x448   : > { %6855 = vmatprep.subr.bf16.mxu1 %v9343_v53  ;;  %6875 = vmatprep.subr.bf16.mxu0 %v9343_v53 }
 0x44b   : > { %6856 = vmatpush3.bf16.msra.mxu1 %v5594_v59  ;;  %6876 = vmatpush3.bf16.msra.mxu0 %v5602_v62 }
 0x44c   : > { %6881 = vmatprep.subr.bf16.mxu1 %v9343_v53 }
 0x451   : > { %v5908_v46 = vpop.xlane.xlu1 %5907 }
 0x452   : > { %v5910_v16 = vpop.xlane.xlu0 %5909  ;;  %6974 = vrcp.f32 %v5908_v46 }
 0x453   : > { %6976 = vrcp.f32 %v5910_v16 }
 0x45c   : > { %v6975_v51 = vpop.eup %6974 }
 0x45d   : > { %v6977_v56 = vpop.eup %6976  ;;  %v5917_v48 = vmul.f32 %v6975_v51, %v8963_v22 }
 0x45e   : > { %v5918_v15 = vmul.f32 %v6977_v56, %v8965_v10 }
 0x45f   : > { %v5921_v29 = vpack.c.bf16 %v5917_v48, %v5917_v48 }
 0x460   : > { %v5922_v45 = vpack.c.bf16 %v5918_v15, %v5918_v15 }
 0x461   : > { %6858 = vmatmul.mubr.bf16.vlgmr.msra.gmra.mrb[28].mxu1 %v5921_v29 }
 0x462   : > { %6878 = vmatmul.mubr.bf16.vlgmr.msra.gmra.mrb[32].mxu0 %v5922_v45  ;;  %6885 = vmatprep.mubr.msk.bf16.mxu1 %vm7075_vm1, %v9343_v53 }
 0x463   : > { %6882 = vmatpush3.bf16.msra.mxu1 %v6960_v13 }
 0x464   : > { %6883 = vmatprep.subr.bf16.mxu1 %v9343_v53 }
 0x467   : > { %6884 = vmatpush3.bf16.msra.mxu1 %v6961_v32 }
 0x501   : > { %v5957_v49 = vpop.f32.mrb[24].mxu1  ;;  %v5997_v17 = vpop.f32.mrb[28].mxu0 }
 0x502   : > { %v6819_v50 = vpop.f32.mrb[25].mxu1  ;;  %v6839_v22 = vpop.f32.mrb[29].mxu0 }
 0x503   : > { %v5960_v4 = vpop.f32.mrb[26].mxu1  ;;  %v6000_v10 = vpop.f32.mrb[30].mxu0 }
 0x504   : > { %v6820_v18 = vpop.f32.mrb[27].mxu1  ;;  %v6840_v43 = vpop.f32.mrb[31].mxu0 }
 0x534   : > { %v6037_v58 = vpop.f32.mrb[28].mxu1 }
 0x535   : > { %v6083_v7 = vcombine.low %v5957_v49, %v6037_v58  ;;  %v6084_v34 = vcombine.high %v5957_v49, %v6037_v58  ;;  %v6077_v52 = vpop.f32.mrb[32].mxu0  ;;  %v6859_v1 = vpop.f32.mrb[29].mxu1 }
 0x536   : > { %v6099_v31 = vcombine.low %v5997_v17, %v6077_v52  ;;  %v6100_v2 = vcombine.high %v5997_v17, %v6077_v52  ;;  %v6879_v47 = vpop.f32.mrb[33].mxu0  ;;  %v6040_v40 = vpop.f32.mrb[30].mxu1 }
 0x537   : > { %v6091_v30 = vrot.slane %v6083_v7, %v9402_v57  ;;  %v6098_v53 = vrot.slane %v6084_v34, %v9402_v57  ;;  %v6080_v42 = vpop.f32.mrb[34].mxu0  ;;  %v6860_v0 = vpop.f32.mrb[31].mxu1 }
 0x538   : > { %v6107_v5 = vrot.slane %v6099_v31, %v9402_v57  ;;  %v6114_v55 = vrot.slane %v6100_v2, %v9402_v57  ;;  %v6880_v28 = vpop.f32.mrb[35].mxu0 }
 0x53a   : > { %v6115_v14 = vcombine.low %v6091_v30, %v6107_v5  ;;  %v6116_v35 = vcombine.high %v6091_v30, %v6107_v5  ;;  %v6131_v24 = vcombine.low %v6098_v53, %v6114_v55  ;;  %v6132_v37 = vcombine.high %v6098_v53, %v6114_v55 }
 0x53c   : > { %v6123_v19 = vrot.slane %v6115_v14, %v7422_v63  ;;  %v6130_v12 = vrot.slane %v6116_v35, %v7422_v63  ;;  %v6139_v25 = vrot.slane %v6131_v24, %v7422_v63  ;;  %v6146_v6 = vrot.slane %v6132_v37, %v7422_v63 }
 0x53e   : > { %v6151_v61 = vcombine.low %v6123_v19, %v6130_v12  ;;  %v6554_v38 = vcombine.high %v6123_v19, %v6130_v12  ;;  %v6167_v26 = vcombine.low %v6139_v25, %v6146_v6  ;;  %v6555_v41 = vcombine.high %v6139_v25, %v6146_v6 }
 0x540   : > { %v6158_v20 = vrot.slane %v6151_v61, %v9402_v57  ;;  %v6166_v3 = vrot.slane %v6554_v38, %v9402_v57  ;;  %v6174_v44 = vrot.slane %v6167_v26, %v9402_v57  ;;  %v6182_v11 = vrot.slane %v6555_v41, %v9402_v57 }
 0x542   : > { %v6184_v33 = vcombine.high %v6158_v20, %v6166_v3  ;;  %v6200_v9 = vcombine.high %v6174_v44, %v6182_v11  ;;  %v6183_v8 = vcombine.low %v6158_v20, %v6166_v3  ;;  %v6199_v39 = vcombine.low %v6174_v44, %v6182_v11 }
 0x544   : > { %v6198_v59 = vrot.slane %v6184_v33, %v7422_v63  ;;  %v6214_v62 = vrot.slane %v6200_v9, %v7422_v63  ;;  %v6191_v23 = vrot.slane %v6183_v8, %v7422_v63  ;;  %v6207_v54 = vrot.slane %v6199_v39, %v7422_v63 }
 0x546   : > { %v6217_v36 = vcombine.low %v6198_v59, %v6214_v62  ;;  %v6216_v27 = vcombine.high %v6191_v23, %v6207_v54  ;;  %v6218_v21 = vcombine.high %v6198_v59, %v6214_v62  ;;  %v6215_v60 = vcombine.low %v6191_v23, %v6207_v54 }
 0x548   : > { %6224 = vrot.lane.b32.xlu1 %v6217_v36, %s7081_s26  ;;  %6220 = vrot.lane.b32.xlu0 %v6216_v27, %s7082_s10  ;;  %s6982_s26 = sshll.u32 %s7084_s21, 4  ;;  %s6983_s26 = int_to_ptr.vmem [resolvable:$false] %s6982_s26 }
 0x549   : > { %s6984_s22 = scalar_lea.vmem %s6983_s26, 1024  ;;  %p6985_p0 = scmp.lt.s32.totalorder %s9129_s13, %s6983_s26 }
 0x54a   : > { %p6986_p1 = scmp.lt.s32.totalorder %s6984_s22, %s6978_s25 }
 0x54c   : > { %6228 = vrot.lane.b32.xlu1 %v6218_v21, %s7083_s12  ;;  %p6987_p2 = por %p6986_p1, %p6985_p0 }
 0x54e   : > { %p6988_p3 = pnand %p6987_p2, %p6981_p13 }
 0x5ba   : > { %v6225_v57 = vpop.permute.xlu1 %6224  ;;  %v6221_v46 = vpop.permute.xlu0 %6220 }
 0x5bb   : > { %v6231_v16 = vsel %vm5603_vm3, %v6215_v60, %v6221_v46 }
 0x5bc   : > { %v6233_v51 = vsel %vm6232_vm5, %v6231_v16, %v6225_v57 }
 0x5be   : > { %v6229_v63 = vpop.permute.xlu1 %6228 }
 0x5bf   : > { %v6235_v56 = vsel %vm6234_vm6, %v6233_v51, %v6229_v63 }
 0x5c0   : > { %v6236_v48 = vpack.c.bf16 %v6235_v56, %v6235_v56 }
 0x5c2   : > { %6886 = vmatmul.mubr.msk.bf16.vlgmr.msra.gmra.mrb[32].mxu1 %vm366_vm2, %v6236_v48 }
 0x5c3   : > { %6991 = shalt.err (!%p6988_p3)
}
 0x5c4   : > { %s6992_s12 = scalar_lea.hbm %s9135_s23, 512  ;;  %s6996_s20 = scalar_lea.hbm %s9222_s8, 1024 }
 0x5c5   : > { %p6993_p4 = scmp.ne.s32.totalorder %s9135_s23, %s6992_s12  ;;  %p6997_p9 = scmp.lt.u32.totalorder %s9135_s23, %s9222_s8 }
 0x5c6   : > { %p6998_p10 = scmp.lt.u32.totalorder %s6996_s20, %s6992_s12  ;;  %p7000_p12 = scmp.lt.u32.totalorder %s6992_s12, %s9135_s23 }
 0x5c7   : > { %p6994_p7 = pnand %p6993_p4, %p7170_p5 }
 0x5c8   : > { %p6999_p11 = por %p6998_p10, %p6997_p9 }
 0x5c9   : > { %p6995_p8 = pneg %p6994_p7 }
 0x5ca   : > { %p7001_p13 = por %p7000_p12, %p6999_p11 }
 0x5cc   : > { %p7002_p0 = pnand %p7001_p13, %p6995_p8 }
 0x5ce   : > { %7005 = shalt.err (!%p7002_p0)
}
 0x5cf   : > { %s7085_s25 = smov 128   ;;  %s6446_s22 = sshll.u32 %s8933_s19, 3  ;;  %v6556_v15 = vld [vmem:[%s9220_s6] ss:$0 sm:$0xff] }
 0x5d0   : > { %6890 = dma.vmem_to_hbm [thread:$0]  (%p7170_p5), %s9129_s13, 512, %s9135_s23, %s6310_s24, %s7085_s25, %s7085_s25, %s7082_s10  }
 0x5d1   : > { %s6562_s12 = sshll.u32 %s7153_s9, 7  ;;  %s315_s20 = scalar_lea.vmem [#allocation2], %s6446_s22 }
 0x5d2   : > { %s6323_s21 = sshll.u32 %s315_s20, 4  ;;  %s9170_s1 = scalar_lea.hbm %s9221_s7, %s6562_s12  ;;  %s9172_s21 = int_to_ptr.vmem [resolvable:$true] %s6323_s21 }
 0x5d3   : > { %s6305_s9 = scalar_lea.sflag [#allocation3], %s8933_s19  ;;  %s7006_s10 = scalar_lea.vmem %s9172_s21, 128 }
 0x5d4   : > { %p7007_p1 = scmp.ne.s32.totalorder %s9172_s21, %s7006_s10  ;;  %s7086_s13 = smov [#allocation2]  }
 0x5d5   : > { %s7010_s23 = sshll.u32 %s7086_s13, 4  ;;  %s7011_s23 = int_to_ptr.vmem [resolvable:$false] %s7010_s23 }
 0x5d6   : > { %p7008_p2 = pnand %p7007_p1, %p7170_p5  ;;  %s7012_s0 = scalar_lea.vmem %s7011_s23, 256 }
 0x5d7   : > { %p7013_p4 = scmp.lt.s32.totalorder %s9172_s21, %s7011_s23  ;;  %p7014_p7 = scmp.lt.s32.totalorder %s7012_s0, %s7006_s10 }
 0x5d8   : > { %p7009_p3 = pneg %p7008_p2 }
 0x5d9   : > { %p7015_p8 = por %p7014_p7, %p7013_p4 }
 0x5db   : > { %p7016_p9 = pnand %p7015_p8, %p7009_p3 }
 0x695   : > { %v6297_v29 = vpop.f32.mrb[32].mxu1 }
 0x696   : > { %v6298_v45 = vadd.f32 %v6556_v15, %v6297_v29  ;;  %v6887_v13 = vpop.f32.mrb[33].mxu1 }
 0x697   : > { %v6300_v49 = vpop.f32.mrb[34].mxu1 }
 0x698   : > { %v6888_v17 = vpop.f32.mrb[35].mxu1  ;;  %6303 = vst.msk [vmem:[%s315_s20] sm:$0xff] %vm366_vm2, %v6298_v45 }
 0x699   : > { %7019 = shalt.err (!%p7016_p9)
}
 0x69a   : > { %s7020_s19 = scalar_lea.hbm %s9170_s1, 128  ;;  %s7024_s22 = scalar_lea.hbm %s9221_s7, 256 }
 0x69b   : > { %p7021_p10 = scmp.ne.s32.totalorder %s9170_s1, %s7020_s19  ;;  %p7025_p13 = scmp.lt.u32.totalorder %s9170_s1, %s9221_s7 }
 0x69c   : > { %p7026_p0 = scmp.lt.u32.totalorder %s7024_s22, %s7020_s19  ;;  %p7028_p2 = scmp.lt.u32.totalorder %s7020_s19, %s9170_s1 }
 0x69d   : > { %p7022_p11 = pnand %p7021_p10, %p7170_p5 }
 0x69e   : > { %p7027_p1 = por %p7026_p0, %p7025_p13 }
 0x69f   : > { %p7023_p12 = pneg %p7022_p11 }
 0x6a0   : > { %p7029_p3 = por %p7028_p2, %p7027_p1 }
 0x6a2   : > { %p7030_p4 = pnand %p7029_p3, %p7023_p12 }
 0x6a4   : > { %7033 = shalt.err (!%p7030_p4)
}
 0x6a5   : > { %6889 = dma.vmem_to_hbm [thread:$0]  (%p7170_p5), %s9172_s21, 128, %s9170_s1, %s6305_s9  }
 0x6a6 PF: > { %p6900_p7 = scmp.ge.s32.totalorder %s7072_s30, 2  ;;  %s6351_s12 = sand.u32 1, %s7060_s27  }
 0x6a7   : > { %s6352_s20 = scalar_lea.sflag [#allocation3], %s6351_s12 }
 0x6a8   : > { %p6894_p8 = pnand %p6900_p7, %p7174_p6 }
 0x6aa   : > { %7051 = dma.done.wait (!%p6894_p8), %s6352_s20, 128  }
 0x6ab   : > { %7053 = vsyncadd (!%p6894_p8), %s6352_s20, 4294967168  ;;  %s6361_s26 = scalar_lea.sflag [#allocation5], %s6351_s12 }
 0x6ac   : > { %7055 = dma.done.wait (!%p6894_p8), %s6361_s26, 512  }
 0x6ad   : > { %7057 = vsyncadd (!%p6894_p8), %s6361_s26, 4294966784  ;;  %p22_p5 = scmp.ge.s32.totalorder %s7157_s11, 4   ;;  %s9446_s27 = smov %s7064_s28 }
 0x6ae   : > { %s9447_s28 = smov %s7068_s29  ;;  %s9448_s29 = smov %s7168_s14 }
 0x6af   : > { %s9449_s30 = smov %s7157_s11  ;;  %24 = sbr.rel (!%p22_p5) target bundleno = 8 (0x8), region = 103 }
 0x6b6   :  { %6366 = vsyncpa [#allocation3], 1 }
 0x6b7   :  { %6368 = vsyncpa [#allocation3 + $0x1], 1 }
 0x6b8   :  { %6369 = vsyncpa [#allocation5], 1 }
 0x6b9   :  { %6371 = vsyncpa [#allocation5 + $0x1], 1 }

</bundles_post_ra>
